<compile_context>
chip_gen: v5e
topology: v5e:2x2
jax: 0.10.0
libtpu: 0.0.40
codegen_flags: <defaults>
</compile_context>

<pallas_src>
import math
import jax
import jax.numpy as jnp
from jax import lax
from jax.experimental import pallas as pl
from jax.experimental.pallas import tpu as pltpu


# ----------------------------------------------------------------------------
# Fused Pallas kernel
# ----------------------------------------------------------------------------
def make_lstm_block_kernel(num_layers, B, W, D):
    """Builds the fused kernel.

    Ref layout (all f32):
      x_a_ref   : (W*B, D)          time-major flattened input for lstm1a
      x_b_ref   : (D*B, W)          time-major flattened input for lstm1b
      x_skip_ref: (B, W, D)         skip connection input
      w_ref     : (2L, R, 4H)       packed per-(stack,layer) weights, R = In_max+H+1
                                    rows [0:In)      = W_ih^T  (zero-padded to In_max)
                                    rows [In_max:+H) = W_hh^T
                                    row  [In_max+H]  = bias (b_ih + b_hh)
      p_ref     : (W, W+D+1)        proj weight with bias as last column
      out_ref   : (B, W, D)
    Scratch:
      gx_a_scr  : (W*B, 4H)   hoisted input projections, stack a
      gx_b_scr  : (D*B, 4H)   hoisted input projections, stack b
      seq_a_scr : (W*B, H)    time-major hidden sequence, stack a
      seq_b_scr : (D*B, H)    time-major hidden sequence, stack b
    """
    H = D
    In_max = max(W, D)

    def lstm_cell(gx, h, c, whh):
        # One packed matmul for all four gates (PyTorch gate order: i, f, g, o),
        # then packed sigmoid/tanh and lane slices.
        gates = gx + jnp.dot(h, whh, preferred_element_type=jnp.float32)  # (B, 4H)
        sig = jax.nn.sigmoid(gates)
        th = jnp.tanh(gates)
        i_t = sig[:, 0:H]
        f_t = sig[:, H:2 * H]
        g_t = th[:, 2 * H:3 * H]
        o_t = sig[:, 3 * H:4 * H]
        c_new = f_t * c + i_t * g_t
        h_new = o_t * jnp.tanh(c_new)
        return h_new, c_new

    def kernel(x_a_ref, x_b_ref, x_skip_ref, w_ref, p_ref, out_ref,
               gx_a_scr, gx_b_scr, seq_a_scr, seq_b_scr):
        for li in range(num_layers):
            # ---- per-layer weights (both stacks), sliced once ---------------
            wa = w_ref[li]                     # (R, 4H)
            wb = w_ref[num_layers + li]        # (R, 4H)
            in_a = D
            in_b = W if li == 0 else D
            wih_a = wa[0:in_a, :]
            whh_a = wa[In_max:In_max + H, :]
            bias_a = wa[In_max + H:In_max + H + 1, :]
            wih_b = wb[0:in_b, :]
            whh_b = wb[In_max:In_max + H, :]
            bias_b = wb[In_max + H:In_max + H + 1, :]

            # ---- batched input projection (one matmul per stack per layer) --
            xin_a = x_a_ref[...] if li == 0 else seq_a_scr[...]   # (W*B, in_a)
            xin_b = x_b_ref[...] if li == 0 else seq_b_scr[...]   # (D*B, in_b)
            gx_a_scr[...] = (jnp.dot(xin_a, wih_a,
                                     preferred_element_type=jnp.float32) + bias_a)
            gx_b_scr[...] = (jnp.dot(xin_b, wih_b,
                                     preferred_element_type=jnp.float32) + bias_b)

            # ---- interleaved recurrences: two independent latency chains ----
            h_a = jnp.zeros((B, H), jnp.float32)
            c_a = jnp.zeros((B, H), jnp.float32)
            h_b = jnp.zeros((B, H), jnp.float32)
            c_b = jnp.zeros((B, H), jnp.float32)
            for t in range(max(W, D)):
                if t < W:
                    h_a, c_a = lstm_cell(gx_a_scr[t * B:(t + 1) * B, :],
                                         h_a, c_a, whh_a)
                    seq_a_scr[t * B:(t + 1) * B, :] = h_a     # one full-block store
                if t < D:
                    h_b, c_b = lstm_cell(gx_b_scr[t * B:(t + 1) * B, :],
                                         h_b, c_b, whh_b)
                    seq_b_scr[t * B:(t + 1) * B, :] = h_b     # one full-block store

        # ---- projection + bias + skip (fully off the recurrent chain) -------
        pall = p_ref[...]                     # (W, W+D+1)
        p_a = pall[:, 0:W]                    # (W, W)   -> multiplies out1a
        p_b = pall[:, W:W + D]                # (W, D)   -> multiplies out1b
        pb = pall[:, W + D:W + D + 1]         # (W, 1)   bias column
        for b_i in range(B):
            # strided reads pull the per-batch (T, H) slab out of the
            # time-major sequence scratch (rows b, b+B, b+2B, ...)
            a_b = seq_a_scr[pl.ds(b_i, W, stride=B), :]       # (W, D) = out1a[b]
            b_b = seq_b_scr[pl.ds(b_i, D, stride=B), :]       # (D, D) = out1b[b]
            y = (jnp.dot(p_a, a_b, preferred_element_type=jnp.float32)
                 + jnp.dot(p_b, b_b, preferred_element_type=jnp.float32)
                 + pb)
            out_ref[b_i] = y + x_skip_ref[b_i]

    return kernel


# ----------------------------------------------------------------------------
# Wrapper around pallas_call
# ----------------------------------------------------------------------------
def pack_lstm_weights(params_a, params_b, W, D):
    """Pack W_ih^T / W_hh^T / combined bias of every (stack, layer) into one
    (2L, In_max + H + 1, 4H) tensor (W_ih rows zero-padded to In_max)."""
    H = D
    In_max = max(W, D)
    R = In_max + H + 1
    blocks = []
    for (wih_t, whh_t, b) in list(params_a) + list(params_b):
        blk = jnp.zeros((R, 4 * H), jnp.float32)
        blk = blk.at[0:wih_t.shape[0], :].set(wih_t)
        blk = blk.at[In_max:In_max + H, :].set(whh_t)
        blk = blk.at[In_max + H, :].set(b.reshape(-1))
        blocks.append(blk)
    return jnp.stack(blocks, axis=0)


def lstm_block_forward(x, params_a, params_b, P, pbias):
    """Full LSTMBlock forward.  x: (B, W, D) float32."""
    B, W, D = x.shape
    num_layers = len(params_a)
    assert len(params_b) == num_layers

    # Time-major, batch-flattened layer-0 inputs (reshape done once in XLA).
    x_a = jnp.transpose(x, (1, 0, 2)).reshape(W * B, D)   # lstm1a: T=W, In=D
    x_b = jnp.transpose(x, (2, 0, 1)).reshape(D * B, W)   # lstm1b: T=D, In=W

    w_all = pack_lstm_weights(params_a, params_b, W, D)        # (2L, R, 4D)
    p_ext = jnp.concatenate([P, pbias.reshape(-1, 1)], axis=1)  # (W, W+D+1)

    inputs = [x_a, x_b, x, w_all, p_ext]

    def full_spec(arr):
        nd = arr.ndim
        return pl.BlockSpec(arr.shape, lambda i, _nd=nd: (0,) * _nd)

    kernel = make_lstm_block_kernel(num_layers, B, W, D)

    return pl.pallas_call(
        kernel,
        out_shape=jax.ShapeDtypeStruct((B, W, D), jnp.float32),
        grid=(1,),
        in_specs=[full_spec(a) for a in inputs],
        out_specs=pl.BlockSpec((B, W, D), lambda i: (0, 0, 0)),
        scratch_shapes=[
            pltpu.VMEM((W * B, 4 * D), jnp.float32),   # gx_a: hoisted x @ W_ih + b
            pltpu.VMEM((D * B, 4 * D), jnp.float32),   # gx_b
            pltpu.VMEM((W * B, D), jnp.float32),       # seq_a: time-major hidden seq
            pltpu.VMEM((D * B, D), jnp.float32),       # seq_b
        ],
        compiler_params=pltpu.CompilerParams(
            dimension_semantics=("arbitrary",),
        ),
    )(*inputs)


# ----------------------------------------------------------------------------
# Deterministic parameter init (PyTorch-style uniform(-1/sqrt(H), 1/sqrt(H)))
# ----------------------------------------------------------------------------
def init_lstm_params(key, num_layers, input_size, hidden_size):
    params = []
    bound = 1.0 / math.sqrt(hidden_size)
    for layer in range(num_layers):
        in_sz = input_size if layer == 0 else hidden_size
        key, k1, k2, k3, k4 = jax.random.split(key, 5)
        wih = jax.random.uniform(k1, (4 * hidden_size, in_sz), jnp.float32, -bound, bound)
        whh = jax.random.uniform(k2, (4 * hidden_size, hidden_size), jnp.float32, -bound, bound)
        bih = jax.random.uniform(k3, (4 * hidden_size,), jnp.float32, -bound, bound)
        bhh = jax.random.uniform(k4, (4 * hidden_size,), jnp.float32, -bound, bound)
        params.append((wih.T, whh.T, (bih + bhh).reshape(1, -1)))
    return key, params


# ----------------------------------------------------------------------------
# Pure-JAX reference (correctness cross-check)
# ----------------------------------------------------------------------------
def lstm_ref(x, layer_params):
    h_seq = x
    for wih_t, whh_t, b in layer_params:
        H = whh_t.shape[0]
        B = h_seq.shape[0]

        def step(carry, x_t, wih_t=wih_t, whh_t=whh_t, b=b, H=H):
            h, c = carry
            gates = x_t @ wih_t + h @ whh_t + b
            i = jax.nn.sigmoid(gates[:, :H])
            f = jax.nn.sigmoid(gates[:, H:2 * H])
            g = jnp.tanh(gates[:, 2 * H:3 * H])
            o = jax.nn.sigmoid(gates[:, 3 * H:])
            c = f * c + i * g
            h = o * jnp.tanh(c)
            return (h, c), h

        init = (jnp.zeros((B, H), jnp.float32), jnp.zeros((B, H), jnp.float32))
        _, hs = lax.scan(step, init, jnp.transpose(h_seq, (1, 0, 2)))
        h_seq = jnp.transpose(hs, (1, 0, 2))
    return h_seq


def lstm_block_ref(x, params_a, params_b, P, pbias):
    out1a = lstm_ref(x, params_a)
    out1b = lstm_ref(jnp.transpose(x, (0, 2, 1)), params_b)
    cat = jnp.concatenate([out1a, out1b], axis=1)
    y = jnp.einsum('bkd,wk->bwd', cat, P) + pbias[None, :, None]
    return y + x


# ----------------------------------------------------------------------------
if __name__ == "__main__":
    # Shapes implied by the module: x is (B, window_size, input_dim)
    B = 2
    WINDOW = 16   # window_size (sequence length)
    D = 8         # input_dim (feature dim == LSTM hidden size)
    NUM_LAYERS = 2

    key = jax.random.PRNGKey(0)
    key, kx = jax.random.split(key)
    x = jax.random.normal(kx, (B, WINDOW, D), dtype=jnp.float32)

    # lstm1a: input_size = D, hidden = D
    key, params_a = init_lstm_params(key, NUM_LAYERS, D, D)
    # lstm1b: input_size = WINDOW, hidden = D
    key, params_b = init_lstm_params(key, NUM_LAYERS, WINDOW, D)
    # proj: Linear(WINDOW + D -> WINDOW)
    bound = 1.0 / math.sqrt(WINDOW + D)
    key, kp, kb = jax.random.split(key, 3)
    P = jax.random.uniform(kp, (WINDOW, WINDOW + D), jnp.float32, -bound, bound)
    pbias = jax.random.uniform(kb, (WINDOW,), jnp.float32, -bound, bound)

    out = lstm_block_forward(x, params_a, params_b, P, pbias)
    out = jax.block_until_ready(out)

    ref = jax.block_until_ready(lstm_block_ref(x, params_a, params_b, P, pbias))
    assert out.shape == (B, WINDOW, D)
    assert jnp.allclose(out, ref, atol=1e-4, rtol=1e-4), "mismatch vs JAX reference"

    print("KERNEL_OK")
</pallas_src>

<mosaic_0001>
module attributes {stable_mosaic.version = 11 : i64} {
  func.func @kernel(%arg0: i32, %arg1: memref<32x8xf32, #tpu.memory_space<vmem>>, %arg2: memref<16x16xf32, #tpu.memory_space<vmem>>, %arg3: memref<2x16x8xf32, #tpu.memory_space<vmem>>, %arg4: memref<4x25x32xf32, #tpu.memory_space<vmem>>, %arg5: memref<16x25xf32, #tpu.memory_space<vmem>>, %arg6: memref<2x16x8xf32, #tpu.memory_space<vmem>>, %arg7: memref<32x32xf32, #tpu.memory_space<vmem>>, %arg8: memref<16x32xf32, #tpu.memory_space<vmem>>, %arg9: memref<32x8xf32, #tpu.memory_space<vmem>>, %arg10: memref<16x8xf32, #tpu.memory_space<vmem>>) attributes {dimension_semantics = [#tpu.dimension_semantics<arbitrary>], iteration_bounds = array<i64: 1>, scalar_prefetch = 0 : i64, scratch_operands = 4 : i64, tpu.core_type = #tpu.core_type<tc>, window_params = [{pipeline_mode = #tpu.pipeline_mode<synchronous>, transform_indices = @transform_0, window_bounds = array<i64: 32, 8>}, {pipeline_mode = #tpu.pipeline_mode<synchronous>, transform_indices = @transform_1, window_bounds = array<i64: 16, 16>}, {pipeline_mode = #tpu.pipeline_mode<synchronous>, transform_indices = @transform_2, window_bounds = array<i64: 2, 16, 8>}, {pipeline_mode = #tpu.pipeline_mode<synchronous>, transform_indices = @transform_3, window_bounds = array<i64: 4, 25, 32>}, {pipeline_mode = #tpu.pipeline_mode<synchronous>, transform_indices = @transform_4, window_bounds = array<i64: 16, 25>}, {pipeline_mode = #tpu.pipeline_mode<synchronous>, transform_indices = @transform_5, window_bounds = array<i64: 2, 16, 8>}]} {
    %c0 = arith.constant 0 : index
    %c0_0 = arith.constant 0 : index
    %c0_1 = arith.constant 0 : index
    %0 = vector.load %arg4[%c0, %c0_0, %c0_1] : memref<4x25x32xf32, #tpu.memory_space<vmem>>, vector<1x25x32xf32>
    %1 = vector.shape_cast %0 : vector<1x25x32xf32> to vector<25x32xf32>
    %c2 = arith.constant 2 : index
    %c0_2 = arith.constant 0 : index
    %c0_3 = arith.constant 0 : index
    %2 = vector.load %arg4[%c2, %c0_2, %c0_3] : memref<4x25x32xf32, #tpu.memory_space<vmem>>, vector<1x25x32xf32>
    %3 = vector.shape_cast %2 : vector<1x25x32xf32> to vector<25x32xf32>
    %4 = vector.extract_strided_slice %1 {offsets = [0, 0], sizes = [8, 32], strides = [1, 1]} : vector<25x32xf32> to vector<8x32xf32>
    %5 = vector.extract_strided_slice %1 {offsets = [16, 0], sizes = [8, 32], strides = [1, 1]} : vector<25x32xf32> to vector<8x32xf32>
    %6 = vector.extract_strided_slice %1 {offsets = [24, 0], sizes = [1, 32], strides = [1, 1]} : vector<25x32xf32> to vector<1x32xf32>
    %7 = vector.extract_strided_slice %3 {offsets = [0, 0], sizes = [16, 32], strides = [1, 1]} : vector<25x32xf32> to vector<16x32xf32>
    %8 = vector.extract_strided_slice %3 {offsets = [16, 0], sizes = [8, 32], strides = [1, 1]} : vector<25x32xf32> to vector<8x32xf32>
    %9 = vector.extract_strided_slice %3 {offsets = [24, 0], sizes = [1, 32], strides = [1, 1]} : vector<25x32xf32> to vector<1x32xf32>
    %c0_4 = arith.constant 0 : index
    %c0_5 = arith.constant 0 : index
    %10 = vector.load %arg1[%c0_4, %c0_5] : memref<32x8xf32, #tpu.memory_space<vmem>>, vector<32x8xf32>
    %c0_6 = arith.constant 0 : index
    %c0_7 = arith.constant 0 : index
    %11 = vector.load %arg2[%c0_6, %c0_7] : memref<16x16xf32, #tpu.memory_space<vmem>>, vector<16x16xf32>
    %cst = arith.constant dense<0.000000e+00> : vector<32x32xf32>
    %12 = tpu.matmul %10, %4, %cst {dimension_numbers = #tpu.dot_dimension_numbers<[1], [0], [0], [1], [0, 0, 1, 1], [], []>} : vector<32x8xf32>, vector<8x32xf32>, vector<32x32xf32> -> vector<32x32xf32>
    %13 = vector.broadcast %6 : vector<1x32xf32> to vector<32x32xf32>
    %14 = arith.addf %12, %13 : vector<32x32xf32>
    %c0_8 = arith.constant 0 : index
    %c0_9 = arith.constant 0 : index
    %15 = vector.load %arg7[%c0_8, %c0_9] : memref<32x32xf32, #tpu.memory_space<vmem>>, vector<32x32xf32>
    tpu.vector_store %arg7[%c0_8, %c0_9], %14 {strides = array<i32>} : memref<32x32xf32, #tpu.memory_space<vmem>>, vector<32x32xf32>,
    %cst_10 = arith.constant dense<0.000000e+00> : vector<16x32xf32>
    %16 = tpu.matmul %11, %7, %cst_10 {dimension_numbers = #tpu.dot_dimension_numbers<[1], [0], [0], [1], [0, 0, 1, 1], [], []>} : vector<16x16xf32>, vector<16x32xf32>, vector<16x32xf32> -> vector<16x32xf32>
    %17 = vector.broadcast %9 : vector<1x32xf32> to vector<16x32xf32>
    %18 = arith.addf %16, %17 : vector<16x32xf32>
    %c0_11 = arith.constant 0 : index
    %c0_12 = arith.constant 0 : index
    %19 = vector.load %arg8[%c0_11, %c0_12] : memref<16x32xf32, #tpu.memory_space<vmem>>, vector<16x32xf32>
    tpu.vector_store %arg8[%c0_11, %c0_12], %18 {strides = array<i32>} : memref<16x32xf32, #tpu.memory_space<vmem>>, vector<16x32xf32>,
    %cst_13 = arith.constant 0.000000e+00 : f32
    %20 = vector.broadcast %cst_13 : f32 to vector<2x8xf32>
    %cst_14 = arith.constant 0.000000e+00 : f32
    %21 = vector.broadcast %cst_14 : f32 to vector<2x8xf32>
    %cst_15 = arith.constant 0.000000e+00 : f32
    %22 = vector.broadcast %cst_15 : f32 to vector<2x8xf32>
    %cst_16 = arith.constant 0.000000e+00 : f32
    %23 = vector.broadcast %cst_16 : f32 to vector<2x8xf32>
    %c0_17 = arith.constant 0 : index
    %c0_18 = arith.constant 0 : index
    %24 = vector.load %arg7[%c0_17, %c0_18] : memref<32x32xf32, #tpu.memory_space<vmem>>, vector<2x32xf32>
    %cst_19 = arith.constant dense<0.000000e+00> : vector<2x32xf32>
    %25 = tpu.matmul %20, %5, %cst_19 {dimension_numbers = #tpu.dot_dimension_numbers<[1], [0], [0], [1], [0, 0, 1, 1], [], []>} : vector<2x8xf32>, vector<8x32xf32>, vector<2x32xf32> -> vector<2x32xf32>
    %26 = arith.addf %24, %25 : vector<2x32xf32>
    %27 = arith.negf %26 : vector<2x32xf32>
    %28 = math.exp %27 : vector<2x32xf32>
    %cst_20 = arith.constant 1.000000e+00 : f32
    %29 = vector.broadcast %cst_20 : f32 to vector<2x32xf32>
    %30 = arith.addf %29, %28 : vector<2x32xf32>
    %31 = arith.divf %29, %30 : vector<2x32xf32>
    %32 = math.tanh %26 : vector<2x32xf32>
    %33 = vector.extract_strided_slice %31 {offsets = [0, 0], sizes = [2, 8], strides = [1, 1]} : vector<2x32xf32> to vector<2x8xf32>
    %34 = vector.extract_strided_slice %31 {offsets = [0, 8], sizes = [2, 8], strides = [1, 1]} : vector<2x32xf32> to vector<2x8xf32>
    %35 = vector.extract_strided_slice %32 {offsets = [0, 16], sizes = [2, 8], strides = [1, 1]} : vector<2x32xf32> to vector<2x8xf32>
    %36 = vector.extract_strided_slice %31 {offsets = [0, 24], sizes = [2, 8], strides = [1, 1]} : vector<2x32xf32> to vector<2x8xf32>
    %37 = arith.mulf %34, %21 : vector<2x8xf32>
    %38 = arith.mulf %33, %35 : vector<2x8xf32>
    %39 = arith.addf %37, %38 : vector<2x8xf32>
    %40 = math.tanh %39 : vector<2x8xf32>
    %41 = arith.mulf %36, %40 : vector<2x8xf32>
    %c0_21 = arith.constant 0 : index
    %c0_22 = arith.constant 0 : index
    %42 = vector.load %arg9[%c0_21, %c0_22] : memref<32x8xf32, #tpu.memory_space<vmem>>, vector<2x8xf32>
    tpu.vector_store %arg9[%c0_21, %c0_22], %41 {strides = array<i32>} : memref<32x8xf32, #tpu.memory_space<vmem>>, vector<2x8xf32>,
    %c0_23 = arith.constant 0 : index
    %c0_24 = arith.constant 0 : index
    %43 = vector.load %arg8[%c0_23, %c0_24] : memref<16x32xf32, #tpu.memory_space<vmem>>, vector<2x32xf32>
    %cst_25 = arith.constant dense<0.000000e+00> : vector<2x32xf32>
    %44 = tpu.matmul %22, %8, %cst_25 {dimension_numbers = #tpu.dot_dimension_numbers<[1], [0], [0], [1], [0, 0, 1, 1], [], []>} : vector<2x8xf32>, vector<8x32xf32>, vector<2x32xf32> -> vector<2x32xf32>
    %45 = arith.addf %43, %44 : vector<2x32xf32>
    %46 = arith.negf %45 : vector<2x32xf32>
    %47 = math.exp %46 : vector<2x32xf32>
    %cst_26 = arith.constant 1.000000e+00 : f32
    %48 = vector.broadcast %cst_26 : f32 to vector<2x32xf32>
    %49 = arith.addf %48, %47 : vector<2x32xf32>
    %50 = arith.divf %48, %49 : vector<2x32xf32>
    %51 = math.tanh %45 : vector<2x32xf32>
    %52 = vector.extract_strided_slice %50 {offsets = [0, 0], sizes = [2, 8], strides = [1, 1]} : vector<2x32xf32> to vector<2x8xf32>
    %53 = vector.extract_strided_slice %50 {offsets = [0, 8], sizes = [2, 8], strides = [1, 1]} : vector<2x32xf32> to vector<2x8xf32>
    %54 = vector.extract_strided_slice %51 {offsets = [0, 16], sizes = [2, 8], strides = [1, 1]} : vector<2x32xf32> to vector<2x8xf32>
    %55 = vector.extract_strided_slice %50 {offsets = [0, 24], sizes = [2, 8], strides = [1, 1]} : vector<2x32xf32> to vector<2x8xf32>
    %56 = arith.mulf %53, %23 : vector<2x8xf32>
    %57 = arith.mulf %52, %54 : vector<2x8xf32>
    %58 = arith.addf %56, %57 : vector<2x8xf32>
    %59 = math.tanh %58 : vector<2x8xf32>
    %60 = arith.mulf %55, %59 : vector<2x8xf32>
    %c0_27 = arith.constant 0 : index
    %c0_28 = arith.constant 0 : index
    %61 = vector.load %arg10[%c0_27, %c0_28] : memref<16x8xf32, #tpu.memory_space<vmem>>, vector<2x8xf32>
    tpu.vector_store %arg10[%c0_27, %c0_28], %60 {strides = array<i32>} : memref<16x8xf32, #tpu.memory_space<vmem>>, vector<2x8xf32>,
    %c2_29 = arith.constant 2 : index
    %c0_30 = arith.constant 0 : index
    %62 = vector.load %arg7[%c2_29, %c0_30] : memref<32x32xf32, #tpu.memory_space<vmem>>, vector<2x32xf32>
    %cst_31 = arith.constant dense<0.000000e+00> : vector<2x32xf32>
    %63 = tpu.matmul %41, %5, %cst_31 {dimension_numbers = #tpu.dot_dimension_numbers<[1], [0], [0], [1], [0, 0, 1, 1], [], []>} : vector<2x8xf32>, vector<8x32xf32>, vector<2x32xf32> -> vector<2x32xf32>
    %64 = arith.addf %62, %63 : vector<2x32xf32>
    %65 = arith.negf %64 : vector<2x32xf32>
    %66 = math.exp %65 : vector<2x32xf32>
    %cst_32 = arith.constant 1.000000e+00 : f32
    %67 = vector.broadcast %cst_32 : f32 to vector<2x32xf32>
    %68 = arith.addf %67, %66 : vector<2x32xf32>
    %69 = arith.divf %67, %68 : vector<2x32xf32>
    %70 = math.tanh %64 : vector<2x32xf32>
    %71 = vector.extract_strided_slice %69 {offsets = [0, 0], sizes = [2, 8], strides = [1, 1]} : vector<2x32xf32> to vector<2x8xf32>
    %72 = vector.extract_strided_slice %69 {offsets = [0, 8], sizes = [2, 8], strides = [1, 1]} : vector<2x32xf32> to vector<2x8xf32>
    %73 = vector.extract_strided_slice %70 {offsets = [0, 16], sizes = [2, 8], strides = [1, 1]} : vector<2x32xf32> to vector<2x8xf32>
    %74 = vector.extract_strided_slice %69 {offsets = [0, 24], sizes = [2, 8], strides = [1, 1]} : vector<2x32xf32> to vector<2x8xf32>
    %75 = arith.mulf %72, %39 : vector<2x8xf32>
    %76 = arith.mulf %71, %73 : vector<2x8xf32>
    %77 = arith.addf %75, %76 : vector<2x8xf32>
    %78 = math.tanh %77 : vector<2x8xf32>
    %79 = arith.mulf %74, %78 : vector<2x8xf32>
    %c2_33 = arith.constant 2 : index
    %c0_34 = arith.constant 0 : index
    %80 = vector.load %arg9[%c2_33, %c0_34] : memref<32x8xf32, #tpu.memory_space<vmem>>, vector<2x8xf32>
    tpu.vector_store %arg9[%c2_33, %c0_34], %79 {strides = array<i32>} : memref<32x8xf32, #tpu.memory_space<vmem>>, vector<2x8xf32>,
    %c2_35 = arith.constant 2 : index
    %c0_36 = arith.constant 0 : index
    %81 = vector.load %arg8[%c2_35, %c0_36] : memref<16x32xf32, #tpu.memory_space<vmem>>, vector<2x32xf32>
    %cst_37 = arith.constant dense<0.000000e+00> : vector<2x32xf32>
    %82 = tpu.matmul %60, %8, %cst_37 {dimension_numbers = #tpu.dot_dimension_numbers<[1], [0], [0], [1], [0, 0, 1, 1], [], []>} : vector<2x8xf32>, vector<8x32xf32>, vector<2x32xf32> -> vector<2x32xf32>
    %83 = arith.addf %81, %82 : vector<2x32xf32>
    %84 = arith.negf %83 : vector<2x32xf32>
    %85 = math.exp %84 : vector<2x32xf32>
    %cst_38 = arith.constant 1.000000e+00 : f32
    %86 = vector.broadcast %cst_38 : f32 to vector<2x32xf32>
    %87 = arith.addf %86, %85 : vector<2x32xf32>
    %88 = arith.divf %86, %87 : vector<2x32xf32>
    %89 = math.tanh %83 : vector<2x32xf32>
    %90 = vector.extract_strided_slice %88 {offsets = [0, 0], sizes = [2, 8], strides = [1, 1]} : vector<2x32xf32> to vector<2x8xf32>
    %91 = vector.extract_strided_slice %88 {offsets = [0, 8], sizes = [2, 8], strides = [1, 1]} : vector<2x32xf32> to vector<2x8xf32>
    %92 = vector.extract_strided_slice %89 {offsets = [0, 16], sizes = [2, 8], strides = [1, 1]} : vector<2x32xf32> to vector<2x8xf32>
    %93 = vector.extract_strided_slice %88 {offsets = [0, 24], sizes = [2, 8], strides = [1, 1]} : vector<2x32xf32> to vector<2x8xf32>
    %94 = arith.mulf %91, %58 : vector<2x8xf32>
    %95 = arith.mulf %90, %92 : vector<2x8xf32>
    %96 = arith.addf %94, %95 : vector<2x8xf32>
    %97 = math.tanh %96 : vector<2x8xf32>
    %98 = arith.mulf %93, %97 : vector<2x8xf32>
    %c2_39 = arith.constant 2 : index
    %c0_40 = arith.constant 0 : index
    %99 = vector.load %arg10[%c2_39, %c0_40] : memref<16x8xf32, #tpu.memory_space<vmem>>, vector<2x8xf32>
    tpu.vector_store %arg10[%c2_39, %c0_40], %98 {strides = array<i32>} : memref<16x8xf32, #tpu.memory_space<vmem>>, vector<2x8xf32>,
    %c4 = arith.constant 4 : index
    %c0_41 = arith.constant 0 : index
    %100 = vector.load %arg7[%c4, %c0_41] : memref<32x32xf32, #tpu.memory_space<vmem>>, vector<2x32xf32>
    %cst_42 = arith.constant dense<0.000000e+00> : vector<2x32xf32>
    %101 = tpu.matmul %79, %5, %cst_42 {dimension_numbers = #tpu.dot_dimension_numbers<[1], [0], [0], [1], [0, 0, 1, 1], [], []>} : vector<2x8xf32>, vector<8x32xf32>, vector<2x32xf32> -> vector<2x32xf32>
    %102 = arith.addf %100, %101 : vector<2x32xf32>
    %103 = arith.negf %102 : vector<2x32xf32>
    %104 = math.exp %103 : vector<2x32xf32>
    %cst_43 = arith.constant 1.000000e+00 : f32
    %105 = vector.broadcast %cst_43 : f32 to vector<2x32xf32>
    %106 = arith.addf %105, %104 : vector<2x32xf32>
    %107 = arith.divf %105, %106 : vector<2x32xf32>
    %108 = math.tanh %102 : vector<2x32xf32>
    %109 = vector.extract_strided_slice %107 {offsets = [0, 0], sizes = [2, 8], strides = [1, 1]} : vector<2x32xf32> to vector<2x8xf32>
    %110 = vector.extract_strided_slice %107 {offsets = [0, 8], sizes = [2, 8], strides = [1, 1]} : vector<2x32xf32> to vector<2x8xf32>
    %111 = vector.extract_strided_slice %108 {offsets = [0, 16], sizes = [2, 8], strides = [1, 1]} : vector<2x32xf32> to vector<2x8xf32>
    %112 = vector.extract_strided_slice %107 {offsets = [0, 24], sizes = [2, 8], strides = [1, 1]} : vector<2x32xf32> to vector<2x8xf32>
    %113 = arith.mulf %110, %77 : vector<2x8xf32>
    %114 = arith.mulf %109, %111 : vector<2x8xf32>
    %115 = arith.addf %113, %114 : vector<2x8xf32>
    %116 = math.tanh %115 : vector<2x8xf32>
    %117 = arith.mulf %112, %116 : vector<2x8xf32>
    %c4_44 = arith.constant 4 : index
    %c0_45 = arith.constant 0 : index
    %118 = vector.load %arg9[%c4_44, %c0_45] : memref<32x8xf32, #tpu.memory_space<vmem>>, vector<2x8xf32>
    tpu.vector_store %arg9[%c4_44, %c0_45], %117 {strides = array<i32>} : memref<32x8xf32, #tpu.memory_space<vmem>>, vector<2x8xf32>,
    %c4_46 = arith.constant 4 : index
    %c0_47 = arith.constant 0 : index
    %119 = vector.load %arg8[%c4_46, %c0_47] : memref<16x32xf32, #tpu.memory_space<vmem>>, vector<2x32xf32>
    %cst_48 = arith.constant dense<0.000000e+00> : vector<2x32xf32>
    %120 = tpu.matmul %98, %8, %cst_48 {dimension_numbers = #tpu.dot_dimension_numbers<[1], [0], [0], [1], [0, 0, 1, 1], [], []>} : vector<2x8xf32>, vector<8x32xf32>, vector<2x32xf32> -> vector<2x32xf32>
    %121 = arith.addf %119, %120 : vector<2x32xf32>
    %122 = arith.negf %121 : vector<2x32xf32>
    %123 = math.exp %122 : vector<2x32xf32>
    %cst_49 = arith.constant 1.000000e+00 : f32
    %124 = vector.broadcast %cst_49 : f32 to vector<2x32xf32>
    %125 = arith.addf %124, %123 : vector<2x32xf32>
    %126 = arith.divf %124, %125 : vector<2x32xf32>
    %127 = math.tanh %121 : vector<2x32xf32>
    %128 = vector.extract_strided_slice %126 {offsets = [0, 0], sizes = [2, 8], strides = [1, 1]} : vector<2x32xf32> to vector<2x8xf32>
    %129 = vector.extract_strided_slice %126 {offsets = [0, 8], sizes = [2, 8], strides = [1, 1]} : vector<2x32xf32> to vector<2x8xf32>
    %130 = vector.extract_strided_slice %127 {offsets = [0, 16], sizes = [2, 8], strides = [1, 1]} : vector<2x32xf32> to vector<2x8xf32>
    %131 = vector.extract_strided_slice %126 {offsets = [0, 24], sizes = [2, 8], strides = [1, 1]} : vector<2x32xf32> to vector<2x8xf32>
    %132 = arith.mulf %129, %96 : vector<2x8xf32>
    %133 = arith.mulf %128, %130 : vector<2x8xf32>
    %134 = arith.addf %132, %133 : vector<2x8xf32>
    %135 = math.tanh %134 : vector<2x8xf32>
    %136 = arith.mulf %131, %135 : vector<2x8xf32>
    %c4_50 = arith.constant 4 : index
    %c0_51 = arith.constant 0 : index
    %137 = vector.load %arg10[%c4_50, %c0_51] : memref<16x8xf32, #tpu.memory_space<vmem>>, vector<2x8xf32>
    tpu.vector_store %arg10[%c4_50, %c0_51], %136 {strides = array<i32>} : memref<16x8xf32, #tpu.memory_space<vmem>>, vector<2x8xf32>,
    %c6 = arith.constant 6 : index
    %c0_52 = arith.constant 0 : index
    %138 = vector.load %arg7[%c6, %c0_52] : memref<32x32xf32, #tpu.memory_space<vmem>>, vector<2x32xf32>
    %cst_53 = arith.constant dense<0.000000e+00> : vector<2x32xf32>
    %139 = tpu.matmul %117, %5, %cst_53 {dimension_numbers = #tpu.dot_dimension_numbers<[1], [0], [0], [1], [0, 0, 1, 1], [], []>} : vector<2x8xf32>, vector<8x32xf32>, vector<2x32xf32> -> vector<2x32xf32>
    %140 = arith.addf %138, %139 : vector<2x32xf32>
    %141 = arith.negf %140 : vector<2x32xf32>
    %142 = math.exp %141 : vector<2x32xf32>
    %cst_54 = arith.constant 1.000000e+00 : f32
    %143 = vector.broadcast %cst_54 : f32 to vector<2x32xf32>
    %144 = arith.addf %143, %142 : vector<2x32xf32>
    %145 = arith.divf %143, %144 : vector<2x32xf32>
    %146 = math.tanh %140 : vector<2x32xf32>
    %147 = vector.extract_strided_slice %145 {offsets = [0, 0], sizes = [2, 8], strides = [1, 1]} : vector<2x32xf32> to vector<2x8xf32>
    %148 = vector.extract_strided_slice %145 {offsets = [0, 8], sizes = [2, 8], strides = [1, 1]} : vector<2x32xf32> to vector<2x8xf32>
    %149 = vector.extract_strided_slice %146 {offsets = [0, 16], sizes = [2, 8], strides = [1, 1]} : vector<2x32xf32> to vector<2x8xf32>
    %150 = vector.extract_strided_slice %145 {offsets = [0, 24], sizes = [2, 8], strides = [1, 1]} : vector<2x32xf32> to vector<2x8xf32>
    %151 = arith.mulf %148, %115 : vector<2x8xf32>
    %152 = arith.mulf %147, %149 : vector<2x8xf32>
    %153 = arith.addf %151, %152 : vector<2x8xf32>
    %154 = math.tanh %153 : vector<2x8xf32>
    %155 = arith.mulf %150, %154 : vector<2x8xf32>
    %c6_55 = arith.constant 6 : index
    %c0_56 = arith.constant 0 : index
    %156 = vector.load %arg9[%c6_55, %c0_56] : memref<32x8xf32, #tpu.memory_space<vmem>>, vector<2x8xf32>
    tpu.vector_store %arg9[%c6_55, %c0_56], %155 {strides = array<i32>} : memref<32x8xf32, #tpu.memory_space<vmem>>, vector<2x8xf32>,
    %c6_57 = arith.constant 6 : index
    %c0_58 = arith.constant 0 : index
    %157 = vector.load %arg8[%c6_57, %c0_58] : memref<16x32xf32, #tpu.memory_space<vmem>>, vector<2x32xf32>
    %cst_59 = arith.constant dense<0.000000e+00> : vector<2x32xf32>
    %158 = tpu.matmul %136, %8, %cst_59 {dimension_numbers = #tpu.dot_dimension_numbers<[1], [0], [0], [1], [0, 0, 1, 1], [], []>} : vector<2x8xf32>, vector<8x32xf32>, vector<2x32xf32> -> vector<2x32xf32>
    %159 = arith.addf %157, %158 : vector<2x32xf32>
    %160 = arith.negf %159 : vector<2x32xf32>
    %161 = math.exp %160 : vector<2x32xf32>
    %cst_60 = arith.constant 1.000000e+00 : f32
    %162 = vector.broadcast %cst_60 : f32 to vector<2x32xf32>
    %163 = arith.addf %162, %161 : vector<2x32xf32>
    %164 = arith.divf %162, %163 : vector<2x32xf32>
    %165 = math.tanh %159 : vector<2x32xf32>
    %166 = vector.extract_strided_slice %164 {offsets = [0, 0], sizes = [2, 8], strides = [1, 1]} : vector<2x32xf32> to vector<2x8xf32>
    %167 = vector.extract_strided_slice %164 {offsets = [0, 8], sizes = [2, 8], strides = [1, 1]} : vector<2x32xf32> to vector<2x8xf32>
    %168 = vector.extract_strided_slice %165 {offsets = [0, 16], sizes = [2, 8], strides = [1, 1]} : vector<2x32xf32> to vector<2x8xf32>
    %169 = vector.extract_strided_slice %164 {offsets = [0, 24], sizes = [2, 8], strides = [1, 1]} : vector<2x32xf32> to vector<2x8xf32>
    %170 = arith.mulf %167, %134 : vector<2x8xf32>
    %171 = arith.mulf %166, %168 : vector<2x8xf32>
    %172 = arith.addf %170, %171 : vector<2x8xf32>
    %173 = math.tanh %172 : vector<2x8xf32>
    %174 = arith.mulf %169, %173 : vector<2x8xf32>
    %c6_61 = arith.constant 6 : index
    %c0_62 = arith.constant 0 : index
    %175 = vector.load %arg10[%c6_61, %c0_62] : memref<16x8xf32, #tpu.memory_space<vmem>>, vector<2x8xf32>
    tpu.vector_store %arg10[%c6_61, %c0_62], %174 {strides = array<i32>} : memref<16x8xf32, #tpu.memory_space<vmem>>, vector<2x8xf32>,
    %c8 = arith.constant 8 : index
    %c0_63 = arith.constant 0 : index
    %176 = vector.load %arg7[%c8, %c0_63] : memref<32x32xf32, #tpu.memory_space<vmem>>, vector<2x32xf32>
    %cst_64 = arith.constant dense<0.000000e+00> : vector<2x32xf32>
    %177 = tpu.matmul %155, %5, %cst_64 {dimension_numbers = #tpu.dot_dimension_numbers<[1], [0], [0], [1], [0, 0, 1, 1], [], []>} : vector<2x8xf32>, vector<8x32xf32>, vector<2x32xf32> -> vector<2x32xf32>
    %178 = arith.addf %176, %177 : vector<2x32xf32>
    %179 = arith.negf %178 : vector<2x32xf32>
    %180 = math.exp %179 : vector<2x32xf32>
    %cst_65 = arith.constant 1.000000e+00 : f32
    %181 = vector.broadcast %cst_65 : f32 to vector<2x32xf32>
    %182 = arith.addf %181, %180 : vector<2x32xf32>
    %183 = arith.divf %181, %182 : vector<2x32xf32>
    %184 = math.tanh %178 : vector<2x32xf32>
    %185 = vector.extract_strided_slice %183 {offsets = [0, 0], sizes = [2, 8], strides = [1, 1]} : vector<2x32xf32> to vector<2x8xf32>
    %186 = vector.extract_strided_slice %183 {offsets = [0, 8], sizes = [2, 8], strides = [1, 1]} : vector<2x32xf32> to vector<2x8xf32>
    %187 = vector.extract_strided_slice %184 {offsets = [0, 16], sizes = [2, 8], strides = [1, 1]} : vector<2x32xf32> to vector<2x8xf32>
    %188 = vector.extract_strided_slice %183 {offsets = [0, 24], sizes = [2, 8], strides = [1, 1]} : vector<2x32xf32> to vector<2x8xf32>
    %189 = arith.mulf %186, %153 : vector<2x8xf32>
    %190 = arith.mulf %185, %187 : vector<2x8xf32>
    %191 = arith.addf %189, %190 : vector<2x8xf32>
    %192 = math.tanh %191 : vector<2x8xf32>
    %193 = arith.mulf %188, %192 : vector<2x8xf32>
    %c8_66 = arith.constant 8 : index
    %c0_67 = arith.constant 0 : index
    %194 = vector.load %arg9[%c8_66, %c0_67] : memref<32x8xf32, #tpu.memory_space<vmem>>, vector<2x8xf32>
    tpu.vector_store %arg9[%c8_66, %c0_67], %193 {strides = array<i32>} : memref<32x8xf32, #tpu.memory_space<vmem>>, vector<2x8xf32>,
    %c8_68 = arith.constant 8 : index
    %c0_69 = arith.constant 0 : index
    %195 = vector.load %arg8[%c8_68, %c0_69] : memref<16x32xf32, #tpu.memory_space<vmem>>, vector<2x32xf32>
    %cst_70 = arith.constant dense<0.000000e+00> : vector<2x32xf32>
    %196 = tpu.matmul %174, %8, %cst_70 {dimension_numbers = #tpu.dot_dimension_numbers<[1], [0], [0], [1], [0, 0, 1, 1], [], []>} : vector<2x8xf32>, vector<8x32xf32>, vector<2x32xf32> -> vector<2x32xf32>
    %197 = arith.addf %195, %196 : vector<2x32xf32>
    %198 = arith.negf %197 : vector<2x32xf32>
    %199 = math.exp %198 : vector<2x32xf32>
    %cst_71 = arith.constant 1.000000e+00 : f32
    %200 = vector.broadcast %cst_71 : f32 to vector<2x32xf32>
    %201 = arith.addf %200, %199 : vector<2x32xf32>
    %202 = arith.divf %200, %201 : vector<2x32xf32>
    %203 = math.tanh %197 : vector<2x32xf32>
    %204 = vector.extract_strided_slice %202 {offsets = [0, 0], sizes = [2, 8], strides = [1, 1]} : vector<2x32xf32> to vector<2x8xf32>
    %205 = vector.extract_strided_slice %202 {offsets = [0, 8], sizes = [2, 8], strides = [1, 1]} : vector<2x32xf32> to vector<2x8xf32>
    %206 = vector.extract_strided_slice %203 {offsets = [0, 16], sizes = [2, 8], strides = [1, 1]} : vector<2x32xf32> to vector<2x8xf32>
    %207 = vector.extract_strided_slice %202 {offsets = [0, 24], sizes = [2, 8], strides = [1, 1]} : vector<2x32xf32> to vector<2x8xf32>
    %208 = arith.mulf %205, %172 : vector<2x8xf32>
    %209 = arith.mulf %204, %206 : vector<2x8xf32>
    %210 = arith.addf %208, %209 : vector<2x8xf32>
    %211 = math.tanh %210 : vector<2x8xf32>
    %212 = arith.mulf %207, %211 : vector<2x8xf32>
    %c8_72 = arith.constant 8 : index
    %c0_73 = arith.constant 0 : index
    %213 = vector.load %arg10[%c8_72, %c0_73] : memref<16x8xf32, #tpu.memory_space<vmem>>, vector<2x8xf32>
    tpu.vector_store %arg10[%c8_72, %c0_73], %212 {strides = array<i32>} : memref<16x8xf32, #tpu.memory_space<vmem>>, vector<2x8xf32>,
    %c10 = arith.constant 10 : index
    %c0_74 = arith.constant 0 : index
    %214 = vector.load %arg7[%c10, %c0_74] : memref<32x32xf32, #tpu.memory_space<vmem>>, vector<2x32xf32>
    %cst_75 = arith.constant dense<0.000000e+00> : vector<2x32xf32>
    %215 = tpu.matmul %193, %5, %cst_75 {dimension_numbers = #tpu.dot_dimension_numbers<[1], [0], [0], [1], [0, 0, 1, 1], [], []>} : vector<2x8xf32>, vector<8x32xf32>, vector<2x32xf32> -> vector<2x32xf32>
    %216 = arith.addf %214, %215 : vector<2x32xf32>
    %217 = arith.negf %216 : vector<2x32xf32>
    %218 = math.exp %217 : vector<2x32xf32>
    %cst_76 = arith.constant 1.000000e+00 : f32
    %219 = vector.broadcast %cst_76 : f32 to vector<2x32xf32>
    %220 = arith.addf %219, %218 : vector<2x32xf32>
    %221 = arith.divf %219, %220 : vector<2x32xf32>
    %222 = math.tanh %216 : vector<2x32xf32>
    %223 = vector.extract_strided_slice %221 {offsets = [0, 0], sizes = [2, 8], strides = [1, 1]} : vector<2x32xf32> to vector<2x8xf32>
    %224 = vector.extract_strided_slice %221 {offsets = [0, 8], sizes = [2, 8], strides = [1, 1]} : vector<2x32xf32> to vector<2x8xf32>
    %225 = vector.extract_strided_slice %222 {offsets = [0, 16], sizes = [2, 8], strides = [1, 1]} : vector<2x32xf32> to vector<2x8xf32>
    %226 = vector.extract_strided_slice %221 {offsets = [0, 24], sizes = [2, 8], strides = [1, 1]} : vector<2x32xf32> to vector<2x8xf32>
    %227 = arith.mulf %224, %191 : vector<2x8xf32>
    %228 = arith.mulf %223, %225 : vector<2x8xf32>
    %229 = arith.addf %227, %228 : vector<2x8xf32>
    %230 = math.tanh %229 : vector<2x8xf32>
    %231 = arith.mulf %226, %230 : vector<2x8xf32>
    %c10_77 = arith.constant 10 : index
    %c0_78 = arith.constant 0 : index
    %232 = vector.load %arg9[%c10_77, %c0_78] : memref<32x8xf32, #tpu.memory_space<vmem>>, vector<2x8xf32>
    tpu.vector_store %arg9[%c10_77, %c0_78], %231 {strides = array<i32>} : memref<32x8xf32, #tpu.memory_space<vmem>>, vector<2x8xf32>,
    %c10_79 = arith.constant 10 : index
    %c0_80 = arith.constant 0 : index
    %233 = vector.load %arg8[%c10_79, %c0_80] : memref<16x32xf32, #tpu.memory_space<vmem>>, vector<2x32xf32>
    %cst_81 = arith.constant dense<0.000000e+00> : vector<2x32xf32>
    %234 = tpu.matmul %212, %8, %cst_81 {dimension_numbers = #tpu.dot_dimension_numbers<[1], [0], [0], [1], [0, 0, 1, 1], [], []>} : vector<2x8xf32>, vector<8x32xf32>, vector<2x32xf32> -> vector<2x32xf32>
    %235 = arith.addf %233, %234 : vector<2x32xf32>
    %236 = arith.negf %235 : vector<2x32xf32>
    %237 = math.exp %236 : vector<2x32xf32>
    %cst_82 = arith.constant 1.000000e+00 : f32
    %238 = vector.broadcast %cst_82 : f32 to vector<2x32xf32>
    %239 = arith.addf %238, %237 : vector<2x32xf32>
    %240 = arith.divf %238, %239 : vector<2x32xf32>
    %241 = math.tanh %235 : vector<2x32xf32>
    %242 = vector.extract_strided_slice %240 {offsets = [0, 0], sizes = [2, 8], strides = [1, 1]} : vector<2x32xf32> to vector<2x8xf32>
    %243 = vector.extract_strided_slice %240 {offsets = [0, 8], sizes = [2, 8], strides = [1, 1]} : vector<2x32xf32> to vector<2x8xf32>
    %244 = vector.extract_strided_slice %241 {offsets = [0, 16], sizes = [2, 8], strides = [1, 1]} : vector<2x32xf32> to vector<2x8xf32>
    %245 = vector.extract_strided_slice %240 {offsets = [0, 24], sizes = [2, 8], strides = [1, 1]} : vector<2x32xf32> to vector<2x8xf32>
    %246 = arith.mulf %243, %210 : vector<2x8xf32>
    %247 = arith.mulf %242, %244 : vector<2x8xf32>
    %248 = arith.addf %246, %247 : vector<2x8xf32>
    %249 = math.tanh %248 : vector<2x8xf32>
    %250 = arith.mulf %245, %249 : vector<2x8xf32>
    %c10_83 = arith.constant 10 : index
    %c0_84 = arith.constant 0 : index
    %251 = vector.load %arg10[%c10_83, %c0_84] : memref<16x8xf32, #tpu.memory_space<vmem>>, vector<2x8xf32>
    tpu.vector_store %arg10[%c10_83, %c0_84], %250 {strides = array<i32>} : memref<16x8xf32, #tpu.memory_space<vmem>>, vector<2x8xf32>,
    %c12 = arith.constant 12 : index
    %c0_85 = arith.constant 0 : index
    %252 = vector.load %arg7[%c12, %c0_85] : memref<32x32xf32, #tpu.memory_space<vmem>>, vector<2x32xf32>
    %cst_86 = arith.constant dense<0.000000e+00> : vector<2x32xf32>
    %253 = tpu.matmul %231, %5, %cst_86 {dimension_numbers = #tpu.dot_dimension_numbers<[1], [0], [0], [1], [0, 0, 1, 1], [], []>} : vector<2x8xf32>, vector<8x32xf32>, vector<2x32xf32> -> vector<2x32xf32>
    %254 = arith.addf %252, %253 : vector<2x32xf32>
    %255 = arith.negf %254 : vector<2x32xf32>
    %256 = math.exp %255 : vector<2x32xf32>
    %cst_87 = arith.constant 1.000000e+00 : f32
    %257 = vector.broadcast %cst_87 : f32 to vector<2x32xf32>
    %258 = arith.addf %257, %256 : vector<2x32xf32>
    %259 = arith.divf %257, %258 : vector<2x32xf32>
    %260 = math.tanh %254 : vector<2x32xf32>
    %261 = vector.extract_strided_slice %259 {offsets = [0, 0], sizes = [2, 8], strides = [1, 1]} : vector<2x32xf32> to vector<2x8xf32>
    %262 = vector.extract_strided_slice %259 {offsets = [0, 8], sizes = [2, 8], strides = [1, 1]} : vector<2x32xf32> to vector<2x8xf32>
    %263 = vector.extract_strided_slice %260 {offsets = [0, 16], sizes = [2, 8], strides = [1, 1]} : vector<2x32xf32> to vector<2x8xf32>
    %264 = vector.extract_strided_slice %259 {offsets = [0, 24], sizes = [2, 8], strides = [1, 1]} : vector<2x32xf32> to vector<2x8xf32>
    %265 = arith.mulf %262, %229 : vector<2x8xf32>
    %266 = arith.mulf %261, %263 : vector<2x8xf32>
    %267 = arith.addf %265, %266 : vector<2x8xf32>
    %268 = math.tanh %267 : vector<2x8xf32>
    %269 = arith.mulf %264, %268 : vector<2x8xf32>
    %c12_88 = arith.constant 12 : index
    %c0_89 = arith.constant 0 : index
    %270 = vector.load %arg9[%c12_88, %c0_89] : memref<32x8xf32, #tpu.memory_space<vmem>>, vector<2x8xf32>
    tpu.vector_store %arg9[%c12_88, %c0_89], %269 {strides = array<i32>} : memref<32x8xf32, #tpu.memory_space<vmem>>, vector<2x8xf32>,
    %c12_90 = arith.constant 12 : index
    %c0_91 = arith.constant 0 : index
    %271 = vector.load %arg8[%c12_90, %c0_91] : memref<16x32xf32, #tpu.memory_space<vmem>>, vector<2x32xf32>
    %cst_92 = arith.constant dense<0.000000e+00> : vector<2x32xf32>
    %272 = tpu.matmul %250, %8, %cst_92 {dimension_numbers = #tpu.dot_dimension_numbers<[1], [0], [0], [1], [0, 0, 1, 1], [], []>} : vector<2x8xf32>, vector<8x32xf32>, vector<2x32xf32> -> vector<2x32xf32>
    %273 = arith.addf %271, %272 : vector<2x32xf32>
    %274 = arith.negf %273 : vector<2x32xf32>
    %275 = math.exp %274 : vector<2x32xf32>
    %cst_93 = arith.constant 1.000000e+00 : f32
    %276 = vector.broadcast %cst_93 : f32 to vector<2x32xf32>
    %277 = arith.addf %276, %275 : vector<2x32xf32>
    %278 = arith.divf %276, %277 : vector<2x32xf32>
    %279 = math.tanh %273 : vector<2x32xf32>
    %280 = vector.extract_strided_slice %278 {offsets = [0, 0], sizes = [2, 8], strides = [1, 1]} : vector<2x32xf32> to vector<2x8xf32>
    %281 = vector.extract_strided_slice %278 {offsets = [0, 8], sizes = [2, 8], strides = [1, 1]} : vector<2x32xf32> to vector<2x8xf32>
    %282 = vector.extract_strided_slice %279 {offsets = [0, 16], sizes = [2, 8], strides = [1, 1]} : vector<2x32xf32> to vector<2x8xf32>
    %283 = vector.extract_strided_slice %278 {offsets = [0, 24], sizes = [2, 8], strides = [1, 1]} : vector<2x32xf32> to vector<2x8xf32>
    %284 = arith.mulf %281, %248 : vector<2x8xf32>
    %285 = arith.mulf %280, %282 : vector<2x8xf32>
    %286 = arith.addf %284, %285 : vector<2x8xf32>
    %287 = math.tanh %286 : vector<2x8xf32>
    %288 = arith.mulf %283, %287 : vector<2x8xf32>
    %c12_94 = arith.constant 12 : index
    %c0_95 = arith.constant 0 : index
    %289 = vector.load %arg10[%c12_94, %c0_95] : memref<16x8xf32, #tpu.memory_space<vmem>>, vector<2x8xf32>
    tpu.vector_store %arg10[%c12_94, %c0_95], %288 {strides = array<i32>} : memref<16x8xf32, #tpu.memory_space<vmem>>, vector<2x8xf32>,
    %c14 = arith.constant 14 : index
    %c0_96 = arith.constant 0 : index
    %290 = vector.load %arg7[%c14, %c0_96] : memref<32x32xf32, #tpu.memory_space<vmem>>, vector<2x32xf32>
    %cst_97 = arith.constant dense<0.000000e+00> : vector<2x32xf32>
    %291 = tpu.matmul %269, %5, %cst_97 {dimension_numbers = #tpu.dot_dimension_numbers<[1], [0], [0], [1], [0, 0, 1, 1], [], []>} : vector<2x8xf32>, vector<8x32xf32>, vector<2x32xf32> -> vector<2x32xf32>
    %292 = arith.addf %290, %291 : vector<2x32xf32>
    %293 = arith.negf %292 : vector<2x32xf32>
    %294 = math.exp %293 : vector<2x32xf32>
    %cst_98 = arith.constant 1.000000e+00 : f32
    %295 = vector.broadcast %cst_98 : f32 to vector<2x32xf32>
    %296 = arith.addf %295, %294 : vector<2x32xf32>
    %297 = arith.divf %295, %296 : vector<2x32xf32>
    %298 = math.tanh %292 : vector<2x32xf32>
    %299 = vector.extract_strided_slice %297 {offsets = [0, 0], sizes = [2, 8], strides = [1, 1]} : vector<2x32xf32> to vector<2x8xf32>
    %300 = vector.extract_strided_slice %297 {offsets = [0, 8], sizes = [2, 8], strides = [1, 1]} : vector<2x32xf32> to vector<2x8xf32>
    %301 = vector.extract_strided_slice %298 {offsets = [0, 16], sizes = [2, 8], strides = [1, 1]} : vector<2x32xf32> to vector<2x8xf32>
    %302 = vector.extract_strided_slice %297 {offsets = [0, 24], sizes = [2, 8], strides = [1, 1]} : vector<2x32xf32> to vector<2x8xf32>
    %303 = arith.mulf %300, %267 : vector<2x8xf32>
    %304 = arith.mulf %299, %301 : vector<2x8xf32>
    %305 = arith.addf %303, %304 : vector<2x8xf32>
    %306 = math.tanh %305 : vector<2x8xf32>
    %307 = arith.mulf %302, %306 : vector<2x8xf32>
    %c14_99 = arith.constant 14 : index
    %c0_100 = arith.constant 0 : index
    %308 = vector.load %arg9[%c14_99, %c0_100] : memref<32x8xf32, #tpu.memory_space<vmem>>, vector<2x8xf32>
    tpu.vector_store %arg9[%c14_99, %c0_100], %307 {strides = array<i32>} : memref<32x8xf32, #tpu.memory_space<vmem>>, vector<2x8xf32>,
    %c14_101 = arith.constant 14 : index
    %c0_102 = arith.constant 0 : index
    %309 = vector.load %arg8[%c14_101, %c0_102] : memref<16x32xf32, #tpu.memory_space<vmem>>, vector<2x32xf32>
    %cst_103 = arith.constant dense<0.000000e+00> : vector<2x32xf32>
    %310 = tpu.matmul %288, %8, %cst_103 {dimension_numbers = #tpu.dot_dimension_numbers<[1], [0], [0], [1], [0, 0, 1, 1], [], []>} : vector<2x8xf32>, vector<8x32xf32>, vector<2x32xf32> -> vector<2x32xf32>
    %311 = arith.addf %309, %310 : vector<2x32xf32>
    %312 = arith.negf %311 : vector<2x32xf32>
    %313 = math.exp %312 : vector<2x32xf32>
    %cst_104 = arith.constant 1.000000e+00 : f32
    %314 = vector.broadcast %cst_104 : f32 to vector<2x32xf32>
    %315 = arith.addf %314, %313 : vector<2x32xf32>
    %316 = arith.divf %314, %315 : vector<2x32xf32>
    %317 = math.tanh %311 : vector<2x32xf32>
    %318 = vector.extract_strided_slice %316 {offsets = [0, 0], sizes = [2, 8], strides = [1, 1]} : vector<2x32xf32> to vector<2x8xf32>
    %319 = vector.extract_strided_slice %316 {offsets = [0, 8], sizes = [2, 8], strides = [1, 1]} : vector<2x32xf32> to vector<2x8xf32>
    %320 = vector.extract_strided_slice %317 {offsets = [0, 16], sizes = [2, 8], strides = [1, 1]} : vector<2x32xf32> to vector<2x8xf32>
    %321 = vector.extract_strided_slice %316 {offsets = [0, 24], sizes = [2, 8], strides = [1, 1]} : vector<2x32xf32> to vector<2x8xf32>
    %322 = arith.mulf %319, %286 : vector<2x8xf32>
    %323 = arith.mulf %318, %320 : vector<2x8xf32>
    %324 = arith.addf %322, %323 : vector<2x8xf32>
    %325 = math.tanh %324 : vector<2x8xf32>
    %326 = arith.mulf %321, %325 : vector<2x8xf32>
    %c14_105 = arith.constant 14 : index
    %c0_106 = arith.constant 0 : index
    %327 = vector.load %arg10[%c14_105, %c0_106] : memref<16x8xf32, #tpu.memory_space<vmem>>, vector<2x8xf32>
    tpu.vector_store %arg10[%c14_105, %c0_106], %326 {strides = array<i32>} : memref<16x8xf32, #tpu.memory_space<vmem>>, vector<2x8xf32>,
    %c16 = arith.constant 16 : index
    %c0_107 = arith.constant 0 : index
    %328 = vector.load %arg7[%c16, %c0_107] : memref<32x32xf32, #tpu.memory_space<vmem>>, vector<2x32xf32>
    %cst_108 = arith.constant dense<0.000000e+00> : vector<2x32xf32>
    %329 = tpu.matmul %307, %5, %cst_108 {dimension_numbers = #tpu.dot_dimension_numbers<[1], [0], [0], [1], [0, 0, 1, 1], [], []>} : vector<2x8xf32>, vector<8x32xf32>, vector<2x32xf32> -> vector<2x32xf32>
    %330 = arith.addf %328, %329 : vector<2x32xf32>
    %331 = arith.negf %330 : vector<2x32xf32>
    %332 = math.exp %331 : vector<2x32xf32>
    %cst_109 = arith.constant 1.000000e+00 : f32
    %333 = vector.broadcast %cst_109 : f32 to vector<2x32xf32>
    %334 = arith.addf %333, %332 : vector<2x32xf32>
    %335 = arith.divf %333, %334 : vector<2x32xf32>
    %336 = math.tanh %330 : vector<2x32xf32>
    %337 = vector.extract_strided_slice %335 {offsets = [0, 0], sizes = [2, 8], strides = [1, 1]} : vector<2x32xf32> to vector<2x8xf32>
    %338 = vector.extract_strided_slice %335 {offsets = [0, 8], sizes = [2, 8], strides = [1, 1]} : vector<2x32xf32> to vector<2x8xf32>
    %339 = vector.extract_strided_slice %336 {offsets = [0, 16], sizes = [2, 8], strides = [1, 1]} : vector<2x32xf32> to vector<2x8xf32>
    %340 = vector.extract_strided_slice %335 {offsets = [0, 24], sizes = [2, 8], strides = [1, 1]} : vector<2x32xf32> to vector<2x8xf32>
    %341 = arith.mulf %338, %305 : vector<2x8xf32>
    %342 = arith.mulf %337, %339 : vector<2x8xf32>
    %343 = arith.addf %341, %342 : vector<2x8xf32>
    %344 = math.tanh %343 : vector<2x8xf32>
    %345 = arith.mulf %340, %344 : vector<2x8xf32>
    %c16_110 = arith.constant 16 : index
    %c0_111 = arith.constant 0 : index
    %346 = vector.load %arg9[%c16_110, %c0_111] : memref<32x8xf32, #tpu.memory_space<vmem>>, vector<2x8xf32>
    tpu.vector_store %arg9[%c16_110, %c0_111], %345 {strides = array<i32>} : memref<32x8xf32, #tpu.memory_space<vmem>>, vector<2x8xf32>,
    %c18 = arith.constant 18 : index
    %c0_112 = arith.constant 0 : index
    %347 = vector.load %arg7[%c18, %c0_112] : memref<32x32xf32, #tpu.memory_space<vmem>>, vector<2x32xf32>
    %cst_113 = arith.constant dense<0.000000e+00> : vector<2x32xf32>
    %348 = tpu.matmul %345, %5, %cst_113 {dimension_numbers = #tpu.dot_dimension_numbers<[1], [0], [0], [1], [0, 0, 1, 1], [], []>} : vector<2x8xf32>, vector<8x32xf32>, vector<2x32xf32> -> vector<2x32xf32>
    %349 = arith.addf %347, %348 : vector<2x32xf32>
    %350 = arith.negf %349 : vector<2x32xf32>
    %351 = math.exp %350 : vector<2x32xf32>
    %cst_114 = arith.constant 1.000000e+00 : f32
    %352 = vector.broadcast %cst_114 : f32 to vector<2x32xf32>
    %353 = arith.addf %352, %351 : vector<2x32xf32>
    %354 = arith.divf %352, %353 : vector<2x32xf32>
    %355 = math.tanh %349 : vector<2x32xf32>
    %356 = vector.extract_strided_slice %354 {offsets = [0, 0], sizes = [2, 8], strides = [1, 1]} : vector<2x32xf32> to vector<2x8xf32>
    %357 = vector.extract_strided_slice %354 {offsets = [0, 8], sizes = [2, 8], strides = [1, 1]} : vector<2x32xf32> to vector<2x8xf32>
    %358 = vector.extract_strided_slice %355 {offsets = [0, 16], sizes = [2, 8], strides = [1, 1]} : vector<2x32xf32> to vector<2x8xf32>
    %359 = vector.extract_strided_slice %354 {offsets = [0, 24], sizes = [2, 8], strides = [1, 1]} : vector<2x32xf32> to vector<2x8xf32>
    %360 = arith.mulf %357, %343 : vector<2x8xf32>
    %361 = arith.mulf %356, %358 : vector<2x8xf32>
    %362 = arith.addf %360, %361 : vector<2x8xf32>
    %363 = math.tanh %362 : vector<2x8xf32>
    %364 = arith.mulf %359, %363 : vector<2x8xf32>
    %c18_115 = arith.constant 18 : index
    %c0_116 = arith.constant 0 : index
    %365 = vector.load %arg9[%c18_115, %c0_116] : memref<32x8xf32, #tpu.memory_space<vmem>>, vector<2x8xf32>
    tpu.vector_store %arg9[%c18_115, %c0_116], %364 {strides = array<i32>} : memref<32x8xf32, #tpu.memory_space<vmem>>, vector<2x8xf32>,
    %c20 = arith.constant 20 : index
    %c0_117 = arith.constant 0 : index
    %366 = vector.load %arg7[%c20, %c0_117] : memref<32x32xf32, #tpu.memory_space<vmem>>, vector<2x32xf32>
    %cst_118 = arith.constant dense<0.000000e+00> : vector<2x32xf32>
    %367 = tpu.matmul %364, %5, %cst_118 {dimension_numbers = #tpu.dot_dimension_numbers<[1], [0], [0], [1], [0, 0, 1, 1], [], []>} : vector<2x8xf32>, vector<8x32xf32>, vector<2x32xf32> -> vector<2x32xf32>
    %368 = arith.addf %366, %367 : vector<2x32xf32>
    %369 = arith.negf %368 : vector<2x32xf32>
    %370 = math.exp %369 : vector<2x32xf32>
    %cst_119 = arith.constant 1.000000e+00 : f32
    %371 = vector.broadcast %cst_119 : f32 to vector<2x32xf32>
    %372 = arith.addf %371, %370 : vector<2x32xf32>
    %373 = arith.divf %371, %372 : vector<2x32xf32>
    %374 = math.tanh %368 : vector<2x32xf32>
    %375 = vector.extract_strided_slice %373 {offsets = [0, 0], sizes = [2, 8], strides = [1, 1]} : vector<2x32xf32> to vector<2x8xf32>
    %376 = vector.extract_strided_slice %373 {offsets = [0, 8], sizes = [2, 8], strides = [1, 1]} : vector<2x32xf32> to vector<2x8xf32>
    %377 = vector.extract_strided_slice %374 {offsets = [0, 16], sizes = [2, 8], strides = [1, 1]} : vector<2x32xf32> to vector<2x8xf32>
    %378 = vector.extract_strided_slice %373 {offsets = [0, 24], sizes = [2, 8], strides = [1, 1]} : vector<2x32xf32> to vector<2x8xf32>
    %379 = arith.mulf %376, %362 : vector<2x8xf32>
    %380 = arith.mulf %375, %377 : vector<2x8xf32>
    %381 = arith.addf %379, %380 : vector<2x8xf32>
    %382 = math.tanh %381 : vector<2x8xf32>
    %383 = arith.mulf %378, %382 : vector<2x8xf32>
    %c20_120 = arith.constant 20 : index
    %c0_121 = arith.constant 0 : index
    %384 = vector.load %arg9[%c20_120, %c0_121] : memref<32x8xf32, #tpu.memory_space<vmem>>, vector<2x8xf32>
    tpu.vector_store %arg9[%c20_120, %c0_121], %383 {strides = array<i32>} : memref<32x8xf32, #tpu.memory_space<vmem>>, vector<2x8xf32>,
    %c22 = arith.constant 22 : index
    %c0_122 = arith.constant 0 : index
    %385 = vector.load %arg7[%c22, %c0_122] : memref<32x32xf32, #tpu.memory_space<vmem>>, vector<2x32xf32>
    %cst_123 = arith.constant dense<0.000000e+00> : vector<2x32xf32>
    %386 = tpu.matmul %383, %5, %cst_123 {dimension_numbers = #tpu.dot_dimension_numbers<[1], [0], [0], [1], [0, 0, 1, 1], [], []>} : vector<2x8xf32>, vector<8x32xf32>, vector<2x32xf32> -> vector<2x32xf32>
    %387 = arith.addf %385, %386 : vector<2x32xf32>
    %388 = arith.negf %387 : vector<2x32xf32>
    %389 = math.exp %388 : vector<2x32xf32>
    %cst_124 = arith.constant 1.000000e+00 : f32
    %390 = vector.broadcast %cst_124 : f32 to vector<2x32xf32>
    %391 = arith.addf %390, %389 : vector<2x32xf32>
    %392 = arith.divf %390, %391 : vector<2x32xf32>
    %393 = math.tanh %387 : vector<2x32xf32>
    %394 = vector.extract_strided_slice %392 {offsets = [0, 0], sizes = [2, 8], strides = [1, 1]} : vector<2x32xf32> to vector<2x8xf32>
    %395 = vector.extract_strided_slice %392 {offsets = [0, 8], sizes = [2, 8], strides = [1, 1]} : vector<2x32xf32> to vector<2x8xf32>
    %396 = vector.extract_strided_slice %393 {offsets = [0, 16], sizes = [2, 8], strides = [1, 1]} : vector<2x32xf32> to vector<2x8xf32>
    %397 = vector.extract_strided_slice %392 {offsets = [0, 24], sizes = [2, 8], strides = [1, 1]} : vector<2x32xf32> to vector<2x8xf32>
    %398 = arith.mulf %395, %381 : vector<2x8xf32>
    %399 = arith.mulf %394, %396 : vector<2x8xf32>
    %400 = arith.addf %398, %399 : vector<2x8xf32>
    %401 = math.tanh %400 : vector<2x8xf32>
    %402 = arith.mulf %397, %401 : vector<2x8xf32>
    %c22_125 = arith.constant 22 : index
    %c0_126 = arith.constant 0 : index
    %403 = vector.load %arg9[%c22_125, %c0_126] : memref<32x8xf32, #tpu.memory_space<vmem>>, vector<2x8xf32>
    tpu.vector_store %arg9[%c22_125, %c0_126], %402 {strides = array<i32>} : memref<32x8xf32, #tpu.memory_space<vmem>>, vector<2x8xf32>,
    %c24 = arith.constant 24 : index
    %c0_127 = arith.constant 0 : index
    %404 = vector.load %arg7[%c24, %c0_127] : memref<32x32xf32, #tpu.memory_space<vmem>>, vector<2x32xf32>
    %cst_128 = arith.constant dense<0.000000e+00> : vector<2x32xf32>
    %405 = tpu.matmul %402, %5, %cst_128 {dimension_numbers = #tpu.dot_dimension_numbers<[1], [0], [0], [1], [0, 0, 1, 1], [], []>} : vector<2x8xf32>, vector<8x32xf32>, vector<2x32xf32> -> vector<2x32xf32>
    %406 = arith.addf %404, %405 : vector<2x32xf32>
    %407 = arith.negf %406 : vector<2x32xf32>
    %408 = math.exp %407 : vector<2x32xf32>
    %cst_129 = arith.constant 1.000000e+00 : f32
    %409 = vector.broadcast %cst_129 : f32 to vector<2x32xf32>
    %410 = arith.addf %409, %408 : vector<2x32xf32>
    %411 = arith.divf %409, %410 : vector<2x32xf32>
    %412 = math.tanh %406 : vector<2x32xf32>
    %413 = vector.extract_strided_slice %411 {offsets = [0, 0], sizes = [2, 8], strides = [1, 1]} : vector<2x32xf32> to vector<2x8xf32>
    %414 = vector.extract_strided_slice %411 {offsets = [0, 8], sizes = [2, 8], strides = [1, 1]} : vector<2x32xf32> to vector<2x8xf32>
    %415 = vector.extract_strided_slice %412 {offsets = [0, 16], sizes = [2, 8], strides = [1, 1]} : vector<2x32xf32> to vector<2x8xf32>
    %416 = vector.extract_strided_slice %411 {offsets = [0, 24], sizes = [2, 8], strides = [1, 1]} : vector<2x32xf32> to vector<2x8xf32>
    %417 = arith.mulf %414, %400 : vector<2x8xf32>
    %418 = arith.mulf %413, %415 : vector<2x8xf32>
    %419 = arith.addf %417, %418 : vector<2x8xf32>
    %420 = math.tanh %419 : vector<2x8xf32>
    %421 = arith.mulf %416, %420 : vector<2x8xf32>
    %c24_130 = arith.constant 24 : index
    %c0_131 = arith.constant 0 : index
    %422 = vector.load %arg9[%c24_130, %c0_131] : memref<32x8xf32, #tpu.memory_space<vmem>>, vector<2x8xf32>
    tpu.vector_store %arg9[%c24_130, %c0_131], %421 {strides = array<i32>} : memref<32x8xf32, #tpu.memory_space<vmem>>, vector<2x8xf32>,
    %c26 = arith.constant 26 : index
    %c0_132 = arith.constant 0 : index
    %423 = vector.load %arg7[%c26, %c0_132] : memref<32x32xf32, #tpu.memory_space<vmem>>, vector<2x32xf32>
    %cst_133 = arith.constant dense<0.000000e+00> : vector<2x32xf32>
    %424 = tpu.matmul %421, %5, %cst_133 {dimension_numbers = #tpu.dot_dimension_numbers<[1], [0], [0], [1], [0, 0, 1, 1], [], []>} : vector<2x8xf32>, vector<8x32xf32>, vector<2x32xf32> -> vector<2x32xf32>
    %425 = arith.addf %423, %424 : vector<2x32xf32>
    %426 = arith.negf %425 : vector<2x32xf32>
    %427 = math.exp %426 : vector<2x32xf32>
    %cst_134 = arith.constant 1.000000e+00 : f32
    %428 = vector.broadcast %cst_134 : f32 to vector<2x32xf32>
    %429 = arith.addf %428, %427 : vector<2x32xf32>
    %430 = arith.divf %428, %429 : vector<2x32xf32>
    %431 = math.tanh %425 : vector<2x32xf32>
    %432 = vector.extract_strided_slice %430 {offsets = [0, 0], sizes = [2, 8], strides = [1, 1]} : vector<2x32xf32> to vector<2x8xf32>
    %433 = vector.extract_strided_slice %430 {offsets = [0, 8], sizes = [2, 8], strides = [1, 1]} : vector<2x32xf32> to vector<2x8xf32>
    %434 = vector.extract_strided_slice %431 {offsets = [0, 16], sizes = [2, 8], strides = [1, 1]} : vector<2x32xf32> to vector<2x8xf32>
    %435 = vector.extract_strided_slice %430 {offsets = [0, 24], sizes = [2, 8], strides = [1, 1]} : vector<2x32xf32> to vector<2x8xf32>
    %436 = arith.mulf %433, %419 : vector<2x8xf32>
    %437 = arith.mulf %432, %434 : vector<2x8xf32>
    %438 = arith.addf %436, %437 : vector<2x8xf32>
    %439 = math.tanh %438 : vector<2x8xf32>
    %440 = arith.mulf %435, %439 : vector<2x8xf32>
    %c26_135 = arith.constant 26 : index
    %c0_136 = arith.constant 0 : index
    %441 = vector.load %arg9[%c26_135, %c0_136] : memref<32x8xf32, #tpu.memory_space<vmem>>, vector<2x8xf32>
    tpu.vector_store %arg9[%c26_135, %c0_136], %440 {strides = array<i32>} : memref<32x8xf32, #tpu.memory_space<vmem>>, vector<2x8xf32>,
    %c28 = arith.constant 28 : index
    %c0_137 = arith.constant 0 : index
    %442 = vector.load %arg7[%c28, %c0_137] : memref<32x32xf32, #tpu.memory_space<vmem>>, vector<2x32xf32>
    %cst_138 = arith.constant dense<0.000000e+00> : vector<2x32xf32>
    %443 = tpu.matmul %440, %5, %cst_138 {dimension_numbers = #tpu.dot_dimension_numbers<[1], [0], [0], [1], [0, 0, 1, 1], [], []>} : vector<2x8xf32>, vector<8x32xf32>, vector<2x32xf32> -> vector<2x32xf32>
    %444 = arith.addf %442, %443 : vector<2x32xf32>
    %445 = arith.negf %444 : vector<2x32xf32>
    %446 = math.exp %445 : vector<2x32xf32>
    %cst_139 = arith.constant 1.000000e+00 : f32
    %447 = vector.broadcast %cst_139 : f32 to vector<2x32xf32>
    %448 = arith.addf %447, %446 : vector<2x32xf32>
    %449 = arith.divf %447, %448 : vector<2x32xf32>
    %450 = math.tanh %444 : vector<2x32xf32>
    %451 = vector.extract_strided_slice %449 {offsets = [0, 0], sizes = [2, 8], strides = [1, 1]} : vector<2x32xf32> to vector<2x8xf32>
    %452 = vector.extract_strided_slice %449 {offsets = [0, 8], sizes = [2, 8], strides = [1, 1]} : vector<2x32xf32> to vector<2x8xf32>
    %453 = vector.extract_strided_slice %450 {offsets = [0, 16], sizes = [2, 8], strides = [1, 1]} : vector<2x32xf32> to vector<2x8xf32>
    %454 = vector.extract_strided_slice %449 {offsets = [0, 24], sizes = [2, 8], strides = [1, 1]} : vector<2x32xf32> to vector<2x8xf32>
    %455 = arith.mulf %452, %438 : vector<2x8xf32>
    %456 = arith.mulf %451, %453 : vector<2x8xf32>
    %457 = arith.addf %455, %456 : vector<2x8xf32>
    %458 = math.tanh %457 : vector<2x8xf32>
    %459 = arith.mulf %454, %458 : vector<2x8xf32>
    %c28_140 = arith.constant 28 : index
    %c0_141 = arith.constant 0 : index
    %460 = vector.load %arg9[%c28_140, %c0_141] : memref<32x8xf32, #tpu.memory_space<vmem>>, vector<2x8xf32>
    tpu.vector_store %arg9[%c28_140, %c0_141], %459 {strides = array<i32>} : memref<32x8xf32, #tpu.memory_space<vmem>>, vector<2x8xf32>,
    %c30 = arith.constant 30 : index
    %c0_142 = arith.constant 0 : index
    %461 = vector.load %arg7[%c30, %c0_142] : memref<32x32xf32, #tpu.memory_space<vmem>>, vector<2x32xf32>
    %cst_143 = arith.constant dense<0.000000e+00> : vector<2x32xf32>
    %462 = tpu.matmul %459, %5, %cst_143 {dimension_numbers = #tpu.dot_dimension_numbers<[1], [0], [0], [1], [0, 0, 1, 1], [], []>} : vector<2x8xf32>, vector<8x32xf32>, vector<2x32xf32> -> vector<2x32xf32>
    %463 = arith.addf %461, %462 : vector<2x32xf32>
    %464 = arith.negf %463 : vector<2x32xf32>
    %465 = math.exp %464 : vector<2x32xf32>
    %cst_144 = arith.constant 1.000000e+00 : f32
    %466 = vector.broadcast %cst_144 : f32 to vector<2x32xf32>
    %467 = arith.addf %466, %465 : vector<2x32xf32>
    %468 = arith.divf %466, %467 : vector<2x32xf32>
    %469 = math.tanh %463 : vector<2x32xf32>
    %470 = vector.extract_strided_slice %468 {offsets = [0, 0], sizes = [2, 8], strides = [1, 1]} : vector<2x32xf32> to vector<2x8xf32>
    %471 = vector.extract_strided_slice %468 {offsets = [0, 8], sizes = [2, 8], strides = [1, 1]} : vector<2x32xf32> to vector<2x8xf32>
    %472 = vector.extract_strided_slice %469 {offsets = [0, 16], sizes = [2, 8], strides = [1, 1]} : vector<2x32xf32> to vector<2x8xf32>
    %473 = vector.extract_strided_slice %468 {offsets = [0, 24], sizes = [2, 8], strides = [1, 1]} : vector<2x32xf32> to vector<2x8xf32>
    %474 = arith.mulf %471, %457 : vector<2x8xf32>
    %475 = arith.mulf %470, %472 : vector<2x8xf32>
    %476 = arith.addf %474, %475 : vector<2x8xf32>
    %477 = math.tanh %476 : vector<2x8xf32>
    %478 = arith.mulf %473, %477 : vector<2x8xf32>
    %c30_145 = arith.constant 30 : index
    %c0_146 = arith.constant 0 : index
    %479 = vector.load %arg9[%c30_145, %c0_146] : memref<32x8xf32, #tpu.memory_space<vmem>>, vector<2x8xf32>
    tpu.vector_store %arg9[%c30_145, %c0_146], %478 {strides = array<i32>} : memref<32x8xf32, #tpu.memory_space<vmem>>, vector<2x8xf32>,
    %c1 = arith.constant 1 : index
    %c0_147 = arith.constant 0 : index
    %c0_148 = arith.constant 0 : index
    %480 = vector.load %arg4[%c1, %c0_147, %c0_148] : memref<4x25x32xf32, #tpu.memory_space<vmem>>, vector<1x25x32xf32>
    %481 = vector.shape_cast %480 : vector<1x25x32xf32> to vector<25x32xf32>
    %c3 = arith.constant 3 : index
    %c0_149 = arith.constant 0 : index
    %c0_150 = arith.constant 0 : index
    %482 = vector.load %arg4[%c3, %c0_149, %c0_150] : memref<4x25x32xf32, #tpu.memory_space<vmem>>, vector<1x25x32xf32>
    %483 = vector.shape_cast %482 : vector<1x25x32xf32> to vector<25x32xf32>
    %484 = vector.extract_strided_slice %481 {offsets = [0, 0], sizes = [8, 32], strides = [1, 1]} : vector<25x32xf32> to vector<8x32xf32>
    %485 = vector.extract_strided_slice %481 {offsets = [16, 0], sizes = [8, 32], strides = [1, 1]} : vector<25x32xf32> to vector<8x32xf32>
    %486 = vector.extract_strided_slice %481 {offsets = [24, 0], sizes = [1, 32], strides = [1, 1]} : vector<25x32xf32> to vector<1x32xf32>
    %487 = vector.extract_strided_slice %483 {offsets = [0, 0], sizes = [8, 32], strides = [1, 1]} : vector<25x32xf32> to vector<8x32xf32>
    %488 = vector.extract_strided_slice %483 {offsets = [16, 0], sizes = [8, 32], strides = [1, 1]} : vector<25x32xf32> to vector<8x32xf32>
    %489 = vector.extract_strided_slice %483 {offsets = [24, 0], sizes = [1, 32], strides = [1, 1]} : vector<25x32xf32> to vector<1x32xf32>
    %c0_151 = arith.constant 0 : index
    %c0_152 = arith.constant 0 : index
    %490 = vector.load %arg9[%c0_151, %c0_152] : memref<32x8xf32, #tpu.memory_space<vmem>>, vector<32x8xf32>
    %c0_153 = arith.constant 0 : index
    %c0_154 = arith.constant 0 : index
    %491 = vector.load %arg10[%c0_153, %c0_154] : memref<16x8xf32, #tpu.memory_space<vmem>>, vector<16x8xf32>
    %cst_155 = arith.constant dense<0.000000e+00> : vector<32x32xf32>
    %492 = tpu.matmul %490, %484, %cst_155 {dimension_numbers = #tpu.dot_dimension_numbers<[1], [0], [0], [1], [0, 0, 1, 1], [], []>} : vector<32x8xf32>, vector<8x32xf32>, vector<32x32xf32> -> vector<32x32xf32>
    %493 = vector.broadcast %486 : vector<1x32xf32> to vector<32x32xf32>
    %494 = arith.addf %492, %493 : vector<32x32xf32>
    %c0_156 = arith.constant 0 : index
    %c0_157 = arith.constant 0 : index
    %495 = vector.load %arg7[%c0_156, %c0_157] : memref<32x32xf32, #tpu.memory_space<vmem>>, vector<32x32xf32>
    tpu.vector_store %arg7[%c0_156, %c0_157], %494 {strides = array<i32>} : memref<32x32xf32, #tpu.memory_space<vmem>>, vector<32x32xf32>,
    %cst_158 = arith.constant dense<0.000000e+00> : vector<16x32xf32>
    %496 = tpu.matmul %491, %487, %cst_158 {dimension_numbers = #tpu.dot_dimension_numbers<[1], [0], [0], [1], [0, 0, 1, 1], [], []>} : vector<16x8xf32>, vector<8x32xf32>, vector<16x32xf32> -> vector<16x32xf32>
    %497 = vector.broadcast %489 : vector<1x32xf32> to vector<16x32xf32>
    %498 = arith.addf %496, %497 : vector<16x32xf32>
    %c0_159 = arith.constant 0 : index
    %c0_160 = arith.constant 0 : index
    %499 = vector.load %arg8[%c0_159, %c0_160] : memref<16x32xf32, #tpu.memory_space<vmem>>, vector<16x32xf32>
    tpu.vector_store %arg8[%c0_159, %c0_160], %498 {strides = array<i32>} : memref<16x32xf32, #tpu.memory_space<vmem>>, vector<16x32xf32>,
    %cst_161 = arith.constant 0.000000e+00 : f32
    %500 = vector.broadcast %cst_161 : f32 to vector<2x8xf32>
    %cst_162 = arith.constant 0.000000e+00 : f32
    %501 = vector.broadcast %cst_162 : f32 to vector<2x8xf32>
    %cst_163 = arith.constant 0.000000e+00 : f32
    %502 = vector.broadcast %cst_163 : f32 to vector<2x8xf32>
    %cst_164 = arith.constant 0.000000e+00 : f32
    %503 = vector.broadcast %cst_164 : f32 to vector<2x8xf32>
    %c0_165 = arith.constant 0 : index
    %c0_166 = arith.constant 0 : index
    %504 = vector.load %arg7[%c0_165, %c0_166] : memref<32x32xf32, #tpu.memory_space<vmem>>, vector<2x32xf32>
    %cst_167 = arith.constant dense<0.000000e+00> : vector<2x32xf32>
    %505 = tpu.matmul %500, %485, %cst_167 {dimension_numbers = #tpu.dot_dimension_numbers<[1], [0], [0], [1], [0, 0, 1, 1], [], []>} : vector<2x8xf32>, vector<8x32xf32>, vector<2x32xf32> -> vector<2x32xf32>
    %506 = arith.addf %504, %505 : vector<2x32xf32>
    %507 = arith.negf %506 : vector<2x32xf32>
    %508 = math.exp %507 : vector<2x32xf32>
    %cst_168 = arith.constant 1.000000e+00 : f32
    %509 = vector.broadcast %cst_168 : f32 to vector<2x32xf32>
    %510 = arith.addf %509, %508 : vector<2x32xf32>
    %511 = arith.divf %509, %510 : vector<2x32xf32>
    %512 = math.tanh %506 : vector<2x32xf32>
    %513 = vector.extract_strided_slice %511 {offsets = [0, 0], sizes = [2, 8], strides = [1, 1]} : vector<2x32xf32> to vector<2x8xf32>
    %514 = vector.extract_strided_slice %511 {offsets = [0, 8], sizes = [2, 8], strides = [1, 1]} : vector<2x32xf32> to vector<2x8xf32>
    %515 = vector.extract_strided_slice %512 {offsets = [0, 16], sizes = [2, 8], strides = [1, 1]} : vector<2x32xf32> to vector<2x8xf32>
    %516 = vector.extract_strided_slice %511 {offsets = [0, 24], sizes = [2, 8], strides = [1, 1]} : vector<2x32xf32> to vector<2x8xf32>
    %517 = arith.mulf %514, %501 : vector<2x8xf32>
    %518 = arith.mulf %513, %515 : vector<2x8xf32>
    %519 = arith.addf %517, %518 : vector<2x8xf32>
    %520 = math.tanh %519 : vector<2x8xf32>
    %521 = arith.mulf %516, %520 : vector<2x8xf32>
    %c0_169 = arith.constant 0 : index
    %c0_170 = arith.constant 0 : index
    %522 = vector.load %arg9[%c0_169, %c0_170] : memref<32x8xf32, #tpu.memory_space<vmem>>, vector<2x8xf32>
    tpu.vector_store %arg9[%c0_169, %c0_170], %521 {strides = array<i32>} : memref<32x8xf32, #tpu.memory_space<vmem>>, vector<2x8xf32>,
    %c0_171 = arith.constant 0 : index
    %c0_172 = arith.constant 0 : index
    %523 = vector.load %arg8[%c0_171, %c0_172] : memref<16x32xf32, #tpu.memory_space<vmem>>, vector<2x32xf32>
    %cst_173 = arith.constant dense<0.000000e+00> : vector<2x32xf32>
    %524 = tpu.matmul %502, %488, %cst_173 {dimension_numbers = #tpu.dot_dimension_numbers<[1], [0], [0], [1], [0, 0, 1, 1], [], []>} : vector<2x8xf32>, vector<8x32xf32>, vector<2x32xf32> -> vector<2x32xf32>
    %525 = arith.addf %523, %524 : vector<2x32xf32>
    %526 = arith.negf %525 : vector<2x32xf32>
    %527 = math.exp %526 : vector<2x32xf32>
    %cst_174 = arith.constant 1.000000e+00 : f32
    %528 = vector.broadcast %cst_174 : f32 to vector<2x32xf32>
    %529 = arith.addf %528, %527 : vector<2x32xf32>
    %530 = arith.divf %528, %529 : vector<2x32xf32>
    %531 = math.tanh %525 : vector<2x32xf32>
    %532 = vector.extract_strided_slice %530 {offsets = [0, 0], sizes = [2, 8], strides = [1, 1]} : vector<2x32xf32> to vector<2x8xf32>
    %533 = vector.extract_strided_slice %530 {offsets = [0, 8], sizes = [2, 8], strides = [1, 1]} : vector<2x32xf32> to vector<2x8xf32>
    %534 = vector.extract_strided_slice %531 {offsets = [0, 16], sizes = [2, 8], strides = [1, 1]} : vector<2x32xf32> to vector<2x8xf32>
    %535 = vector.extract_strided_slice %530 {offsets = [0, 24], sizes = [2, 8], strides = [1, 1]} : vector<2x32xf32> to vector<2x8xf32>
    %536 = arith.mulf %533, %503 : vector<2x8xf32>
    %537 = arith.mulf %532, %534 : vector<2x8xf32>
    %538 = arith.addf %536, %537 : vector<2x8xf32>
    %539 = math.tanh %538 : vector<2x8xf32>
    %540 = arith.mulf %535, %539 : vector<2x8xf32>
    %c0_175 = arith.constant 0 : index
    %c0_176 = arith.constant 0 : index
    %541 = vector.load %arg10[%c0_175, %c0_176] : memref<16x8xf32, #tpu.memory_space<vmem>>, vector<2x8xf32>
    tpu.vector_store %arg10[%c0_175, %c0_176], %540 {strides = array<i32>} : memref<16x8xf32, #tpu.memory_space<vmem>>, vector<2x8xf32>,
    %c2_177 = arith.constant 2 : index
    %c0_178 = arith.constant 0 : index
    %542 = vector.load %arg7[%c2_177, %c0_178] : memref<32x32xf32, #tpu.memory_space<vmem>>, vector<2x32xf32>
    %cst_179 = arith.constant dense<0.000000e+00> : vector<2x32xf32>
    %543 = tpu.matmul %521, %485, %cst_179 {dimension_numbers = #tpu.dot_dimension_numbers<[1], [0], [0], [1], [0, 0, 1, 1], [], []>} : vector<2x8xf32>, vector<8x32xf32>, vector<2x32xf32> -> vector<2x32xf32>
    %544 = arith.addf %542, %543 : vector<2x32xf32>
    %545 = arith.negf %544 : vector<2x32xf32>
    %546 = math.exp %545 : vector<2x32xf32>
    %cst_180 = arith.constant 1.000000e+00 : f32
    %547 = vector.broadcast %cst_180 : f32 to vector<2x32xf32>
    %548 = arith.addf %547, %546 : vector<2x32xf32>
    %549 = arith.divf %547, %548 : vector<2x32xf32>
    %550 = math.tanh %544 : vector<2x32xf32>
    %551 = vector.extract_strided_slice %549 {offsets = [0, 0], sizes = [2, 8], strides = [1, 1]} : vector<2x32xf32> to vector<2x8xf32>
    %552 = vector.extract_strided_slice %549 {offsets = [0, 8], sizes = [2, 8], strides = [1, 1]} : vector<2x32xf32> to vector<2x8xf32>
    %553 = vector.extract_strided_slice %550 {offsets = [0, 16], sizes = [2, 8], strides = [1, 1]} : vector<2x32xf32> to vector<2x8xf32>
    %554 = vector.extract_strided_slice %549 {offsets = [0, 24], sizes = [2, 8], strides = [1, 1]} : vector<2x32xf32> to vector<2x8xf32>
    %555 = arith.mulf %552, %519 : vector<2x8xf32>
    %556 = arith.mulf %551, %553 : vector<2x8xf32>
    %557 = arith.addf %555, %556 : vector<2x8xf32>
    %558 = math.tanh %557 : vector<2x8xf32>
    %559 = arith.mulf %554, %558 : vector<2x8xf32>
    %c2_181 = arith.constant 2 : index
    %c0_182 = arith.constant 0 : index
    %560 = vector.load %arg9[%c2_181, %c0_182] : memref<32x8xf32, #tpu.memory_space<vmem>>, vector<2x8xf32>
    tpu.vector_store %arg9[%c2_181, %c0_182], %559 {strides = array<i32>} : memref<32x8xf32, #tpu.memory_space<vmem>>, vector<2x8xf32>,
    %c2_183 = arith.constant 2 : index
    %c0_184 = arith.constant 0 : index
    %561 = vector.load %arg8[%c2_183, %c0_184] : memref<16x32xf32, #tpu.memory_space<vmem>>, vector<2x32xf32>
    %cst_185 = arith.constant dense<0.000000e+00> : vector<2x32xf32>
    %562 = tpu.matmul %540, %488, %cst_185 {dimension_numbers = #tpu.dot_dimension_numbers<[1], [0], [0], [1], [0, 0, 1, 1], [], []>} : vector<2x8xf32>, vector<8x32xf32>, vector<2x32xf32> -> vector<2x32xf32>
    %563 = arith.addf %561, %562 : vector<2x32xf32>
    %564 = arith.negf %563 : vector<2x32xf32>
    %565 = math.exp %564 : vector<2x32xf32>
    %cst_186 = arith.constant 1.000000e+00 : f32
    %566 = vector.broadcast %cst_186 : f32 to vector<2x32xf32>
    %567 = arith.addf %566, %565 : vector<2x32xf32>
    %568 = arith.divf %566, %567 : vector<2x32xf32>
    %569 = math.tanh %563 : vector<2x32xf32>
    %570 = vector.extract_strided_slice %568 {offsets = [0, 0], sizes = [2, 8], strides = [1, 1]} : vector<2x32xf32> to vector<2x8xf32>
    %571 = vector.extract_strided_slice %568 {offsets = [0, 8], sizes = [2, 8], strides = [1, 1]} : vector<2x32xf32> to vector<2x8xf32>
    %572 = vector.extract_strided_slice %569 {offsets = [0, 16], sizes = [2, 8], strides = [1, 1]} : vector<2x32xf32> to vector<2x8xf32>
    %573 = vector.extract_strided_slice %568 {offsets = [0, 24], sizes = [2, 8], strides = [1, 1]} : vector<2x32xf32> to vector<2x8xf32>
    %574 = arith.mulf %571, %538 : vector<2x8xf32>
    %575 = arith.mulf %570, %572 : vector<2x8xf32>
    %576 = arith.addf %574, %575 : vector<2x8xf32>
    %577 = math.tanh %576 : vector<2x8xf32>
    %578 = arith.mulf %573, %577 : vector<2x8xf32>
    %c2_187 = arith.constant 2 : index
    %c0_188 = arith.constant 0 : index
    %579 = vector.load %arg10[%c2_187, %c0_188] : memref<16x8xf32, #tpu.memory_space<vmem>>, vector<2x8xf32>
    tpu.vector_store %arg10[%c2_187, %c0_188], %578 {strides = array<i32>} : memref<16x8xf32, #tpu.memory_space<vmem>>, vector<2x8xf32>,
    %c4_189 = arith.constant 4 : index
    %c0_190 = arith.constant 0 : index
    %580 = vector.load %arg7[%c4_189, %c0_190] : memref<32x32xf32, #tpu.memory_space<vmem>>, vector<2x32xf32>
    %cst_191 = arith.constant dense<0.000000e+00> : vector<2x32xf32>
    %581 = tpu.matmul %559, %485, %cst_191 {dimension_numbers = #tpu.dot_dimension_numbers<[1], [0], [0], [1], [0, 0, 1, 1], [], []>} : vector<2x8xf32>, vector<8x32xf32>, vector<2x32xf32> -> vector<2x32xf32>
    %582 = arith.addf %580, %581 : vector<2x32xf32>
    %583 = arith.negf %582 : vector<2x32xf32>
    %584 = math.exp %583 : vector<2x32xf32>
    %cst_192 = arith.constant 1.000000e+00 : f32
    %585 = vector.broadcast %cst_192 : f32 to vector<2x32xf32>
    %586 = arith.addf %585, %584 : vector<2x32xf32>
    %587 = arith.divf %585, %586 : vector<2x32xf32>
    %588 = math.tanh %582 : vector<2x32xf32>
    %589 = vector.extract_strided_slice %587 {offsets = [0, 0], sizes = [2, 8], strides = [1, 1]} : vector<2x32xf32> to vector<2x8xf32>
    %590 = vector.extract_strided_slice %587 {offsets = [0, 8], sizes = [2, 8], strides = [1, 1]} : vector<2x32xf32> to vector<2x8xf32>
    %591 = vector.extract_strided_slice %588 {offsets = [0, 16], sizes = [2, 8], strides = [1, 1]} : vector<2x32xf32> to vector<2x8xf32>
    %592 = vector.extract_strided_slice %587 {offsets = [0, 24], sizes = [2, 8], strides = [1, 1]} : vector<2x32xf32> to vector<2x8xf32>
    %593 = arith.mulf %590, %557 : vector<2x8xf32>
    %594 = arith.mulf %589, %591 : vector<2x8xf32>
    %595 = arith.addf %593, %594 : vector<2x8xf32>
    %596 = math.tanh %595 : vector<2x8xf32>
    %597 = arith.mulf %592, %596 : vector<2x8xf32>
    %c4_193 = arith.constant 4 : index
    %c0_194 = arith.constant 0 : index
    %598 = vector.load %arg9[%c4_193, %c0_194] : memref<32x8xf32, #tpu.memory_space<vmem>>, vector<2x8xf32>
    tpu.vector_store %arg9[%c4_193, %c0_194], %597 {strides = array<i32>} : memref<32x8xf32, #tpu.memory_space<vmem>>, vector<2x8xf32>,
    %c4_195 = arith.constant 4 : index
    %c0_196 = arith.constant 0 : index
    %599 = vector.load %arg8[%c4_195, %c0_196] : memref<16x32xf32, #tpu.memory_space<vmem>>, vector<2x32xf32>
    %cst_197 = arith.constant dense<0.000000e+00> : vector<2x32xf32>
    %600 = tpu.matmul %578, %488, %cst_197 {dimension_numbers = #tpu.dot_dimension_numbers<[1], [0], [0], [1], [0, 0, 1, 1], [], []>} : vector<2x8xf32>, vector<8x32xf32>, vector<2x32xf32> -> vector<2x32xf32>
    %601 = arith.addf %599, %600 : vector<2x32xf32>
    %602 = arith.negf %601 : vector<2x32xf32>
    %603 = math.exp %602 : vector<2x32xf32>
    %cst_198 = arith.constant 1.000000e+00 : f32
    %604 = vector.broadcast %cst_198 : f32 to vector<2x32xf32>
    %605 = arith.addf %604, %603 : vector<2x32xf32>
    %606 = arith.divf %604, %605 : vector<2x32xf32>
    %607 = math.tanh %601 : vector<2x32xf32>
    %608 = vector.extract_strided_slice %606 {offsets = [0, 0], sizes = [2, 8], strides = [1, 1]} : vector<2x32xf32> to vector<2x8xf32>
    %609 = vector.extract_strided_slice %606 {offsets = [0, 8], sizes = [2, 8], strides = [1, 1]} : vector<2x32xf32> to vector<2x8xf32>
    %610 = vector.extract_strided_slice %607 {offsets = [0, 16], sizes = [2, 8], strides = [1, 1]} : vector<2x32xf32> to vector<2x8xf32>
    %611 = vector.extract_strided_slice %606 {offsets = [0, 24], sizes = [2, 8], strides = [1, 1]} : vector<2x32xf32> to vector<2x8xf32>
    %612 = arith.mulf %609, %576 : vector<2x8xf32>
    %613 = arith.mulf %608, %610 : vector<2x8xf32>
    %614 = arith.addf %612, %613 : vector<2x8xf32>
    %615 = math.tanh %614 : vector<2x8xf32>
    %616 = arith.mulf %611, %615 : vector<2x8xf32>
    %c4_199 = arith.constant 4 : index
    %c0_200 = arith.constant 0 : index
    %617 = vector.load %arg10[%c4_199, %c0_200] : memref<16x8xf32, #tpu.memory_space<vmem>>, vector<2x8xf32>
    tpu.vector_store %arg10[%c4_199, %c0_200], %616 {strides = array<i32>} : memref<16x8xf32, #tpu.memory_space<vmem>>, vector<2x8xf32>,
    %c6_201 = arith.constant 6 : index
    %c0_202 = arith.constant 0 : index
    %618 = vector.load %arg7[%c6_201, %c0_202] : memref<32x32xf32, #tpu.memory_space<vmem>>, vector<2x32xf32>
    %cst_203 = arith.constant dense<0.000000e+00> : vector<2x32xf32>
    %619 = tpu.matmul %597, %485, %cst_203 {dimension_numbers = #tpu.dot_dimension_numbers<[1], [0], [0], [1], [0, 0, 1, 1], [], []>} : vector<2x8xf32>, vector<8x32xf32>, vector<2x32xf32> -> vector<2x32xf32>
    %620 = arith.addf %618, %619 : vector<2x32xf32>
    %621 = arith.negf %620 : vector<2x32xf32>
    %622 = math.exp %621 : vector<2x32xf32>
    %cst_204 = arith.constant 1.000000e+00 : f32
    %623 = vector.broadcast %cst_204 : f32 to vector<2x32xf32>
    %624 = arith.addf %623, %622 : vector<2x32xf32>
    %625 = arith.divf %623, %624 : vector<2x32xf32>
    %626 = math.tanh %620 : vector<2x32xf32>
    %627 = vector.extract_strided_slice %625 {offsets = [0, 0], sizes = [2, 8], strides = [1, 1]} : vector<2x32xf32> to vector<2x8xf32>
    %628 = vector.extract_strided_slice %625 {offsets = [0, 8], sizes = [2, 8], strides = [1, 1]} : vector<2x32xf32> to vector<2x8xf32>
    %629 = vector.extract_strided_slice %626 {offsets = [0, 16], sizes = [2, 8], strides = [1, 1]} : vector<2x32xf32> to vector<2x8xf32>
    %630 = vector.extract_strided_slice %625 {offsets = [0, 24], sizes = [2, 8], strides = [1, 1]} : vector<2x32xf32> to vector<2x8xf32>
    %631 = arith.mulf %628, %595 : vector<2x8xf32>
    %632 = arith.mulf %627, %629 : vector<2x8xf32>
    %633 = arith.addf %631, %632 : vector<2x8xf32>
    %634 = math.tanh %633 : vector<2x8xf32>
    %635 = arith.mulf %630, %634 : vector<2x8xf32>
    %c6_205 = arith.constant 6 : index
    %c0_206 = arith.constant 0 : index
    %636 = vector.load %arg9[%c6_205, %c0_206] : memref<32x8xf32, #tpu.memory_space<vmem>>, vector<2x8xf32>
    tpu.vector_store %arg9[%c6_205, %c0_206], %635 {strides = array<i32>} : memref<32x8xf32, #tpu.memory_space<vmem>>, vector<2x8xf32>,
    %c6_207 = arith.constant 6 : index
    %c0_208 = arith.constant 0 : index
    %637 = vector.load %arg8[%c6_207, %c0_208] : memref<16x32xf32, #tpu.memory_space<vmem>>, vector<2x32xf32>
    %cst_209 = arith.constant dense<0.000000e+00> : vector<2x32xf32>
    %638 = tpu.matmul %616, %488, %cst_209 {dimension_numbers = #tpu.dot_dimension_numbers<[1], [0], [0], [1], [0, 0, 1, 1], [], []>} : vector<2x8xf32>, vector<8x32xf32>, vector<2x32xf32> -> vector<2x32xf32>
    %639 = arith.addf %637, %638 : vector<2x32xf32>
    %640 = arith.negf %639 : vector<2x32xf32>
    %641 = math.exp %640 : vector<2x32xf32>
    %cst_210 = arith.constant 1.000000e+00 : f32
    %642 = vector.broadcast %cst_210 : f32 to vector<2x32xf32>
    %643 = arith.addf %642, %641 : vector<2x32xf32>
    %644 = arith.divf %642, %643 : vector<2x32xf32>
    %645 = math.tanh %639 : vector<2x32xf32>
    %646 = vector.extract_strided_slice %644 {offsets = [0, 0], sizes = [2, 8], strides = [1, 1]} : vector<2x32xf32> to vector<2x8xf32>
    %647 = vector.extract_strided_slice %644 {offsets = [0, 8], sizes = [2, 8], strides = [1, 1]} : vector<2x32xf32> to vector<2x8xf32>
    %648 = vector.extract_strided_slice %645 {offsets = [0, 16], sizes = [2, 8], strides = [1, 1]} : vector<2x32xf32> to vector<2x8xf32>
    %649 = vector.extract_strided_slice %644 {offsets = [0, 24], sizes = [2, 8], strides = [1, 1]} : vector<2x32xf32> to vector<2x8xf32>
    %650 = arith.mulf %647, %614 : vector<2x8xf32>
    %651 = arith.mulf %646, %648 : vector<2x8xf32>
    %652 = arith.addf %650, %651 : vector<2x8xf32>
    %653 = math.tanh %652 : vector<2x8xf32>
    %654 = arith.mulf %649, %653 : vector<2x8xf32>
    %c6_211 = arith.constant 6 : index
    %c0_212 = arith.constant 0 : index
    %655 = vector.load %arg10[%c6_211, %c0_212] : memref<16x8xf32, #tpu.memory_space<vmem>>, vector<2x8xf32>
    tpu.vector_store %arg10[%c6_211, %c0_212], %654 {strides = array<i32>} : memref<16x8xf32, #tpu.memory_space<vmem>>, vector<2x8xf32>,
    %c8_213 = arith.constant 8 : index
    %c0_214 = arith.constant 0 : index
    %656 = vector.load %arg7[%c8_213, %c0_214] : memref<32x32xf32, #tpu.memory_space<vmem>>, vector<2x32xf32>
    %cst_215 = arith.constant dense<0.000000e+00> : vector<2x32xf32>
    %657 = tpu.matmul %635, %485, %cst_215 {dimension_numbers = #tpu.dot_dimension_numbers<[1], [0], [0], [1], [0, 0, 1, 1], [], []>} : vector<2x8xf32>, vector<8x32xf32>, vector<2x32xf32> -> vector<2x32xf32>
    %658 = arith.addf %656, %657 : vector<2x32xf32>
    %659 = arith.negf %658 : vector<2x32xf32>
    %660 = math.exp %659 : vector<2x32xf32>
    %cst_216 = arith.constant 1.000000e+00 : f32
    %661 = vector.broadcast %cst_216 : f32 to vector<2x32xf32>
    %662 = arith.addf %661, %660 : vector<2x32xf32>
    %663 = arith.divf %661, %662 : vector<2x32xf32>
    %664 = math.tanh %658 : vector<2x32xf32>
    %665 = vector.extract_strided_slice %663 {offsets = [0, 0], sizes = [2, 8], strides = [1, 1]} : vector<2x32xf32> to vector<2x8xf32>
    %666 = vector.extract_strided_slice %663 {offsets = [0, 8], sizes = [2, 8], strides = [1, 1]} : vector<2x32xf32> to vector<2x8xf32>
    %667 = vector.extract_strided_slice %664 {offsets = [0, 16], sizes = [2, 8], strides = [1, 1]} : vector<2x32xf32> to vector<2x8xf32>
    %668 = vector.extract_strided_slice %663 {offsets = [0, 24], sizes = [2, 8], strides = [1, 1]} : vector<2x32xf32> to vector<2x8xf32>
    %669 = arith.mulf %666, %633 : vector<2x8xf32>
    %670 = arith.mulf %665, %667 : vector<2x8xf32>
    %671 = arith.addf %669, %670 : vector<2x8xf32>
    %672 = math.tanh %671 : vector<2x8xf32>
    %673 = arith.mulf %668, %672 : vector<2x8xf32>
    %c8_217 = arith.constant 8 : index
    %c0_218 = arith.constant 0 : index
    %674 = vector.load %arg9[%c8_217, %c0_218] : memref<32x8xf32, #tpu.memory_space<vmem>>, vector<2x8xf32>
    tpu.vector_store %arg9[%c8_217, %c0_218], %673 {strides = array<i32>} : memref<32x8xf32, #tpu.memory_space<vmem>>, vector<2x8xf32>,
    %c8_219 = arith.constant 8 : index
    %c0_220 = arith.constant 0 : index
    %675 = vector.load %arg8[%c8_219, %c0_220] : memref<16x32xf32, #tpu.memory_space<vmem>>, vector<2x32xf32>
    %cst_221 = arith.constant dense<0.000000e+00> : vector<2x32xf32>
    %676 = tpu.matmul %654, %488, %cst_221 {dimension_numbers = #tpu.dot_dimension_numbers<[1], [0], [0], [1], [0, 0, 1, 1], [], []>} : vector<2x8xf32>, vector<8x32xf32>, vector<2x32xf32> -> vector<2x32xf32>
    %677 = arith.addf %675, %676 : vector<2x32xf32>
    %678 = arith.negf %677 : vector<2x32xf32>
    %679 = math.exp %678 : vector<2x32xf32>
    %cst_222 = arith.constant 1.000000e+00 : f32
    %680 = vector.broadcast %cst_222 : f32 to vector<2x32xf32>
    %681 = arith.addf %680, %679 : vector<2x32xf32>
    %682 = arith.divf %680, %681 : vector<2x32xf32>
    %683 = math.tanh %677 : vector<2x32xf32>
    %684 = vector.extract_strided_slice %682 {offsets = [0, 0], sizes = [2, 8], strides = [1, 1]} : vector<2x32xf32> to vector<2x8xf32>
    %685 = vector.extract_strided_slice %682 {offsets = [0, 8], sizes = [2, 8], strides = [1, 1]} : vector<2x32xf32> to vector<2x8xf32>
    %686 = vector.extract_strided_slice %683 {offsets = [0, 16], sizes = [2, 8], strides = [1, 1]} : vector<2x32xf32> to vector<2x8xf32>
    %687 = vector.extract_strided_slice %682 {offsets = [0, 24], sizes = [2, 8], strides = [1, 1]} : vector<2x32xf32> to vector<2x8xf32>
    %688 = arith.mulf %685, %652 : vector<2x8xf32>
    %689 = arith.mulf %684, %686 : vector<2x8xf32>
    %690 = arith.addf %688, %689 : vector<2x8xf32>
    %691 = math.tanh %690 : vector<2x8xf32>
    %692 = arith.mulf %687, %691 : vector<2x8xf32>
    %c8_223 = arith.constant 8 : index
    %c0_224 = arith.constant 0 : index
    %693 = vector.load %arg10[%c8_223, %c0_224] : memref<16x8xf32, #tpu.memory_space<vmem>>, vector<2x8xf32>
    tpu.vector_store %arg10[%c8_223, %c0_224], %692 {strides = array<i32>} : memref<16x8xf32, #tpu.memory_space<vmem>>, vector<2x8xf32>,
    %c10_225 = arith.constant 10 : index
    %c0_226 = arith.constant 0 : index
    %694 = vector.load %arg7[%c10_225, %c0_226] : memref<32x32xf32, #tpu.memory_space<vmem>>, vector<2x32xf32>
    %cst_227 = arith.constant dense<0.000000e+00> : vector<2x32xf32>
    %695 = tpu.matmul %673, %485, %cst_227 {dimension_numbers = #tpu.dot_dimension_numbers<[1], [0], [0], [1], [0, 0, 1, 1], [], []>} : vector<2x8xf32>, vector<8x32xf32>, vector<2x32xf32> -> vector<2x32xf32>
    %696 = arith.addf %694, %695 : vector<2x32xf32>
    %697 = arith.negf %696 : vector<2x32xf32>
    %698 = math.exp %697 : vector<2x32xf32>
    %cst_228 = arith.constant 1.000000e+00 : f32
    %699 = vector.broadcast %cst_228 : f32 to vector<2x32xf32>
    %700 = arith.addf %699, %698 : vector<2x32xf32>
    %701 = arith.divf %699, %700 : vector<2x32xf32>
    %702 = math.tanh %696 : vector<2x32xf32>
    %703 = vector.extract_strided_slice %701 {offsets = [0, 0], sizes = [2, 8], strides = [1, 1]} : vector<2x32xf32> to vector<2x8xf32>
    %704 = vector.extract_strided_slice %701 {offsets = [0, 8], sizes = [2, 8], strides = [1, 1]} : vector<2x32xf32> to vector<2x8xf32>
    %705 = vector.extract_strided_slice %702 {offsets = [0, 16], sizes = [2, 8], strides = [1, 1]} : vector<2x32xf32> to vector<2x8xf32>
    %706 = vector.extract_strided_slice %701 {offsets = [0, 24], sizes = [2, 8], strides = [1, 1]} : vector<2x32xf32> to vector<2x8xf32>
    %707 = arith.mulf %704, %671 : vector<2x8xf32>
    %708 = arith.mulf %703, %705 : vector<2x8xf32>
    %709 = arith.addf %707, %708 : vector<2x8xf32>
    %710 = math.tanh %709 : vector<2x8xf32>
    %711 = arith.mulf %706, %710 : vector<2x8xf32>
    %c10_229 = arith.constant 10 : index
    %c0_230 = arith.constant 0 : index
    %712 = vector.load %arg9[%c10_229, %c0_230] : memref<32x8xf32, #tpu.memory_space<vmem>>, vector<2x8xf32>
    tpu.vector_store %arg9[%c10_229, %c0_230], %711 {strides = array<i32>} : memref<32x8xf32, #tpu.memory_space<vmem>>, vector<2x8xf32>,
    %c10_231 = arith.constant 10 : index
    %c0_232 = arith.constant 0 : index
    %713 = vector.load %arg8[%c10_231, %c0_232] : memref<16x32xf32, #tpu.memory_space<vmem>>, vector<2x32xf32>
    %cst_233 = arith.constant dense<0.000000e+00> : vector<2x32xf32>
    %714 = tpu.matmul %692, %488, %cst_233 {dimension_numbers = #tpu.dot_dimension_numbers<[1], [0], [0], [1], [0, 0, 1, 1], [], []>} : vector<2x8xf32>, vector<8x32xf32>, vector<2x32xf32> -> vector<2x32xf32>
    %715 = arith.addf %713, %714 : vector<2x32xf32>
    %716 = arith.negf %715 : vector<2x32xf32>
    %717 = math.exp %716 : vector<2x32xf32>
    %cst_234 = arith.constant 1.000000e+00 : f32
    %718 = vector.broadcast %cst_234 : f32 to vector<2x32xf32>
    %719 = arith.addf %718, %717 : vector<2x32xf32>
    %720 = arith.divf %718, %719 : vector<2x32xf32>
    %721 = math.tanh %715 : vector<2x32xf32>
    %722 = vector.extract_strided_slice %720 {offsets = [0, 0], sizes = [2, 8], strides = [1, 1]} : vector<2x32xf32> to vector<2x8xf32>
    %723 = vector.extract_strided_slice %720 {offsets = [0, 8], sizes = [2, 8], strides = [1, 1]} : vector<2x32xf32> to vector<2x8xf32>
    %724 = vector.extract_strided_slice %721 {offsets = [0, 16], sizes = [2, 8], strides = [1, 1]} : vector<2x32xf32> to vector<2x8xf32>
    %725 = vector.extract_strided_slice %720 {offsets = [0, 24], sizes = [2, 8], strides = [1, 1]} : vector<2x32xf32> to vector<2x8xf32>
    %726 = arith.mulf %723, %690 : vector<2x8xf32>
    %727 = arith.mulf %722, %724 : vector<2x8xf32>
    %728 = arith.addf %726, %727 : vector<2x8xf32>
    %729 = math.tanh %728 : vector<2x8xf32>
    %730 = arith.mulf %725, %729 : vector<2x8xf32>
    %c10_235 = arith.constant 10 : index
    %c0_236 = arith.constant 0 : index
    %731 = vector.load %arg10[%c10_235, %c0_236] : memref<16x8xf32, #tpu.memory_space<vmem>>, vector<2x8xf32>
    tpu.vector_store %arg10[%c10_235, %c0_236], %730 {strides = array<i32>} : memref<16x8xf32, #tpu.memory_space<vmem>>, vector<2x8xf32>,
    %c12_237 = arith.constant 12 : index
    %c0_238 = arith.constant 0 : index
    %732 = vector.load %arg7[%c12_237, %c0_238] : memref<32x32xf32, #tpu.memory_space<vmem>>, vector<2x32xf32>
    %cst_239 = arith.constant dense<0.000000e+00> : vector<2x32xf32>
    %733 = tpu.matmul %711, %485, %cst_239 {dimension_numbers = #tpu.dot_dimension_numbers<[1], [0], [0], [1], [0, 0, 1, 1], [], []>} : vector<2x8xf32>, vector<8x32xf32>, vector<2x32xf32> -> vector<2x32xf32>
    %734 = arith.addf %732, %733 : vector<2x32xf32>
    %735 = arith.negf %734 : vector<2x32xf32>
    %736 = math.exp %735 : vector<2x32xf32>
    %cst_240 = arith.constant 1.000000e+00 : f32
    %737 = vector.broadcast %cst_240 : f32 to vector<2x32xf32>
    %738 = arith.addf %737, %736 : vector<2x32xf32>
    %739 = arith.divf %737, %738 : vector<2x32xf32>
    %740 = math.tanh %734 : vector<2x32xf32>
    %741 = vector.extract_strided_slice %739 {offsets = [0, 0], sizes = [2, 8], strides = [1, 1]} : vector<2x32xf32> to vector<2x8xf32>
    %742 = vector.extract_strided_slice %739 {offsets = [0, 8], sizes = [2, 8], strides = [1, 1]} : vector<2x32xf32> to vector<2x8xf32>
    %743 = vector.extract_strided_slice %740 {offsets = [0, 16], sizes = [2, 8], strides = [1, 1]} : vector<2x32xf32> to vector<2x8xf32>
    %744 = vector.extract_strided_slice %739 {offsets = [0, 24], sizes = [2, 8], strides = [1, 1]} : vector<2x32xf32> to vector<2x8xf32>
    %745 = arith.mulf %742, %709 : vector<2x8xf32>
    %746 = arith.mulf %741, %743 : vector<2x8xf32>
    %747 = arith.addf %745, %746 : vector<2x8xf32>
    %748 = math.tanh %747 : vector<2x8xf32>
    %749 = arith.mulf %744, %748 : vector<2x8xf32>
    %c12_241 = arith.constant 12 : index
    %c0_242 = arith.constant 0 : index
    %750 = vector.load %arg9[%c12_241, %c0_242] : memref<32x8xf32, #tpu.memory_space<vmem>>, vector<2x8xf32>
    tpu.vector_store %arg9[%c12_241, %c0_242], %749 {strides = array<i32>} : memref<32x8xf32, #tpu.memory_space<vmem>>, vector<2x8xf32>,
    %c12_243 = arith.constant 12 : index
    %c0_244 = arith.constant 0 : index
    %751 = vector.load %arg8[%c12_243, %c0_244] : memref<16x32xf32, #tpu.memory_space<vmem>>, vector<2x32xf32>
    %cst_245 = arith.constant dense<0.000000e+00> : vector<2x32xf32>
    %752 = tpu.matmul %730, %488, %cst_245 {dimension_numbers = #tpu.dot_dimension_numbers<[1], [0], [0], [1], [0, 0, 1, 1], [], []>} : vector<2x8xf32>, vector<8x32xf32>, vector<2x32xf32> -> vector<2x32xf32>
    %753 = arith.addf %751, %752 : vector<2x32xf32>
    %754 = arith.negf %753 : vector<2x32xf32>
    %755 = math.exp %754 : vector<2x32xf32>
    %cst_246 = arith.constant 1.000000e+00 : f32
    %756 = vector.broadcast %cst_246 : f32 to vector<2x32xf32>
    %757 = arith.addf %756, %755 : vector<2x32xf32>
    %758 = arith.divf %756, %757 : vector<2x32xf32>
    %759 = math.tanh %753 : vector<2x32xf32>
    %760 = vector.extract_strided_slice %758 {offsets = [0, 0], sizes = [2, 8], strides = [1, 1]} : vector<2x32xf32> to vector<2x8xf32>
    %761 = vector.extract_strided_slice %758 {offsets = [0, 8], sizes = [2, 8], strides = [1, 1]} : vector<2x32xf32> to vector<2x8xf32>
    %762 = vector.extract_strided_slice %759 {offsets = [0, 16], sizes = [2, 8], strides = [1, 1]} : vector<2x32xf32> to vector<2x8xf32>
    %763 = vector.extract_strided_slice %758 {offsets = [0, 24], sizes = [2, 8], strides = [1, 1]} : vector<2x32xf32> to vector<2x8xf32>
    %764 = arith.mulf %761, %728 : vector<2x8xf32>
    %765 = arith.mulf %760, %762 : vector<2x8xf32>
    %766 = arith.addf %764, %765 : vector<2x8xf32>
    %767 = math.tanh %766 : vector<2x8xf32>
    %768 = arith.mulf %763, %767 : vector<2x8xf32>
    %c12_247 = arith.constant 12 : index
    %c0_248 = arith.constant 0 : index
    %769 = vector.load %arg10[%c12_247, %c0_248] : memref<16x8xf32, #tpu.memory_space<vmem>>, vector<2x8xf32>
    tpu.vector_store %arg10[%c12_247, %c0_248], %768 {strides = array<i32>} : memref<16x8xf32, #tpu.memory_space<vmem>>, vector<2x8xf32>,
    %c14_249 = arith.constant 14 : index
    %c0_250 = arith.constant 0 : index
    %770 = vector.load %arg7[%c14_249, %c0_250] : memref<32x32xf32, #tpu.memory_space<vmem>>, vector<2x32xf32>
    %cst_251 = arith.constant dense<0.000000e+00> : vector<2x32xf32>
    %771 = tpu.matmul %749, %485, %cst_251 {dimension_numbers = #tpu.dot_dimension_numbers<[1], [0], [0], [1], [0, 0, 1, 1], [], []>} : vector<2x8xf32>, vector<8x32xf32>, vector<2x32xf32> -> vector<2x32xf32>
    %772 = arith.addf %770, %771 : vector<2x32xf32>
    %773 = arith.negf %772 : vector<2x32xf32>
    %774 = math.exp %773 : vector<2x32xf32>
    %cst_252 = arith.constant 1.000000e+00 : f32
    %775 = vector.broadcast %cst_252 : f32 to vector<2x32xf32>
    %776 = arith.addf %775, %774 : vector<2x32xf32>
    %777 = arith.divf %775, %776 : vector<2x32xf32>
    %778 = math.tanh %772 : vector<2x32xf32>
    %779 = vector.extract_strided_slice %777 {offsets = [0, 0], sizes = [2, 8], strides = [1, 1]} : vector<2x32xf32> to vector<2x8xf32>
    %780 = vector.extract_strided_slice %777 {offsets = [0, 8], sizes = [2, 8], strides = [1, 1]} : vector<2x32xf32> to vector<2x8xf32>
    %781 = vector.extract_strided_slice %778 {offsets = [0, 16], sizes = [2, 8], strides = [1, 1]} : vector<2x32xf32> to vector<2x8xf32>
    %782 = vector.extract_strided_slice %777 {offsets = [0, 24], sizes = [2, 8], strides = [1, 1]} : vector<2x32xf32> to vector<2x8xf32>
    %783 = arith.mulf %780, %747 : vector<2x8xf32>
    %784 = arith.mulf %779, %781 : vector<2x8xf32>
    %785 = arith.addf %783, %784 : vector<2x8xf32>
    %786 = math.tanh %785 : vector<2x8xf32>
    %787 = arith.mulf %782, %786 : vector<2x8xf32>
    %c14_253 = arith.constant 14 : index
    %c0_254 = arith.constant 0 : index
    %788 = vector.load %arg9[%c14_253, %c0_254] : memref<32x8xf32, #tpu.memory_space<vmem>>, vector<2x8xf32>
    tpu.vector_store %arg9[%c14_253, %c0_254], %787 {strides = array<i32>} : memref<32x8xf32, #tpu.memory_space<vmem>>, vector<2x8xf32>,
    %c14_255 = arith.constant 14 : index
    %c0_256 = arith.constant 0 : index
    %789 = vector.load %arg8[%c14_255, %c0_256] : memref<16x32xf32, #tpu.memory_space<vmem>>, vector<2x32xf32>
    %cst_257 = arith.constant dense<0.000000e+00> : vector<2x32xf32>
    %790 = tpu.matmul %768, %488, %cst_257 {dimension_numbers = #tpu.dot_dimension_numbers<[1], [0], [0], [1], [0, 0, 1, 1], [], []>} : vector<2x8xf32>, vector<8x32xf32>, vector<2x32xf32> -> vector<2x32xf32>
    %791 = arith.addf %789, %790 : vector<2x32xf32>
    %792 = arith.negf %791 : vector<2x32xf32>
    %793 = math.exp %792 : vector<2x32xf32>
    %cst_258 = arith.constant 1.000000e+00 : f32
    %794 = vector.broadcast %cst_258 : f32 to vector<2x32xf32>
    %795 = arith.addf %794, %793 : vector<2x32xf32>
    %796 = arith.divf %794, %795 : vector<2x32xf32>
    %797 = math.tanh %791 : vector<2x32xf32>
    %798 = vector.extract_strided_slice %796 {offsets = [0, 0], sizes = [2, 8], strides = [1, 1]} : vector<2x32xf32> to vector<2x8xf32>
    %799 = vector.extract_strided_slice %796 {offsets = [0, 8], sizes = [2, 8], strides = [1, 1]} : vector<2x32xf32> to vector<2x8xf32>
    %800 = vector.extract_strided_slice %797 {offsets = [0, 16], sizes = [2, 8], strides = [1, 1]} : vector<2x32xf32> to vector<2x8xf32>
    %801 = vector.extract_strided_slice %796 {offsets = [0, 24], sizes = [2, 8], strides = [1, 1]} : vector<2x32xf32> to vector<2x8xf32>
    %802 = arith.mulf %799, %766 : vector<2x8xf32>
    %803 = arith.mulf %798, %800 : vector<2x8xf32>
    %804 = arith.addf %802, %803 : vector<2x8xf32>
    %805 = math.tanh %804 : vector<2x8xf32>
    %806 = arith.mulf %801, %805 : vector<2x8xf32>
    %c14_259 = arith.constant 14 : index
    %c0_260 = arith.constant 0 : index
    %807 = vector.load %arg10[%c14_259, %c0_260] : memref<16x8xf32, #tpu.memory_space<vmem>>, vector<2x8xf32>
    tpu.vector_store %arg10[%c14_259, %c0_260], %806 {strides = array<i32>} : memref<16x8xf32, #tpu.memory_space<vmem>>, vector<2x8xf32>,
    %c16_261 = arith.constant 16 : index
    %c0_262 = arith.constant 0 : index
    %808 = vector.load %arg7[%c16_261, %c0_262] : memref<32x32xf32, #tpu.memory_space<vmem>>, vector<2x32xf32>
    %cst_263 = arith.constant dense<0.000000e+00> : vector<2x32xf32>
    %809 = tpu.matmul %787, %485, %cst_263 {dimension_numbers = #tpu.dot_dimension_numbers<[1], [0], [0], [1], [0, 0, 1, 1], [], []>} : vector<2x8xf32>, vector<8x32xf32>, vector<2x32xf32> -> vector<2x32xf32>
    %810 = arith.addf %808, %809 : vector<2x32xf32>
    %811 = arith.negf %810 : vector<2x32xf32>
    %812 = math.exp %811 : vector<2x32xf32>
    %cst_264 = arith.constant 1.000000e+00 : f32
    %813 = vector.broadcast %cst_264 : f32 to vector<2x32xf32>
    %814 = arith.addf %813, %812 : vector<2x32xf32>
    %815 = arith.divf %813, %814 : vector<2x32xf32>
    %816 = math.tanh %810 : vector<2x32xf32>
    %817 = vector.extract_strided_slice %815 {offsets = [0, 0], sizes = [2, 8], strides = [1, 1]} : vector<2x32xf32> to vector<2x8xf32>
    %818 = vector.extract_strided_slice %815 {offsets = [0, 8], sizes = [2, 8], strides = [1, 1]} : vector<2x32xf32> to vector<2x8xf32>
    %819 = vector.extract_strided_slice %816 {offsets = [0, 16], sizes = [2, 8], strides = [1, 1]} : vector<2x32xf32> to vector<2x8xf32>
    %820 = vector.extract_strided_slice %815 {offsets = [0, 24], sizes = [2, 8], strides = [1, 1]} : vector<2x32xf32> to vector<2x8xf32>
    %821 = arith.mulf %818, %785 : vector<2x8xf32>
    %822 = arith.mulf %817, %819 : vector<2x8xf32>
    %823 = arith.addf %821, %822 : vector<2x8xf32>
    %824 = math.tanh %823 : vector<2x8xf32>
    %825 = arith.mulf %820, %824 : vector<2x8xf32>
    %c16_265 = arith.constant 16 : index
    %c0_266 = arith.constant 0 : index
    %826 = vector.load %arg9[%c16_265, %c0_266] : memref<32x8xf32, #tpu.memory_space<vmem>>, vector<2x8xf32>
    tpu.vector_store %arg9[%c16_265, %c0_266], %825 {strides = array<i32>} : memref<32x8xf32, #tpu.memory_space<vmem>>, vector<2x8xf32>,
    %c18_267 = arith.constant 18 : index
    %c0_268 = arith.constant 0 : index
    %827 = vector.load %arg7[%c18_267, %c0_268] : memref<32x32xf32, #tpu.memory_space<vmem>>, vector<2x32xf32>
    %cst_269 = arith.constant dense<0.000000e+00> : vector<2x32xf32>
    %828 = tpu.matmul %825, %485, %cst_269 {dimension_numbers = #tpu.dot_dimension_numbers<[1], [0], [0], [1], [0, 0, 1, 1], [], []>} : vector<2x8xf32>, vector<8x32xf32>, vector<2x32xf32> -> vector<2x32xf32>
    %829 = arith.addf %827, %828 : vector<2x32xf32>
    %830 = arith.negf %829 : vector<2x32xf32>
    %831 = math.exp %830 : vector<2x32xf32>
    %cst_270 = arith.constant 1.000000e+00 : f32
    %832 = vector.broadcast %cst_270 : f32 to vector<2x32xf32>
    %833 = arith.addf %832, %831 : vector<2x32xf32>
    %834 = arith.divf %832, %833 : vector<2x32xf32>
    %835 = math.tanh %829 : vector<2x32xf32>
    %836 = vector.extract_strided_slice %834 {offsets = [0, 0], sizes = [2, 8], strides = [1, 1]} : vector<2x32xf32> to vector<2x8xf32>
    %837 = vector.extract_strided_slice %834 {offsets = [0, 8], sizes = [2, 8], strides = [1, 1]} : vector<2x32xf32> to vector<2x8xf32>
    %838 = vector.extract_strided_slice %835 {offsets = [0, 16], sizes = [2, 8], strides = [1, 1]} : vector<2x32xf32> to vector<2x8xf32>
    %839 = vector.extract_strided_slice %834 {offsets = [0, 24], sizes = [2, 8], strides = [1, 1]} : vector<2x32xf32> to vector<2x8xf32>
    %840 = arith.mulf %837, %823 : vector<2x8xf32>
    %841 = arith.mulf %836, %838 : vector<2x8xf32>
    %842 = arith.addf %840, %841 : vector<2x8xf32>
    %843 = math.tanh %842 : vector<2x8xf32>
    %844 = arith.mulf %839, %843 : vector<2x8xf32>
    %c18_271 = arith.constant 18 : index
    %c0_272 = arith.constant 0 : index
    %845 = vector.load %arg9[%c18_271, %c0_272] : memref<32x8xf32, #tpu.memory_space<vmem>>, vector<2x8xf32>
    tpu.vector_store %arg9[%c18_271, %c0_272], %844 {strides = array<i32>} : memref<32x8xf32, #tpu.memory_space<vmem>>, vector<2x8xf32>,
    %c20_273 = arith.constant 20 : index
    %c0_274 = arith.constant 0 : index
    %846 = vector.load %arg7[%c20_273, %c0_274] : memref<32x32xf32, #tpu.memory_space<vmem>>, vector<2x32xf32>
    %cst_275 = arith.constant dense<0.000000e+00> : vector<2x32xf32>
    %847 = tpu.matmul %844, %485, %cst_275 {dimension_numbers = #tpu.dot_dimension_numbers<[1], [0], [0], [1], [0, 0, 1, 1], [], []>} : vector<2x8xf32>, vector<8x32xf32>, vector<2x32xf32> -> vector<2x32xf32>
    %848 = arith.addf %846, %847 : vector<2x32xf32>
    %849 = arith.negf %848 : vector<2x32xf32>
    %850 = math.exp %849 : vector<2x32xf32>
    %cst_276 = arith.constant 1.000000e+00 : f32
    %851 = vector.broadcast %cst_276 : f32 to vector<2x32xf32>
    %852 = arith.addf %851, %850 : vector<2x32xf32>
    %853 = arith.divf %851, %852 : vector<2x32xf32>
    %854 = math.tanh %848 : vector<2x32xf32>
    %855 = vector.extract_strided_slice %853 {offsets = [0, 0], sizes = [2, 8], strides = [1, 1]} : vector<2x32xf32> to vector<2x8xf32>
    %856 = vector.extract_strided_slice %853 {offsets = [0, 8], sizes = [2, 8], strides = [1, 1]} : vector<2x32xf32> to vector<2x8xf32>
    %857 = vector.extract_strided_slice %854 {offsets = [0, 16], sizes = [2, 8], strides = [1, 1]} : vector<2x32xf32> to vector<2x8xf32>
    %858 = vector.extract_strided_slice %853 {offsets = [0, 24], sizes = [2, 8], strides = [1, 1]} : vector<2x32xf32> to vector<2x8xf32>
    %859 = arith.mulf %856, %842 : vector<2x8xf32>
    %860 = arith.mulf %855, %857 : vector<2x8xf32>
    %861 = arith.addf %859, %860 : vector<2x8xf32>
    %862 = math.tanh %861 : vector<2x8xf32>
    %863 = arith.mulf %858, %862 : vector<2x8xf32>
    %c20_277 = arith.constant 20 : index
    %c0_278 = arith.constant 0 : index
    %864 = vector.load %arg9[%c20_277, %c0_278] : memref<32x8xf32, #tpu.memory_space<vmem>>, vector<2x8xf32>
    tpu.vector_store %arg9[%c20_277, %c0_278], %863 {strides = array<i32>} : memref<32x8xf32, #tpu.memory_space<vmem>>, vector<2x8xf32>,
    %c22_279 = arith.constant 22 : index
    %c0_280 = arith.constant 0 : index
    %865 = vector.load %arg7[%c22_279, %c0_280] : memref<32x32xf32, #tpu.memory_space<vmem>>, vector<2x32xf32>
    %cst_281 = arith.constant dense<0.000000e+00> : vector<2x32xf32>
    %866 = tpu.matmul %863, %485, %cst_281 {dimension_numbers = #tpu.dot_dimension_numbers<[1], [0], [0], [1], [0, 0, 1, 1], [], []>} : vector<2x8xf32>, vector<8x32xf32>, vector<2x32xf32> -> vector<2x32xf32>
    %867 = arith.addf %865, %866 : vector<2x32xf32>
    %868 = arith.negf %867 : vector<2x32xf32>
    %869 = math.exp %868 : vector<2x32xf32>
    %cst_282 = arith.constant 1.000000e+00 : f32
    %870 = vector.broadcast %cst_282 : f32 to vector<2x32xf32>
    %871 = arith.addf %870, %869 : vector<2x32xf32>
    %872 = arith.divf %870, %871 : vector<2x32xf32>
    %873 = math.tanh %867 : vector<2x32xf32>
    %874 = vector.extract_strided_slice %872 {offsets = [0, 0], sizes = [2, 8], strides = [1, 1]} : vector<2x32xf32> to vector<2x8xf32>
    %875 = vector.extract_strided_slice %872 {offsets = [0, 8], sizes = [2, 8], strides = [1, 1]} : vector<2x32xf32> to vector<2x8xf32>
    %876 = vector.extract_strided_slice %873 {offsets = [0, 16], sizes = [2, 8], strides = [1, 1]} : vector<2x32xf32> to vector<2x8xf32>
    %877 = vector.extract_strided_slice %872 {offsets = [0, 24], sizes = [2, 8], strides = [1, 1]} : vector<2x32xf32> to vector<2x8xf32>
    %878 = arith.mulf %875, %861 : vector<2x8xf32>
    %879 = arith.mulf %874, %876 : vector<2x8xf32>
    %880 = arith.addf %878, %879 : vector<2x8xf32>
    %881 = math.tanh %880 : vector<2x8xf32>
    %882 = arith.mulf %877, %881 : vector<2x8xf32>
    %c22_283 = arith.constant 22 : index
    %c0_284 = arith.constant 0 : index
    %883 = vector.load %arg9[%c22_283, %c0_284] : memref<32x8xf32, #tpu.memory_space<vmem>>, vector<2x8xf32>
    tpu.vector_store %arg9[%c22_283, %c0_284], %882 {strides = array<i32>} : memref<32x8xf32, #tpu.memory_space<vmem>>, vector<2x8xf32>,
    %c24_285 = arith.constant 24 : index
    %c0_286 = arith.constant 0 : index
    %884 = vector.load %arg7[%c24_285, %c0_286] : memref<32x32xf32, #tpu.memory_space<vmem>>, vector<2x32xf32>
    %cst_287 = arith.constant dense<0.000000e+00> : vector<2x32xf32>
    %885 = tpu.matmul %882, %485, %cst_287 {dimension_numbers = #tpu.dot_dimension_numbers<[1], [0], [0], [1], [0, 0, 1, 1], [], []>} : vector<2x8xf32>, vector<8x32xf32>, vector<2x32xf32> -> vector<2x32xf32>
    %886 = arith.addf %884, %885 : vector<2x32xf32>
    %887 = arith.negf %886 : vector<2x32xf32>
    %888 = math.exp %887 : vector<2x32xf32>
    %cst_288 = arith.constant 1.000000e+00 : f32
    %889 = vector.broadcast %cst_288 : f32 to vector<2x32xf32>
    %890 = arith.addf %889, %888 : vector<2x32xf32>
    %891 = arith.divf %889, %890 : vector<2x32xf32>
    %892 = math.tanh %886 : vector<2x32xf32>
    %893 = vector.extract_strided_slice %891 {offsets = [0, 0], sizes = [2, 8], strides = [1, 1]} : vector<2x32xf32> to vector<2x8xf32>
    %894 = vector.extract_strided_slice %891 {offsets = [0, 8], sizes = [2, 8], strides = [1, 1]} : vector<2x32xf32> to vector<2x8xf32>
    %895 = vector.extract_strided_slice %892 {offsets = [0, 16], sizes = [2, 8], strides = [1, 1]} : vector<2x32xf32> to vector<2x8xf32>
    %896 = vector.extract_strided_slice %891 {offsets = [0, 24], sizes = [2, 8], strides = [1, 1]} : vector<2x32xf32> to vector<2x8xf32>
    %897 = arith.mulf %894, %880 : vector<2x8xf32>
    %898 = arith.mulf %893, %895 : vector<2x8xf32>
    %899 = arith.addf %897, %898 : vector<2x8xf32>
    %900 = math.tanh %899 : vector<2x8xf32>
    %901 = arith.mulf %896, %900 : vector<2x8xf32>
    %c24_289 = arith.constant 24 : index
    %c0_290 = arith.constant 0 : index
    %902 = vector.load %arg9[%c24_289, %c0_290] : memref<32x8xf32, #tpu.memory_space<vmem>>, vector<2x8xf32>
    tpu.vector_store %arg9[%c24_289, %c0_290], %901 {strides = array<i32>} : memref<32x8xf32, #tpu.memory_space<vmem>>, vector<2x8xf32>,
    %c26_291 = arith.constant 26 : index
    %c0_292 = arith.constant 0 : index
    %903 = vector.load %arg7[%c26_291, %c0_292] : memref<32x32xf32, #tpu.memory_space<vmem>>, vector<2x32xf32>
    %cst_293 = arith.constant dense<0.000000e+00> : vector<2x32xf32>
    %904 = tpu.matmul %901, %485, %cst_293 {dimension_numbers = #tpu.dot_dimension_numbers<[1], [0], [0], [1], [0, 0, 1, 1], [], []>} : vector<2x8xf32>, vector<8x32xf32>, vector<2x32xf32> -> vector<2x32xf32>
    %905 = arith.addf %903, %904 : vector<2x32xf32>
    %906 = arith.negf %905 : vector<2x32xf32>
    %907 = math.exp %906 : vector<2x32xf32>
    %cst_294 = arith.constant 1.000000e+00 : f32
    %908 = vector.broadcast %cst_294 : f32 to vector<2x32xf32>
    %909 = arith.addf %908, %907 : vector<2x32xf32>
    %910 = arith.divf %908, %909 : vector<2x32xf32>
    %911 = math.tanh %905 : vector<2x32xf32>
    %912 = vector.extract_strided_slice %910 {offsets = [0, 0], sizes = [2, 8], strides = [1, 1]} : vector<2x32xf32> to vector<2x8xf32>
    %913 = vector.extract_strided_slice %910 {offsets = [0, 8], sizes = [2, 8], strides = [1, 1]} : vector<2x32xf32> to vector<2x8xf32>
    %914 = vector.extract_strided_slice %911 {offsets = [0, 16], sizes = [2, 8], strides = [1, 1]} : vector<2x32xf32> to vector<2x8xf32>
    %915 = vector.extract_strided_slice %910 {offsets = [0, 24], sizes = [2, 8], strides = [1, 1]} : vector<2x32xf32> to vector<2x8xf32>
    %916 = arith.mulf %913, %899 : vector<2x8xf32>
    %917 = arith.mulf %912, %914 : vector<2x8xf32>
    %918 = arith.addf %916, %917 : vector<2x8xf32>
    %919 = math.tanh %918 : vector<2x8xf32>
    %920 = arith.mulf %915, %919 : vector<2x8xf32>
    %c26_295 = arith.constant 26 : index
    %c0_296 = arith.constant 0 : index
    %921 = vector.load %arg9[%c26_295, %c0_296] : memref<32x8xf32, #tpu.memory_space<vmem>>, vector<2x8xf32>
    tpu.vector_store %arg9[%c26_295, %c0_296], %920 {strides = array<i32>} : memref<32x8xf32, #tpu.memory_space<vmem>>, vector<2x8xf32>,
    %c28_297 = arith.constant 28 : index
    %c0_298 = arith.constant 0 : index
    %922 = vector.load %arg7[%c28_297, %c0_298] : memref<32x32xf32, #tpu.memory_space<vmem>>, vector<2x32xf32>
    %cst_299 = arith.constant dense<0.000000e+00> : vector<2x32xf32>
    %923 = tpu.matmul %920, %485, %cst_299 {dimension_numbers = #tpu.dot_dimension_numbers<[1], [0], [0], [1], [0, 0, 1, 1], [], []>} : vector<2x8xf32>, vector<8x32xf32>, vector<2x32xf32> -> vector<2x32xf32>
    %924 = arith.addf %922, %923 : vector<2x32xf32>
    %925 = arith.negf %924 : vector<2x32xf32>
    %926 = math.exp %925 : vector<2x32xf32>
    %cst_300 = arith.constant 1.000000e+00 : f32
    %927 = vector.broadcast %cst_300 : f32 to vector<2x32xf32>
    %928 = arith.addf %927, %926 : vector<2x32xf32>
    %929 = arith.divf %927, %928 : vector<2x32xf32>
    %930 = math.tanh %924 : vector<2x32xf32>
    %931 = vector.extract_strided_slice %929 {offsets = [0, 0], sizes = [2, 8], strides = [1, 1]} : vector<2x32xf32> to vector<2x8xf32>
    %932 = vector.extract_strided_slice %929 {offsets = [0, 8], sizes = [2, 8], strides = [1, 1]} : vector<2x32xf32> to vector<2x8xf32>
    %933 = vector.extract_strided_slice %930 {offsets = [0, 16], sizes = [2, 8], strides = [1, 1]} : vector<2x32xf32> to vector<2x8xf32>
    %934 = vector.extract_strided_slice %929 {offsets = [0, 24], sizes = [2, 8], strides = [1, 1]} : vector<2x32xf32> to vector<2x8xf32>
    %935 = arith.mulf %932, %918 : vector<2x8xf32>
    %936 = arith.mulf %931, %933 : vector<2x8xf32>
    %937 = arith.addf %935, %936 : vector<2x8xf32>
    %938 = math.tanh %937 : vector<2x8xf32>
    %939 = arith.mulf %934, %938 : vector<2x8xf32>
    %c28_301 = arith.constant 28 : index
    %c0_302 = arith.constant 0 : index
    %940 = vector.load %arg9[%c28_301, %c0_302] : memref<32x8xf32, #tpu.memory_space<vmem>>, vector<2x8xf32>
    tpu.vector_store %arg9[%c28_301, %c0_302], %939 {strides = array<i32>} : memref<32x8xf32, #tpu.memory_space<vmem>>, vector<2x8xf32>,
    %c30_303 = arith.constant 30 : index
    %c0_304 = arith.constant 0 : index
    %941 = vector.load %arg7[%c30_303, %c0_304] : memref<32x32xf32, #tpu.memory_space<vmem>>, vector<2x32xf32>
    %cst_305 = arith.constant dense<0.000000e+00> : vector<2x32xf32>
    %942 = tpu.matmul %939, %485, %cst_305 {dimension_numbers = #tpu.dot_dimension_numbers<[1], [0], [0], [1], [0, 0, 1, 1], [], []>} : vector<2x8xf32>, vector<8x32xf32>, vector<2x32xf32> -> vector<2x32xf32>
    %943 = arith.addf %941, %942 : vector<2x32xf32>
    %944 = arith.negf %943 : vector<2x32xf32>
    %945 = math.exp %944 : vector<2x32xf32>
    %cst_306 = arith.constant 1.000000e+00 : f32
    %946 = vector.broadcast %cst_306 : f32 to vector<2x32xf32>
    %947 = arith.addf %946, %945 : vector<2x32xf32>
    %948 = arith.divf %946, %947 : vector<2x32xf32>
    %949 = math.tanh %943 : vector<2x32xf32>
    %950 = vector.extract_strided_slice %948 {offsets = [0, 0], sizes = [2, 8], strides = [1, 1]} : vector<2x32xf32> to vector<2x8xf32>
    %951 = vector.extract_strided_slice %948 {offsets = [0, 8], sizes = [2, 8], strides = [1, 1]} : vector<2x32xf32> to vector<2x8xf32>
    %952 = vector.extract_strided_slice %949 {offsets = [0, 16], sizes = [2, 8], strides = [1, 1]} : vector<2x32xf32> to vector<2x8xf32>
    %953 = vector.extract_strided_slice %948 {offsets = [0, 24], sizes = [2, 8], strides = [1, 1]} : vector<2x32xf32> to vector<2x8xf32>
    %954 = arith.mulf %951, %937 : vector<2x8xf32>
    %955 = arith.mulf %950, %952 : vector<2x8xf32>
    %956 = arith.addf %954, %955 : vector<2x8xf32>
    %957 = math.tanh %956 : vector<2x8xf32>
    %958 = arith.mulf %953, %957 : vector<2x8xf32>
    %c30_307 = arith.constant 30 : index
    %c0_308 = arith.constant 0 : index
    %959 = vector.load %arg9[%c30_307, %c0_308] : memref<32x8xf32, #tpu.memory_space<vmem>>, vector<2x8xf32>
    tpu.vector_store %arg9[%c30_307, %c0_308], %958 {strides = array<i32>} : memref<32x8xf32, #tpu.memory_space<vmem>>, vector<2x8xf32>,
    %c0_309 = arith.constant 0 : index
    %c0_310 = arith.constant 0 : index
    %960 = vector.load %arg5[%c0_309, %c0_310] : memref<16x25xf32, #tpu.memory_space<vmem>>, vector<16x25xf32>
    %961 = vector.extract_strided_slice %960 {offsets = [0, 0], sizes = [16, 16], strides = [1, 1]} : vector<16x25xf32> to vector<16x16xf32>
    %962 = vector.extract_strided_slice %960 {offsets = [0, 16], sizes = [16, 8], strides = [1, 1]} : vector<16x25xf32> to vector<16x8xf32>
    %963 = vector.extract_strided_slice %960 {offsets = [0, 24], sizes = [16, 1], strides = [1, 1]} : vector<16x25xf32> to vector<16x1xf32>
    %c0_311 = arith.constant 0 : index
    %c0_312 = arith.constant 0 : index
    %964 = tpu.strided_load %arg9[%c0_311, %c0_312] {strides = array<i32: 2, 1>} : memref<32x8xf32, #tpu.memory_space<vmem>>, vector<16x8xf32>
    %c0_313 = arith.constant 0 : index
    %c0_314 = arith.constant 0 : index
    %965 = tpu.strided_load %arg10[%c0_313, %c0_314] {strides = array<i32: 2, 1>} : memref<16x8xf32, #tpu.memory_space<vmem>>, vector<8x8xf32>
    %cst_315 = arith.constant dense<0.000000e+00> : vector<16x8xf32>
    %966 = tpu.matmul %961, %964, %cst_315 {dimension_numbers = #tpu.dot_dimension_numbers<[1], [0], [0], [1], [0, 0, 1, 1], [], []>} : vector<16x16xf32>, vector<16x8xf32>, vector<16x8xf32> -> vector<16x8xf32>
    %cst_316 = arith.constant dense<0.000000e+00> : vector<16x8xf32>
    %967 = tpu.matmul %962, %965, %cst_316 {dimension_numbers = #tpu.dot_dimension_numbers<[1], [0], [0], [1], [0, 0, 1, 1], [], []>} : vector<16x8xf32>, vector<8x8xf32>, vector<16x8xf32> -> vector<16x8xf32>
    %968 = arith.addf %966, %967 : vector<16x8xf32>
    %969 = vector.broadcast %963 : vector<16x1xf32> to vector<16x8xf32>
    %970 = arith.addf %968, %969 : vector<16x8xf32>
    %c0_317 = arith.constant 0 : index
    %c0_318 = arith.constant 0 : index
    %c0_319 = arith.constant 0 : index
    %971 = vector.load %arg3[%c0_317, %c0_318, %c0_319] : memref<2x16x8xf32, #tpu.memory_space<vmem>>, vector<1x16x8xf32>
    %972 = vector.shape_cast %971 : vector<1x16x8xf32> to vector<16x8xf32>
    %973 = arith.addf %970, %972 : vector<16x8xf32>
    %c0_320 = arith.constant 0 : index
    %c0_321 = arith.constant 0 : index
    %c0_322 = arith.constant 0 : index
    %974 = vector.load %arg6[%c0_320, %c0_321, %c0_322] : memref<2x16x8xf32, #tpu.memory_space<vmem>>, vector<1x16x8xf32>
    %975 = vector.shape_cast %974 : vector<1x16x8xf32> to vector<16x8xf32>
    %976 = vector.shape_cast %973 : vector<16x8xf32> to vector<1x16x8xf32>
    tpu.vector_store %arg6[%c0_320, %c0_321, %c0_322], %976 {strides = array<i32>} : memref<2x16x8xf32, #tpu.memory_space<vmem>>, vector<1x16x8xf32>,
    %c1_323 = arith.constant 1 : index
    %c0_324 = arith.constant 0 : index
    %977 = tpu.strided_load %arg9[%c1_323, %c0_324] {strides = array<i32: 2, 1>} : memref<32x8xf32, #tpu.memory_space<vmem>>, vector<16x8xf32>
    %c1_325 = arith.constant 1 : index
    %c0_326 = arith.constant 0 : index
    %978 = tpu.strided_load %arg10[%c1_325, %c0_326] {strides = array<i32: 2, 1>} : memref<16x8xf32, #tpu.memory_space<vmem>>, vector<8x8xf32>
    %cst_327 = arith.constant dense<0.000000e+00> : vector<16x8xf32>
    %979 = tpu.matmul %961, %977, %cst_327 {dimension_numbers = #tpu.dot_dimension_numbers<[1], [0], [0], [1], [0, 0, 1, 1], [], []>} : vector<16x16xf32>, vector<16x8xf32>, vector<16x8xf32> -> vector<16x8xf32>
    %cst_328 = arith.constant dense<0.000000e+00> : vector<16x8xf32>
    %980 = tpu.matmul %962, %978, %cst_328 {dimension_numbers = #tpu.dot_dimension_numbers<[1], [0], [0], [1], [0, 0, 1, 1], [], []>} : vector<16x8xf32>, vector<8x8xf32>, vector<16x8xf32> -> vector<16x8xf32>
    %981 = arith.addf %979, %980 : vector<16x8xf32>
    %982 = vector.broadcast %963 : vector<16x1xf32> to vector<16x8xf32>
    %983 = arith.addf %981, %982 : vector<16x8xf32>
    %c1_329 = arith.constant 1 : index
    %c0_330 = arith.constant 0 : index
    %c0_331 = arith.constant 0 : index
    %984 = vector.load %arg3[%c1_329, %c0_330, %c0_331] : memref<2x16x8xf32, #tpu.memory_space<vmem>>, vector<1x16x8xf32>
    %985 = vector.shape_cast %984 : vector<1x16x8xf32> to vector<16x8xf32>
    %986 = arith.addf %983, %985 : vector<16x8xf32>
    %c1_332 = arith.constant 1 : index
    %c0_333 = arith.constant 0 : index
    %c0_334 = arith.constant 0 : index
    %987 = vector.load %arg6[%c1_332, %c0_333, %c0_334] : memref<2x16x8xf32, #tpu.memory_space<vmem>>, vector<1x16x8xf32>
    %988 = vector.shape_cast %987 : vector<1x16x8xf32> to vector<16x8xf32>
    %989 = vector.shape_cast %986 : vector<16x8xf32> to vector<1x16x8xf32>
    tpu.vector_store %arg6[%c1_332, %c0_333, %c0_334], %989 {strides = array<i32>} : memref<2x16x8xf32, #tpu.memory_space<vmem>>, vector<1x16x8xf32>,
    return
  }
  func.func @transform_0(%arg0: i32) -> (i32, i32) {
    %c0_i32 = arith.constant 0 : i32
    %c0_i32_0 = arith.constant 0 : i32
    %c0_i32_1 = arith.constant 0 : i32
    return %c0_i32, %c0_i32_0 : i32, i32
  }
  func.func @transform_1(%arg0: i32) -> (i32, i32) {
    %c0_i32 = arith.constant 0 : i32
    %c0_i32_0 = arith.constant 0 : i32
    %c0_i32_1 = arith.constant 0 : i32
    return %c0_i32, %c0_i32_0 : i32, i32
  }
  func.func @transform_2(%arg0: i32) -> (i32, i32, i32) {
    %c0_i32 = arith.constant 0 : i32
    %c0_i32_0 = arith.constant 0 : i32
    %c0_i32_1 = arith.constant 0 : i32
    %c0_i32_2 = arith.constant 0 : i32
    return %c0_i32, %c0_i32_0, %c0_i32_1 : i32, i32, i32
  }
  func.func @transform_3(%arg0: i32) -> (i32, i32, i32) {
    %c0_i32 = arith.constant 0 : i32
    %c0_i32_0 = arith.constant 0 : i32
    %c0_i32_1 = arith.constant 0 : i32
    %c0_i32_2 = arith.constant 0 : i32
    return %c0_i32, %c0_i32_0, %c0_i32_1 : i32, i32, i32
  }
  func.func @transform_4(%arg0: i32) -> (i32, i32) {
    %c0_i32 = arith.constant 0 : i32
    %c0_i32_0 = arith.constant 0 : i32
    %c0_i32_1 = arith.constant 0 : i32
    return %c0_i32, %c0_i32_0 : i32, i32
  }
  func.func @transform_5(%arg0: i32) -> (i32, i32, i32) {
    %c0_i32 = arith.constant 0 : i32
    %c0_i32_0 = arith.constant 0 : i32
    %c0_i32_1 = arith.constant 0 : i32
    %c0_i32_2 = arith.constant 0 : i32
    return %c0_i32, %c0_i32_0, %c0_i32_1 : i32, i32, i32
  }
}

</mosaic_0001>

<bundles_post_ra>
// kernel: tpu_custom_call.1
= control target key start
LH: loop header
LB: loop body
LE: loop exit
PB: predicated region body
PF: predicated region fallthrough
CT: control target
= control target key end

     0   :  { %vm35_vm0 = vcmask 64512   ;;  %v4044_v3 = vmov 0.0   ;;  %vm77_vm1 = vcmask 261120   ;;  %s4045_s26 = smov 112   ;;  %s4046_s27 = smov 8   ;;  %vm181_vm6 = vcmask 58368   ;;  %s4717_s3 = inlined_call_operand.vmem [shape: f32[4,25,32], index: 3, kind: input, shape index: {}]   ;;  %s4718_s0 = inlined_call_operand.vmem [shape: f32[32,8], index: 0, kind: input, shape index: {}]   ;;  %s4719_s1 = inlined_call_operand.vmem [shape: f32[16,16], index: 1, kind: input, shape index: {}]   ;;  %s4720_s4 = inlined_call_operand.vmem [shape: f32[16,25], index: 4, kind: input, shape index: {}]   ;;  %s4721_s2 = inlined_call_operand.vmem [shape: f32[2,16,8], index: 2, kind: input, shape index: {}]   ;;  %s4722_s5 = inlined_call_operand.vmem [shape: f32[2,16,8], index: 5, kind: output, shape index: {}]  }
   0x1   :  { %v20_v0 = vld [vmem:[%s4717_s3] sm:$0xff]  ;;  %v4089_v2 = vld [vmem:[%s4717_s3 + $0x10] sm:$0xff]  ;;  %v4101_v4 = vld [vmem:[%s4717_s3 + $0x18] ss:$0 sm:$0xff]  ;;  %s4047_s28 = smov 16   ;;  %s4048_s29 = smov 104  }
   0x2   :  { %v28_v1 = vld [vmem:[%s4718_s0] sm:$0xff]  ;;  %63 = vmatpush.msra.mxu0 %v20_v0  ;;  %134 = vmatpush.msra.mxu2 %v4089_v2  ;;  %v3520_v52 = vld [vmem:[%s4717_s3 + $0x48] sm:$0xff]  ;;  %vm83_vm11 = vcmask 130048   ;;  %v4125_v55 = vld [vmem:[%s4717_s3 + $0x50] sm:$0xff] }
   0x3   :  { %3523 = vmatmul.msk.f32.vlgmr.msra.gmra.mxu0 %vm35_vm0, %v28_v1  ;;  %135 = vmatmul.f32.vlgmr.msra.gmra.mxu2 %v4044_v3  ;;  %v3519_v53 = vld [vmem:[%s4717_s3 + $0x40] sm:$0xff]  ;;  %v4142_v60 = vld [vmem:[%s4717_s3 + $0x58] ss:$0 sm:$0xff] }
   0x4   :  { %265 = vmatpush.msrb.mxu2 %v4089_v2  ;;  %793 = vmatpush.msrb.mxu0 %v4089_v2  ;;  %v32_v54 = vld [vmem:[%s4719_s1] sm:$0xff] }
   0x5   :  { %104 = vmatpush.msra.mxu1 %v3520_v52  ;;  %199 = vmatpush.msra.mxu3 %v4125_v55 }
   0x6   :  { %397 = vmatpush.msra.mxu2 %v4089_v2  ;;  %1057 = vmatpush.msra.mxu0 %v4089_v2 }
   0x7   :  { %105 = vmatpush.msra.mxu1 %v3519_v53  ;;  %200 = vmatmul.f32.vlgmr.msra.gmra.mxu3 %v4044_v3 }
   0x8   :  { %3527 = vmatmul.msk.f32.vlgmr.msra.gmra.mxu1 %vm83_vm11, %v32_v54  ;;  %331 = vmatpush.msrb.mxu3 %v4125_v55  ;;  %v33_v54 = vld [vmem:[%s4719_s1 + $0x8] sm:$0xff] }
   0x9   :  { %529 = vmatpush.msrb.mxu1 %v4089_v2 }
   0xa   :  { %463 = vmatpush.msra.mxu3 %v4125_v55 }
   0xb   :  { %727 = vmatpush.msra.mxu1 %v4125_v55 }
  0x10   :  { %3528 = vmatmul.msk.f32.gmra.mxu1 %vm83_vm11, %v33_v54 }
  0x80   :  { %v65_v5 = vpop.f32.mrf.mxu0 }
  0x81   :  { %v66_v6 = vadd.f32 %v4101_v4, %v65_v5 }
  0x83   :  { %78 = vst.msk [vmem:[#allocation2] sm:$0xff] %vm77_vm1, %v66_v6 }
  0x85   :  { %v107_v61 = vpop.f32.mrf.mxu1 }
  0x86   :  { %v136_v7 = vpop.f32.mrf.mxu2  ;;  %v108_v62 = vadd.f32 %v4142_v60, %v107_v61 }
  0x88   :  { %113 = vst.msk [vmem:[#allocation3] sm:$0xff] %vm77_vm1, %v108_v62 }
  0x8a   :  { %v115_v8 = vld [vmem:[#allocation2] sm:$0x3]  ;;  %v247_v33 = vld [vmem:[#allocation2 + $0x2] sm:$0x3]  ;;  %v201_v63 = vpop.f32.mrf.mxu3 }
  0x8b   :  { %v139_v9 = vadd.f32 %v136_v7, %v115_v8 }
  0x8d   :  { %3657 = vtanh.f32 %v139_v9  ;;  %v3529_v11 = vmul.f32 -1.442695, %v139_v9 }
  0x8f   :  { %3659 = vpow2.f32 %v3529_v11  ;;  %v183_v0 = vld [vmem:[#allocation3] sm:$0x3] }
  0x90   :  { %v204_v1 = vadd.f32 %v201_v63, %v183_v0 }
  0x92   :  { %v3530_v8 = vmul.f32 -1.442695, %v204_v1 }
  0x93   :  { %v3658_v10 = vpop.eup %3657 }
  0x94   :  { %162 = vrot.lane.b32.xlu0 %v3658_v10, %s4045_s26 }
  0x95   :  { %v3660_v12 = vpop.eup %3659 }
  0x96   :  { %v143_v13 = vadd.f32 1.0, %v3660_v12 }
  0x98   :  { %3661 = vrcp.f32 %v143_v13  ;;  %v155_v19 = vand.u32 2147483648, %v143_v13  ;;  %vm149_vm3 = vweird.f32 %v143_v13  ;;  %v153_v20 = vand.u32 2147483647, %v143_v13 }
  0x9a   :  { %v156_v22 = vor.u32 1.1754944e-38, %v155_v19  ;;  %vm154_vm5 = vcmp.eq.f32.partialorder %v153_v20, 8.507059e+37 }
  0x9e   :  { %v3662_v14 = vpop.eup %3661 }
  0x9f   :  { %v145_v15 = vmul.f32 %v3662_v14, %v143_v13  ;;  %vm150_vm2 = vweird.f32 %v3662_v14 }
  0xa0   :  { %vm151_vm4 = vmor %vm149_vm3, %vm150_vm2 }
  0xa1   :  { %v146_v16 = vsub.f32 1.0, %v145_v15 }
  0xa3   :  { %v147_v17 = vmul.f32 %v3662_v14, %v146_v16 }
  0xa5   :  { %v148_v18 = vadd.f32 %v3662_v14, %v147_v17 }
  0xa7   :  { %v152_v21 = vsel %vm151_vm4, %v3662_v14, %v148_v18 }
  0xa8   :  { %v157_v24 = vsel %vm154_vm5, %v156_v22, %v152_v21 }
  0xa9   :  { %v160_v26 = vmul.f32 0.0, %v157_v24 }
 0x106   :  { %v163_v23 = vpop.permute.xlu0 %162 }
 0x107   :  { %v165_v25 = vmul.f32 %v163_v23, %v157_v24 }
 0x109   :  { %167 = vrot.lane.b32.xlu0 %v165_v25, %s4046_s27 }
 0x17b   :  { %v168_v27 = vpop.permute.xlu0 %167 }
 0x17c   :  { %v170_v28 = vadd.f32 %v168_v27, %v160_v26 }
 0x17e   :  { %3663 = vtanh.f32 %v170_v28 }
 0x184   :  { %v3664_v29 = vpop.eup %3663 }
 0x185   :  { %173 = vrot.lane.b32.xlu1 %v3664_v29, %s4047_s28 }
 0x1f7   :  { %v174_v30 = vpop.permute.xlu1 %173 }
 0x1f8   :  { %v176_v31 = vmul.f32 %v174_v30, %v157_v24  ;;  %v379_v24 = vld [vmem:[#allocation2 + $0x4] sm:$0x3] }
 0x1fa   :  { %178 = vrot.lane.b32.xlu1 %v176_v31, %s4048_s29 }
 0x26c   :  { %v179_v32 = vpop.permute.xlu1 %178 }
 0x26d   :  { %182 = vst.msk [vmem:[#allocation4] sm:$0x3] %vm181_vm6, %v179_v32  ;;  %3531 = vmatmul.msk.f32.vlgmr.msrb.gmra.mxu2 %vm35_vm0, %v179_v32 }
 0x26e   :  { %595 = vmatpush.msrb.mxu2 %v4125_v55 }
 0x2f0   :  { %v267_v34 = vpop.f32.mrf.mxu2 }
 0x2f1   :  { %v270_v35 = vadd.f32 %v267_v34, %v247_v33 }
 0x2f3   :  { %3665 = vtanh.f32 %v270_v35  ;;  %v3532_v37 = vmul.f32 -1.442695, %v270_v35 }
 0x2f5   :  { %3667 = vpow2.f32 %v3532_v37 }
 0x2f9   :  { %v3666_v36 = vpop.eup %3665 }
 0x2fa   :  { %293 = vrot.lane.b32.xlu2 %v3666_v36, %s4045_s26 }
 0x2fb   :  { %v3668_v38 = vpop.eup %3667 }
 0x2fc   :  { %v274_v39 = vadd.f32 1.0, %v3668_v38 }
 0x2fe   :  { %3669 = vrcp.f32 %v274_v39  ;;  %v286_v45 = vand.u32 2147483648, %v274_v39  ;;  %vm280_vm8 = vweird.f32 %v274_v39  ;;  %v284_v46 = vand.u32 2147483647, %v274_v39 }
 0x300   :  { %v287_v48 = vor.u32 1.1754944e-38, %v286_v45  ;;  %vm285_vm10 = vcmp.eq.f32.partialorder %v284_v46, 8.507059e+37 }
 0x304   :  { %v3670_v40 = vpop.eup %3669 }
 0x305   :  { %v276_v41 = vmul.f32 %v3670_v40, %v274_v39  ;;  %vm281_vm7 = vweird.f32 %v3670_v40 }
 0x306   :  { %vm282_vm9 = vmor %vm280_vm8, %vm281_vm7 }
 0x307   :  { %v277_v42 = vsub.f32 1.0, %v276_v41 }
 0x309   :  { %v278_v43 = vmul.f32 %v3670_v40, %v277_v42 }
 0x30b   :  { %v279_v44 = vadd.f32 %v3670_v40, %v278_v43 }
 0x30d   :  { %v283_v47 = vsel %vm282_vm9, %v3670_v40, %v279_v44 }
 0x30e   :  { %v288_v50 = vsel %vm285_vm10, %v287_v48, %v283_v47 }
 0x30f   :  { %v291_v56 = vmul.f32 %v288_v50, %v170_v28 }
 0x354   :  { %v294_v49 = vpop.permute.xlu2 %293 }
 0x355   :  { %v296_v51 = vmul.f32 %v294_v49, %v288_v50 }
 0x357   :  { %298 = vrot.lane.b32.xlu2 %v296_v51, %s4046_s27 }
 0x3b1   :  { %v299_v57 = vpop.permute.xlu2 %298 }
 0x3b2   :  { %v4135_v58 = vadd.f32 %v299_v57, %v291_v56 }
 0x3b4   :  { %3671 = vtanh.f32 %v4135_v58 }
 0x3b5   :  { %3673 = vtanh.f32 %v204_v1 }
 0x3b6   :  { %3675 = vpow2.f32 %v3530_v8  ;;  %v110_v8 = vpop.f32.mrf.mxu1 }
 0x3ba   :  { %v3672_v59 = vpop.eup %3671 }
 0x3bb   :  { %304 = vrot.lane.b32.xlu0 %v3672_v59, %s4047_s28  ;;  %v3674_v7 = vpop.eup %3673 }
 0x3bc   :  { %227 = vrot.lane.b32.xlu2 %v3674_v7, %s4045_s26  ;;  %v3676_v9 = vpop.eup %3675 }
 0x3bd   :  { %v208_v10 = vadd.f32 1.0, %v3676_v9 }
 0x3bf   :  { %3677 = vrcp.f32 %v208_v10  ;;  %v220_v13 = vand.u32 2147483648, %v208_v10  ;;  %vm214_vm12 = vweird.f32 %v208_v10  ;;  %v218_v15 = vand.u32 2147483647, %v208_v10 }
 0x3c1   :  { %v221_v17 = vor.u32 1.1754944e-38, %v220_v13  ;;  %vm219_vm15 = vcmp.eq.f32.partialorder %v218_v15, 8.507059e+37 }
 0x3c5   :  { %v3678_v11 = vpop.eup %3677 }
 0x3c6   :  { %v210_v12 = vmul.f32 %v3678_v11, %v208_v10  ;;  %vm215_vm13 = vweird.f32 %v3678_v11  ;;  %v111_v10 = vadd.f32 %v4142_v60, %v110_v8 }
 0x3c7   :  { %vm216_vm14 = vmor %vm214_vm12, %vm215_vm13 }
 0x3c8   :  { %v211_v14 = vsub.f32 1.0, %v210_v12  ;;  %114 = vst.msk [vmem:[#allocation3 + $0x8] sm:$0xff] %vm77_vm1, %v111_v10 }
 0x3ca   :  { %v212_v16 = vmul.f32 %v3678_v11, %v211_v14 }
 0x3cc   :  { %v213_v18 = vadd.f32 %v3678_v11, %v212_v16 }
 0x3ce   :  { %v217_v20 = vsel %vm216_vm14, %v3678_v11, %v213_v18 }
 0x3cf   :  { %v222_v21 = vsel %vm219_vm15, %v221_v17, %v217_v20  ;;  %v511_v20 = vld [vmem:[#allocation2 + $0x6] sm:$0x3] }
 0x3d0   :  { %v225_v27 = vmul.f32 0.0, %v222_v21 }
 0x416   :  { %v228_v19 = vpop.permute.xlu2 %227 }
 0x417   :  { %v230_v22 = vmul.f32 %v228_v19, %v222_v21 }
 0x42d   :  { %v305_v5 = vpop.permute.xlu0 %304 }
 0x42e   :  { %v307_v6 = vmul.f32 %v305_v5, %v288_v50 }
 0x430   :  { %309 = vrot.lane.b32.xlu1 %v307_v6, %s4048_s29 }
 0x438   :  { %232 = vrot.lane.b32.xlu1 %v230_v22, %s4046_s27 }
 0x4a2   :  { %v310_v23 = vpop.permute.xlu1 %309 }
 0x4a3   :  { %312 = vst.msk [vmem:[#allocation4 + $0x2] sm:$0x3] %vm181_vm6, %v310_v23  ;;  %3535 = vmatmul.msk.f32.vlgmr.msra.gmra.mxu2 %vm35_vm0, %v310_v23 }
 0x4a4   :  { %859 = vmatpush.msra.mxu2 %v4125_v55 }
 0x4aa   :  { %v233_v28 = vpop.permute.xlu1 %232 }
 0x4ab   :  { %v4152_v29 = vadd.f32 %v233_v28, %v225_v27 }
 0x526   :  { %v399_v25 = vpop.f32.mrf.mxu2 }
 0x527   :  { %v402_v26 = vadd.f32 %v399_v25, %v379_v24 }
 0x529   :  { %3679 = vtanh.f32 %v402_v26  ;;  %v3536_v32 = vmul.f32 -1.442695, %v402_v26 }
 0x52a   :  { %3681 = vtanh.f32 %v4152_v29 }
 0x52b   :  { %3683 = vpow2.f32 %v3536_v32 }
 0x52f   :  { %v3680_v30 = vpop.eup %3679 }
 0x530   :  { %425 = vrot.lane.b32.xlu0 %v3680_v30, %s4045_s26  ;;  %v3682_v31 = vpop.eup %3681 }
 0x531   :  { %v3684_v33 = vpop.eup %3683 }
 0x532   :  { %v406_v34 = vadd.f32 1.0, %v3684_v33 }
 0x534   :  { %3685 = vrcp.f32 %v406_v34  ;;  %v418_v40 = vand.u32 2147483648, %v406_v34  ;;  %vm412_vm3 = vweird.f32 %v406_v34  ;;  %v416_v41 = vand.u32 2147483647, %v406_v34 }
 0x536   :  { %v419_v43 = vor.u32 1.1754944e-38, %v418_v40  ;;  %vm417_vm5 = vcmp.eq.f32.partialorder %v416_v41, 8.507059e+37 }
 0x538   :  { %238 = vrot.lane.b32.xlu0 %v3682_v31, %s4047_s28 }
 0x53a   :  { %v3686_v35 = vpop.eup %3685 }
 0x53b   :  { %v408_v36 = vmul.f32 %v3686_v35, %v406_v34  ;;  %vm413_vm2 = vweird.f32 %v3686_v35 }
 0x53c   :  { %vm414_vm4 = vmor %vm412_vm3, %vm413_vm2 }
 0x53d   :  { %v409_v37 = vsub.f32 1.0, %v408_v36 }
 0x53f   :  { %v410_v38 = vmul.f32 %v3686_v35, %v409_v37 }
 0x541   :  { %v411_v39 = vadd.f32 %v3686_v35, %v410_v38 }
 0x543   :  { %v415_v42 = vsel %vm414_vm4, %v3686_v35, %v411_v39 }
 0x544   :  { %v420_v45 = vsel %vm417_vm5, %v419_v43, %v415_v42 }
 0x545   :  { %v423_v49 = vmul.f32 %v420_v45, %v4135_v58  ;;  %v313_v58 = vld [vmem:[#allocation3 + $0x2] sm:$0x3] }
 0x5a2   :  { %v426_v44 = vpop.permute.xlu0 %425 }
 0x5a3   :  { %v428_v46 = vmul.f32 %v426_v44, %v420_v45 }
 0x5a5   :  { %430 = vrot.lane.b32.xlu2 %v428_v46, %s4046_s27 }
 0x5aa   :  { %v239_v47 = vpop.permute.xlu0 %238 }
 0x5ab   :  { %v241_v48 = vmul.f32 %v239_v47, %v222_v21 }
 0x5ad   :  { %243 = vrot.lane.b32.xlu2 %v241_v48, %s4048_s29 }
 0x5ff   :  { %v431_v50 = vpop.permute.xlu2 %430 }
 0x600   :  { %v4160_v51 = vadd.f32 %v431_v50, %v423_v49 }
 0x602   :  { %3687 = vtanh.f32 %v4160_v51 }
 0x607   :  { %v244_v52 = vpop.permute.xlu2 %243 }
 0x608   :  { %v3688_v53 = vpop.eup %3687  ;;  %246 = vst.msk [vmem:[#allocation5] sm:$0x3] %vm181_vm6, %v244_v52  ;;  %3533 = vmatmul.msk.f32.vlgmr.msrb.gmra.mxu3 %vm35_vm0, %v244_v52 }
 0x609   :  { %436 = vrot.lane.b32.xlu1 %v3688_v53, %s4047_s28  ;;  %661 = vmatpush.msrb.mxu3 %v4089_v2 }
 0x67b   :  { %v437_v56 = vpop.permute.xlu1 %436 }
 0x67c   :  { %v439_v57 = vmul.f32 %v437_v56, %v420_v45 }
 0x67e   :  { %441 = vrot.lane.b32.xlu0 %v439_v57, %s4048_s29 }
 0x68b   :  { %v333_v59 = vpop.f32.mrf.mxu3 }
 0x68c   :  { %v336_v61 = vadd.f32 %v333_v59, %v313_v58 }
 0x68e   :  { %3689 = vtanh.f32 %v336_v61  ;;  %v3534_v63 = vmul.f32 -1.442695, %v336_v61 }
 0x690   :  { %3691 = vpow2.f32 %v3534_v63 }
 0x694   :  { %v3690_v62 = vpop.eup %3689 }
 0x695   :  { %359 = vrot.lane.b32.xlu1 %v3690_v62, %s4045_s26 }
 0x696   :  { %v3692_v0 = vpop.eup %3691 }
 0x697   :  { %v340_v1 = vadd.f32 1.0, %v3692_v0 }
 0x699   :  { %3693 = vrcp.f32 %v340_v1  ;;  %v352_v13 = vand.u32 2147483648, %v340_v1  ;;  %vm346_vm8 = vweird.f32 %v340_v1  ;;  %v350_v14 = vand.u32 2147483647, %v340_v1 }
 0x69b   :  { %v353_v16 = vor.u32 1.1754944e-38, %v352_v13  ;;  %vm351_vm10 = vcmp.eq.f32.partialorder %v350_v14, 8.507059e+37  ;;  %v445_v13 = vld [vmem:[#allocation3 + $0x4] sm:$0x3] }
 0x69f   :  { %v3694_v6 = vpop.eup %3693 }
 0x6a0   :  { %v342_v7 = vmul.f32 %v3694_v6, %v340_v1  ;;  %vm347_vm7 = vweird.f32 %v3694_v6 }
 0x6a1   :  { %vm348_vm9 = vmor %vm346_vm8, %vm347_vm7 }
 0x6a2   :  { %v343_v9 = vsub.f32 1.0, %v342_v7 }
 0x6a4   :  { %v344_v11 = vmul.f32 %v3694_v6, %v343_v9 }
 0x6a6   :  { %v345_v12 = vadd.f32 %v3694_v6, %v344_v11 }
 0x6a8   :  { %v349_v15 = vsel %vm348_vm9, %v3694_v6, %v345_v12 }
 0x6a9   :  { %v354_v17 = vsel %vm351_vm10, %v353_v16, %v349_v15 }
 0x6aa   :  { %v357_v23 = vmul.f32 %v354_v17, %v4152_v29 }
 0x6f0   :  { %v442_v5 = vpop.permute.xlu0 %441 }
 0x6f1   :  { %444 = vst.msk [vmem:[#allocation4 + $0x4] sm:$0x3] %vm181_vm6, %v442_v5  ;;  %3539 = vmatmul.msk.f32.vlgmr.msrb.gmra.mxu1 %vm35_vm0, %v442_v5 }
 0x6f2   :  { %991 = vmatpush.msrb.mxu1 %v4125_v55 }
 0x707   :  { %v360_v18 = vpop.permute.xlu1 %359 }
 0x708   :  { %v362_v19 = vmul.f32 %v360_v18, %v354_v17 }
 0x70a   :  { %364 = vrot.lane.b32.xlu0 %v362_v19, %s4046_s27 }
 0x76e   :  { %v531_v21 = vpop.f32.mrf.mxu1 }
 0x76f   :  { %v534_v60 = vadd.f32 %v531_v21, %v511_v20 }
 0x771   :  { %3695 = vtanh.f32 %v534_v60  ;;  %v3540_v27 = vmul.f32 -1.442695, %v534_v60 }
 0x777   :  { %v3696_v22 = vpop.eup %3695 }
 0x778   :  { %557 = vrot.lane.b32.xlu2 %v3696_v22, %s4045_s26 }
 0x77c   :  { %v365_v24 = vpop.permute.xlu0 %364 }
 0x77d   :  { %v4181_v25 = vadd.f32 %v365_v24, %v357_v23 }
 0x77f   :  { %3697 = vtanh.f32 %v4181_v25 }
 0x780   :  { %3699 = vpow2.f32 %v3540_v27  ;;  %v31_v27 = vld [vmem:[%s4718_s0 + $0x18] sm:$0xff] }
 0x785   :  { %v3698_v26 = vpop.eup %3697 }
 0x786   :  { %370 = vrot.lane.b32.xlu2 %v3698_v26, %s4047_s28  ;;  %v3700_v28 = vpop.eup %3699  ;;  %v30_v26 = vld [vmem:[%s4718_s0 + $0x10] sm:$0xff] }
 0x787   :  { %v538_v30 = vadd.f32 1.0, %v3700_v28 }
 0x789   :  { %3701 = vrcp.f32 %v538_v30  ;;  %v550_v29 = vand.u32 2147483648, %v538_v30  ;;  %vm544_vm13 = vweird.f32 %v538_v30  ;;  %v548_v36 = vand.u32 2147483647, %v538_v30 }
 0x78b   :  { %v551_v38 = vor.u32 1.1754944e-38, %v550_v29  ;;  %vm549_vm15 = vcmp.eq.f32.partialorder %v548_v36, 8.507059e+37 }
 0x78f   :  { %v3702_v31 = vpop.eup %3701 }
 0x790   :  { %v540_v32 = vmul.f32 %v3702_v31, %v538_v30  ;;  %vm545_vm12 = vweird.f32 %v3702_v31 }
 0x791   :  { %vm546_vm14 = vmor %vm544_vm13, %vm545_vm12 }
 0x792   :  { %v541_v33 = vsub.f32 1.0, %v540_v32 }
 0x794   :  { %v542_v34 = vmul.f32 %v3702_v31, %v541_v33 }
 0x796   :  { %v543_v35 = vadd.f32 %v3702_v31, %v542_v34 }
 0x798   :  { %v547_v37 = vsel %vm546_vm14, %v3702_v31, %v543_v35 }
 0x799   :  { %v552_v40 = vsel %vm549_vm15, %v551_v38, %v547_v37 }
 0x79a   :  { %v555_v44 = vmul.f32 %v552_v40, %v4160_v51  ;;  %v29_v51 = vld [vmem:[%s4718_s0 + $0x8] sm:$0xff] }
 0x79b   :  { %3524 = vmatmul.msk.f32.gmra.mxu0 %vm35_vm0, %v29_v51 }
 0x7a3   :  { %3525 = vmatmul.msk.f32.gmra.mxu0 %vm35_vm0, %v30_v26 }
 0x7ab   :  { %3526 = vmatmul.msk.f32.gmra.mxu0 %vm35_vm0, %v31_v27 }
 0x7d2   :  { %v558_v39 = vpop.permute.xlu2 %557 }
 0x7d3   :  { %v560_v41 = vmul.f32 %v558_v39, %v552_v40 }
 0x7d5   :  { %562 = vrot.lane.b32.xlu1 %v560_v41, %s4046_s27 }
 0x7e0   :  { %v371_v42 = vpop.permute.xlu2 %370 }
 0x7e1   :  { %v373_v43 = vmul.f32 %v371_v42, %v354_v17 }
 0x7e3   :  { %375 = vrot.lane.b32.xlu1 %v373_v43, %s4048_s29 }
 0x818   :  { %v68_v53 = vpop.f32.mrf.mxu0 }
 0x819   :  { %v69_v54 = vadd.f32 %v4101_v4, %v68_v53 }
 0x81b   :  { %79 = vst.msk [vmem:[#allocation2 + $0x8] sm:$0xff] %vm77_vm1, %v69_v54 }
 0x820   :  { %v71_v42 = vpop.f32.mrf.mxu0 }
 0x821   :  { %v72_v43 = vadd.f32 %v4101_v4, %v71_v42 }
 0x822   :  { %v643_v57 = vld [vmem:[#allocation2 + $0x8] sm:$0x3] }
 0x823   :  { %80 = vst.msk [vmem:[#allocation2 + $0x10] sm:$0xff] %vm77_vm1, %v72_v43 }
 0x847   :  { %v563_v45 = vpop.permute.xlu1 %562 }
 0x848   :  { %v565_v46 = vadd.f32 %v563_v45, %v555_v44  ;;  %v74_v44 = vpop.f32.mrf.mxu0 }
 0x849   :  { %v75_v45 = vadd.f32 %v4101_v4, %v74_v44 }
 0x84a   :  { %3703 = vtanh.f32 %v565_v46 }
 0x84b   :  { %81 = vst.msk [vmem:[#allocation2 + $0x18] sm:$0xff] %vm77_vm1, %v75_v45 }
 0x850   :  { %v3704_v47 = vpop.eup %3703 }
 0x851   :  { %568 = vrot.lane.b32.xlu0 %v3704_v47, %s4047_s28  ;;  %v775_v47 = vld [vmem:[#allocation2 + $0xa] sm:$0x3] }
 0x855   :  { %v376_v48 = vpop.permute.xlu1 %375 }
 0x856   :  { %378 = vst.msk [vmem:[#allocation5 + $0x2] sm:$0x3] %vm181_vm6, %v376_v48  ;;  %3537 = vmatmul.msk.f32.vlgmr.msra.gmra.mxu3 %vm35_vm0, %v376_v48 }
 0x857   :  { %925 = vmatpush.msra.mxu3 %v4089_v2 }
 0x8c3   :  { %v569_v49 = vpop.permute.xlu0 %568 }
 0x8c4   :  { %v571_v50 = vmul.f32 %v569_v49, %v552_v40 }
 0x8c6   :  { %573 = vrot.lane.b32.xlu2 %v571_v50, %s4048_s29 }
 0x8d9   :  { %v465_v56 = vpop.f32.mrf.mxu3 }
 0x8da   :  { %v468_v14 = vadd.f32 %v465_v56, %v445_v13 }
 0x8dc   :  { %v3538_v22 = vmul.f32 -1.442695, %v468_v14 }
 0x920   :  { %v574_v52 = vpop.permute.xlu2 %573 }
 0x921   :  { %576 = vst.msk [vmem:[#allocation4 + $0x6] sm:$0x3] %vm181_vm6, %v574_v52  ;;  %3543 = vmatmul.msk.f32.vlgmr.msrb.gmra.mxu3 %vm35_vm0, %v574_v52 }
 0x922   :  { %1189 = vmatpush.msrb.mxu3 %v4089_v2 }
 0x9a4   :  { %v663_v58 = vpop.f32.mrf.mxu3 }
 0x9a5   :  { %v666_v59 = vadd.f32 %v663_v58, %v643_v57 }
 0x9a7   :  { %3705 = vtanh.f32 %v666_v59  ;;  %v3544_v62 = vmul.f32 -1.442695, %v666_v59 }
 0x9a9   :  { %3707 = vpow2.f32 %v3544_v62 }
 0x9ad   :  { %v3706_v61 = vpop.eup %3705 }
 0x9ae   :  { %689 = vrot.lane.b32.xlu0 %v3706_v61, %s4045_s26 }
 0x9af   :  { %v3708_v63 = vpop.eup %3707 }
 0x9b0   :  { %v670_v0 = vadd.f32 1.0, %v3708_v63 }
 0x9b2   :  { %3709 = vrcp.f32 %v670_v0  ;;  %v682_v9 = vand.u32 2147483648, %v670_v0  ;;  %vm676_vm3 = vweird.f32 %v670_v0  ;;  %v680_v10 = vand.u32 2147483647, %v670_v0 }
 0x9b3   :  { %3711 = vtanh.f32 %v468_v14 }
 0x9b4   :  { %v683_v12 = vor.u32 1.1754944e-38, %v682_v9  ;;  %vm681_vm5 = vcmp.eq.f32.partialorder %v680_v10, 8.507059e+37 }
 0x9b8   :  { %v3710_v1 = vpop.eup %3709 }
 0x9b9   :  { %v672_v5 = vmul.f32 %v3710_v1, %v670_v0  ;;  %vm677_vm2 = vweird.f32 %v3710_v1  ;;  %v3712_v18 = vpop.eup %3711 }
 0x9ba   :  { %vm678_vm4 = vmor %vm676_vm3, %vm677_vm2 }
 0x9bb   :  { %v673_v6 = vsub.f32 1.0, %v672_v5 }
 0x9bd   :  { %v674_v7 = vmul.f32 %v3710_v1, %v673_v6 }
 0x9bf   :  { %v675_v8 = vadd.f32 %v3710_v1, %v674_v7 }
 0x9c1   :  { %v679_v11 = vsel %vm678_vm4, %v3710_v1, %v675_v8 }
 0x9c2   :  { %v684_v16 = vsel %vm681_vm5, %v683_v12, %v679_v11 }
 0x9c3   :  { %v687_v19 = vmul.f32 %v684_v16, %v565_v46 }
 0xa20   :  { %v690_v15 = vpop.permute.xlu0 %689 }
 0xa21   :  { %v692_v17 = vmul.f32 %v690_v15, %v684_v16 }
 0xa23   :  { %694 = vrot.lane.b32.xlu1 %v692_v17, %s4046_s27 }
 0xa2b   :  { %491 = vrot.lane.b32.xlu1 %v3712_v18, %s4045_s26  ;;  %v577_v18 = vld [vmem:[#allocation3 + $0x6] sm:$0x3] }
 0xa95   :  { %v695_v20 = vpop.permute.xlu1 %694 }
 0xa96   :  { %v4205_v21 = vadd.f32 %v695_v20, %v687_v19 }
 0xa98   :  { %3713 = vtanh.f32 %v4205_v21 }
 0xa99   :  { %3715 = vpow2.f32 %v3538_v22 }
 0xa9d   :  { %v492_v38 = vpop.permute.xlu1 %491 }
 0xa9e   :  { %v3714_v60 = vpop.eup %3713 }
 0xa9f   :  { %700 = vrot.lane.b32.xlu2 %v3714_v60, %s4047_s28  ;;  %v3716_v23 = vpop.eup %3715 }
 0xaa0   :  { %v472_v24 = vadd.f32 1.0, %v3716_v23 }
 0xaa2   :  { %3717 = vrcp.f32 %v472_v24  ;;  %v484_v29 = vand.u32 2147483648, %v472_v24  ;;  %vm478_vm8 = vweird.f32 %v472_v24  ;;  %v482_v36 = vand.u32 2147483647, %v472_v24 }
 0xaa4   :  { %v485_v39 = vor.u32 1.1754944e-38, %v484_v29  ;;  %vm483_vm10 = vcmp.eq.f32.partialorder %v482_v36, 8.507059e+37 }
 0xaa8   :  { %v3718_v28 = vpop.eup %3717 }
 0xaa9   :  { %v474_v30 = vmul.f32 %v3718_v28, %v472_v24  ;;  %vm479_vm7 = vweird.f32 %v3718_v28 }
 0xaaa   :  { %vm480_vm9 = vmor %vm478_vm8, %vm479_vm7 }
 0xaab   :  { %v475_v31 = vsub.f32 1.0, %v474_v30 }
 0xaad   :  { %v476_v32 = vmul.f32 %v3718_v28, %v475_v31 }
 0xaaf   :  { %v477_v34 = vadd.f32 %v3718_v28, %v476_v32 }
 0xab1   :  { %v481_v37 = vsel %vm480_vm9, %v3718_v28, %v477_v34 }
 0xab2   :  { %v486_v40 = vsel %vm483_vm10, %v485_v39, %v481_v37  ;;  %v907_v37 = vld [vmem:[#allocation2 + $0xc] sm:$0x3] }
 0xab3   :  { %v494_v41 = vmul.f32 %v492_v38, %v486_v40  ;;  %v489_v51 = vmul.f32 %v486_v40, %v4181_v25 }
 0xaf9   :  { %v701_v33 = vpop.permute.xlu2 %700 }
 0xafa   :  { %v703_v35 = vmul.f32 %v701_v33, %v684_v16 }
 0xafc   :  { %705 = vrot.lane.b32.xlu0 %v703_v35, %s4048_s29 }
 0xb04   :  { %496 = vrot.lane.b32.xlu0 %v494_v41, %s4046_s27 }
 0xb6e   :  { %v706_v46 = vpop.permute.xlu0 %705 }
 0xb6f   :  { %708 = vst.msk [vmem:[#allocation4 + $0x8] sm:$0x3] %vm181_vm6, %v706_v46  ;;  %3547 = vmatmul.msk.f32.vlgmr.msrb.gmra.mxu0 %vm35_vm0, %v706_v46 }
 0xb70   :  { %1321 = vmatpush.msrb.mxu0 %v4089_v2 }
 0xb76   :  { %v497_v50 = vpop.permute.xlu0 %496 }
 0xb77   :  { %v4227_v52 = vadd.f32 %v497_v50, %v489_v51 }
 0xbec   :  { %v795_v48 = vpop.f32.mrf.mxu0 }
 0xbed   :  { %v798_v49 = vadd.f32 %v795_v48, %v775_v47 }
 0xbef   :  { %3719 = vtanh.f32 %v798_v49  ;;  %v3548_v54 = vmul.f32 -1.442695, %v798_v49 }
 0xbf0   :  { %3721 = vtanh.f32 %v4227_v52 }
 0xbf1   :  { %3723 = vpow2.f32 %v3548_v54 }
 0xbf5   :  { %v3720_v53 = vpop.eup %3719 }
 0xbf6   :  { %821 = vrot.lane.b32.xlu2 %v3720_v53, %s4045_s26  ;;  %v3722_v4 = vpop.eup %3721 }
 0xbf7   :  { %v3724_v56 = vpop.eup %3723 }
 0xbf8   :  { %v802_v57 = vadd.f32 1.0, %v3724_v56 }
 0xbfa   :  { %3725 = vrcp.f32 %v802_v57  ;;  %v814_v63 = vand.u32 2147483648, %v802_v57  ;;  %vm808_vm13 = vweird.f32 %v802_v57  ;;  %v812_v0 = vand.u32 2147483647, %v802_v57 }
 0xbfc   :  { %v815_v5 = vor.u32 1.1754944e-38, %v814_v63  ;;  %vm813_vm15 = vcmp.eq.f32.partialorder %v812_v0, 8.507059e+37 }
 0xbfe   :  { %502 = vrot.lane.b32.xlu2 %v3722_v4, %s4047_s28 }
 0xc00   :  { %v3726_v58 = vpop.eup %3725 }
 0xc01   :  { %v804_v59 = vmul.f32 %v3726_v58, %v802_v57  ;;  %vm809_vm12 = vweird.f32 %v3726_v58 }
 0xc02   :  { %vm810_vm14 = vmor %vm808_vm13, %vm809_vm12 }
 0xc03   :  { %v805_v61 = vsub.f32 1.0, %v804_v59 }
 0xc05   :  { %v806_v62 = vmul.f32 %v3726_v58, %v805_v61 }
 0xc07   :  { %v807_v25 = vadd.f32 %v3726_v58, %v806_v62 }
 0xc09   :  { %v811_v1 = vsel %vm810_vm14, %v3726_v58, %v807_v25 }
 0xc0a   :  { %v816_v7 = vsel %vm813_vm15, %v815_v5, %v811_v1 }
 0xc0b   :  { %v819_v11 = vmul.f32 %v816_v7, %v4205_v21 }
 0xc50   :  { %v822_v6 = vpop.permute.xlu2 %821 }
 0xc51   :  { %v824_v8 = vmul.f32 %v822_v6, %v816_v7 }
 0xc53   :  { %826 = vrot.lane.b32.xlu1 %v824_v8, %s4046_s27  ;;  %v709_v8 = vld [vmem:[#allocation3 + $0x8] sm:$0x3] }
 0xc58   :  { %v503_v9 = vpop.permute.xlu2 %502 }
 0xc59   :  { %v505_v10 = vmul.f32 %v503_v9, %v486_v40 }
 0xc5b   :  { %507 = vrot.lane.b32.xlu1 %v505_v10, %s4048_s29 }
 0xcc5   :  { %v827_v12 = vpop.permute.xlu1 %826 }
 0xcc6   :  { %v4235_v13 = vadd.f32 %v827_v12, %v819_v11 }
 0xcc8   :  { %3727 = vtanh.f32 %v4235_v13 }
 0xccd   :  { %v508_v14 = vpop.permute.xlu1 %507 }
 0xcce   :  { %v3728_v15 = vpop.eup %3727  ;;  %510 = vst.msk [vmem:[#allocation5 + $0x4] sm:$0x3] %vm181_vm6, %v508_v14  ;;  %3541 = vmatmul.msk.f32.vlgmr.msrb.gmra.mxu2 %vm35_vm0, %v508_v14 }
 0xccf   :  { %832 = vrot.lane.b32.xlu0 %v3728_v15, %s4047_s28  ;;  %1123 = vmatpush.msrb.mxu2 %v4125_v55 }
 0xd41   :  { %v833_v16 = vpop.permute.xlu0 %832 }
 0xd42   :  { %v835_v17 = vmul.f32 %v833_v16, %v816_v7 }
 0xd44   :  { %837 = vrot.lane.b32.xlu2 %v835_v17, %s4048_s29 }
 0xd51   :  { %v597_v19 = vpop.f32.mrf.mxu2 }
 0xd52   :  { %v600_v20 = vadd.f32 %v597_v19, %v577_v18  ;;  %v4271_v18 = vld [vmem:[%s4717_s3 + $0x10] sm:$0xff] }
 0xd54   :  { %3729 = vtanh.f32 %v600_v20  ;;  %v3542_v22 = vmul.f32 -1.442695, %v600_v20 }
 0xd56   :  { %3731 = vpow2.f32 %v3542_v22 }
 0xd5a   :  { %v3730_v21 = vpop.eup %3729 }
 0xd5b   :  { %623 = vrot.lane.b32.xlu0 %v3730_v21, %s4045_s26 }
 0xd5c   :  { %v3732_v55 = vpop.eup %3731 }
 0xd5d   :  { %v604_v23 = vadd.f32 1.0, %v3732_v55 }
 0xd5f   :  { %3733 = vrcp.f32 %v604_v23  ;;  %v616_v31 = vand.u32 2147483648, %v604_v23  ;;  %vm610_vm3 = vweird.f32 %v604_v23  ;;  %v614_v32 = vand.u32 2147483647, %v604_v23 }
 0xd61   :  { %v617_v34 = vor.u32 1.1754944e-38, %v616_v31  ;;  %vm615_vm5 = vcmp.eq.f32.partialorder %v614_v32, 8.507059e+37 }
 0xd65   :  { %v3734_v24 = vpop.eup %3733 }
 0xd66   :  { %v606_v26 = vmul.f32 %v3734_v24, %v604_v23  ;;  %vm611_vm2 = vweird.f32 %v3734_v24 }
 0xd67   :  { %vm612_vm4 = vmor %vm610_vm3, %vm611_vm2 }
 0xd68   :  { %v607_v27 = vsub.f32 1.0, %v606_v26 }
 0xd6a   :  { %v608_v28 = vmul.f32 %v3734_v24, %v607_v27  ;;  %v1039_v27 = vld [vmem:[#allocation2 + $0xe] sm:$0x3] }
 0xd6c   :  { %v609_v30 = vadd.f32 %v3734_v24, %v608_v28 }
 0xd6e   :  { %v613_v33 = vsel %vm612_vm4, %v3734_v24, %v609_v30 }
 0xd6f   :  { %v618_v29 = vsel %vm615_vm5, %v617_v34, %v613_v33 }
 0xd70   :  { %v621_v40 = vmul.f32 %v618_v29, %v4227_v52 }
 0xd9e   :  { %v838_v60 = vpop.permute.xlu2 %837 }
 0xd9f   :  { %840 = vst.msk [vmem:[#allocation4 + $0xa] sm:$0x3] %vm181_vm6, %v838_v60  ;;  %3551 = vmatmul.msk.f32.vlgmr.msra.gmra.mxu3 %vm35_vm0, %v838_v60 }
 0xda0   :  { %1453 = vmatpush.msra.mxu3 %v4089_v2 }
 0xdcd   :  { %v624_v35 = vpop.permute.xlu0 %623 }
 0xdce   :  { %v626_v36 = vmul.f32 %v624_v35, %v618_v29 }
 0xdd0   :  { %628 = vrot.lane.b32.xlu2 %v626_v36, %s4046_s27 }
 0xe22   :  { %v927_v38 = vpop.f32.mrf.mxu3 }
 0xe23   :  { %v930_v39 = vadd.f32 %v927_v38, %v907_v37 }
 0xe25   :  { %3735 = vtanh.f32 %v930_v39  ;;  %v3552_v45 = vmul.f32 -1.442695, %v930_v39 }
 0xe2a   :  { %v629_v41 = vpop.permute.xlu2 %628 }
 0xe2b   :  { %v3736_v42 = vpop.eup %3735  ;;  %v4249_v43 = vadd.f32 %v629_v41, %v621_v40 }
 0xe2c   :  { %953 = vrot.lane.b32.xlu1 %v3736_v42, %s4045_s26 }
 0xe2d   :  { %3737 = vtanh.f32 %v4249_v43 }
 0xe2e   :  { %3739 = vpow2.f32 %v3552_v45 }
 0xe33   :  { %v3738_v44 = vpop.eup %3737 }
 0xe34   :  { %634 = vrot.lane.b32.xlu1 %v3738_v44, %s4047_s28  ;;  %v3740_v46 = vpop.eup %3739 }
 0xe35   :  { %v934_v47 = vadd.f32 1.0, %v3740_v46 }
 0xe37   :  { %3741 = vrcp.f32 %v934_v47  ;;  %v946_v53 = vand.u32 2147483648, %v934_v47  ;;  %vm940_vm8 = vweird.f32 %v934_v47  ;;  %v944_v4 = vand.u32 2147483647, %v934_v47 }
 0xe39   :  { %v947_v56 = vor.u32 1.1754944e-38, %v946_v53  ;;  %vm945_vm10 = vcmp.eq.f32.partialorder %v944_v4, 8.507059e+37 }
 0xe3d   :  { %v3742_v48 = vpop.eup %3741 }
 0xe3e   :  { %v936_v49 = vmul.f32 %v3742_v48, %v934_v47  ;;  %vm941_vm7 = vweird.f32 %v3742_v48 }
 0xe3f   :  { %vm942_vm9 = vmor %vm940_vm8, %vm941_vm7 }
 0xe40   :  { %v937_v50 = vsub.f32 1.0, %v936_v49 }
 0xe42   :  { %v938_v51 = vmul.f32 %v3742_v48, %v937_v50 }
 0xe44   :  { %v939_v52 = vadd.f32 %v3742_v48, %v938_v51 }
 0xe46   :  { %v943_v54 = vsel %vm942_vm9, %v3742_v48, %v939_v52 }
 0xe47   :  { %v948_v58 = vsel %vm945_vm10, %v947_v56, %v943_v54 }
 0xe48   :  { %v951_v25 = vmul.f32 %v948_v58, %v4235_v13 }
 0xe9e   :  { %v954_v57 = vpop.permute.xlu1 %953 }
 0xe9f   :  { %v956_v59 = vmul.f32 %v954_v57, %v948_v58 }
 0xea1   :  { %958 = vrot.lane.b32.xlu0 %v956_v59, %s4046_s27  ;;  %v841_v59 = vld [vmem:[#allocation3 + $0xa] sm:$0x3] }
 0xea6   :  { %v635_v61 = vpop.permute.xlu1 %634 }
 0xea7   :  { %v637_v62 = vmul.f32 %v635_v61, %v618_v29 }
 0xea9   :  { %639 = vrot.lane.b32.xlu0 %v637_v62, %s4048_s29 }
 0xf13   :  { %v959_v63 = vpop.permute.xlu0 %958 }
 0xf14   :  { %v4257_v0 = vadd.f32 %v959_v63, %v951_v25 }
 0xf16   :  { %3743 = vtanh.f32 %v4257_v0 }
 0xf1b   :  { %v640_v1 = vpop.permute.xlu0 %639 }
 0xf1c   :  { %v3744_v5 = vpop.eup %3743  ;;  %642 = vst.msk [vmem:[#allocation5 + $0x6] sm:$0x3] %vm181_vm6, %v640_v1  ;;  %3545 = vmatmul.msk.f32.vlgmr.msra.gmra.mxu1 %vm35_vm0, %v640_v1 }
 0xf1d   :  { %964 = vrot.lane.b32.xlu2 %v3744_v5, %s4047_s28  ;;  %1255 = vmatpush.msra.mxu1 %v4089_v2 }
 0xf77   :  { %v965_v6 = vpop.permute.xlu2 %964 }
 0xf78   :  { %v967_v7 = vmul.f32 %v965_v6, %v948_v58 }
 0xf7a   :  { %969 = vrot.lane.b32.xlu1 %v967_v7, %s4048_s29 }
 0xf99   :  { %v729_v9 = vpop.f32.mrf.mxu1 }
 0xf9a   :  { %v732_v10 = vadd.f32 %v729_v9, %v709_v8 }
 0xf9c   :  { %3745 = vtanh.f32 %v732_v10  ;;  %v3546_v12 = vmul.f32 -1.442695, %v732_v10 }
 0xf9e   :  { %3747 = vpow2.f32 %v3546_v12 }
 0xfa2   :  { %v3746_v11 = vpop.eup %3745 }
 0xfa3   :  { %755 = vrot.lane.b32.xlu2 %v3746_v11, %s4045_s26 }
 0xfa4   :  { %v3748_v13 = vpop.eup %3747 }
 0xfa5   :  { %v736_v14 = vadd.f32 1.0, %v3748_v13 }
 0xfa7   :  { %3749 = vrcp.f32 %v736_v14  ;;  %v748_v21 = vand.u32 2147483648, %v736_v14  ;;  %vm742_vm13 = vweird.f32 %v736_v14  ;;  %v746_v60 = vand.u32 2147483647, %v736_v14 }
 0xfa9   :  { %v749_v55 = vor.u32 1.1754944e-38, %v748_v21  ;;  %vm747_vm15 = vcmp.eq.f32.partialorder %v746_v60, 8.507059e+37 }
 0xfad   :  { %v3750_v15 = vpop.eup %3749 }
 0xfae   :  { %v738_v16 = vmul.f32 %v3750_v15, %v736_v14  ;;  %vm743_vm12 = vweird.f32 %v3750_v15 }
 0xfaf   :  { %vm744_vm14 = vmor %vm742_vm13, %vm743_vm12 }
 0xfb0   :  { %v739_v2 = vsub.f32 1.0, %v738_v16 }
 0xfb2   :  { %v740_v19 = vmul.f32 %v3750_v15, %v739_v2  ;;  %v1171_v2 = vld [vmem:[#allocation2 + $0x10] sm:$0x3] }
 0xfb4   :  { %v741_v20 = vadd.f32 %v3750_v15, %v740_v19 }
 0xfb6   :  { %v745_v22 = vsel %vm744_vm14, %v3750_v15, %v741_v20 }
 0xfb7   :  { %v750_v23 = vsel %vm747_vm15, %v749_v55, %v745_v22 }
 0xfb8   :  { %v753_v31 = vmul.f32 %v750_v23, %v4249_v43 }
 0xfec   :  { %v970_v17 = vpop.permute.xlu1 %969 }
 0xfed   :  { %972 = vst.msk [vmem:[#allocation4 + $0xc] sm:$0x3] %vm181_vm6, %v970_v17  ;;  %3555 = vmatmul.msk.f32.vlgmr.msra.gmra.mxu0 %vm35_vm0, %v970_v17 }
 0xfee   :  { %1585 = vmatpush.msra.mxu0 %v4271_v18 }
 0xffd   :  { %v756_v24 = vpop.permute.xlu2 %755 }
 0xffe   :  { %v758_v26 = vmul.f32 %v756_v24, %v750_v23 }
0x1000   :  { %760 = vrot.lane.b32.xlu1 %v758_v26, %s4046_s27 }
0x106a   :  { %v1059_v28 = vpop.f32.mrf.mxu0 }
0x106b   :  { %v1062_v30 = vadd.f32 %v1059_v28, %v1039_v27 }
0x106d   :  { %3751 = vtanh.f32 %v1062_v30  ;;  %v3556_v29 = vmul.f32 -1.442695, %v1062_v30 }
0x1072   :  { %v761_v32 = vpop.permute.xlu1 %760 }
0x1073   :  { %v3752_v33 = vpop.eup %3751  ;;  %v4276_v34 = vadd.f32 %v761_v32, %v753_v31 }
0x1074   :  { %1085 = vrot.lane.b32.xlu0 %v3752_v33, %s4045_s26 }
0x1075   :  { %3753 = vtanh.f32 %v4276_v34 }
0x1076   :  { %3755 = vpow2.f32 %v3556_v29 }
0x107b   :  { %v3754_v35 = vpop.eup %3753 }
0x107c   :  { %766 = vrot.lane.b32.xlu0 %v3754_v35, %s4047_s28  ;;  %v3756_v36 = vpop.eup %3755 }
0x107d   :  { %v1066_v37 = vadd.f32 1.0, %v3756_v36 }
0x107f   :  { %3757 = vrcp.f32 %v1066_v37  ;;  %v1078_v43 = vand.u32 2147483648, %v1066_v37  ;;  %vm1072_vm3 = vweird.f32 %v1066_v37  ;;  %v1076_v44 = vand.u32 2147483647, %v1066_v37 }
0x1081   :  { %v1079_v46 = vor.u32 1.1754944e-38, %v1078_v43  ;;  %vm1077_vm5 = vcmp.eq.f32.partialorder %v1076_v44, 8.507059e+37 }
0x1085   :  { %v3758_v38 = vpop.eup %3757 }
0x1086   :  { %v1068_v39 = vmul.f32 %v3758_v38, %v1066_v37  ;;  %vm1073_vm2 = vweird.f32 %v3758_v38 }
0x1087   :  { %vm1074_vm4 = vmor %vm1072_vm3, %vm1073_vm2 }
0x1088   :  { %v1069_v40 = vsub.f32 1.0, %v1068_v39 }
0x108a   :  { %v1070_v41 = vmul.f32 %v3758_v38, %v1069_v40 }
0x108c   :  { %v1071_v42 = vadd.f32 %v3758_v38, %v1070_v41 }
0x108e   :  { %v1075_v45 = vsel %vm1074_vm4, %v3758_v38, %v1071_v42 }
0x108f   :  { %v1080_v48 = vsel %vm1077_vm5, %v1079_v46, %v1075_v45 }
0x1090   :  { %v1083_v52 = vmul.f32 %v1080_v48, %v4257_v0 }
0x10e6   :  { %v1086_v47 = vpop.permute.xlu0 %1085 }
0x10e7   :  { %v1088_v49 = vmul.f32 %v1086_v47, %v1080_v48 }
0x10e9   :  { %1090 = vrot.lane.b32.xlu2 %v1088_v49, %s4046_s27 }
0x10ee   :  { %v767_v50 = vpop.permute.xlu0 %766 }
0x10ef   :  { %v769_v51 = vmul.f32 %v767_v50, %v750_v23 }
0x10f1   :  { %771 = vrot.lane.b32.xlu2 %v769_v51, %s4048_s29  ;;  %v1237_v51 = vld [vmem:[#allocation2 + $0x12] sm:$0x3] }
0x1143   :  { %v1091_v53 = vpop.permute.xlu2 %1090 }
0x1144   :  { %v4284_v4 = vadd.f32 %v1091_v53, %v1083_v52 }
0x1146   :  { %3759 = vtanh.f32 %v4284_v4 }
0x114b   :  { %v772_v54 = vpop.permute.xlu2 %771 }
0x114c   :  { %v3760_v56 = vpop.eup %3759  ;;  %774 = vst.msk [vmem:[#allocation5 + $0x8] sm:$0x3] %vm181_vm6, %v772_v54  ;;  %3549 = vmatmul.msk.f32.vlgmr.msra.gmra.mxu2 %vm35_vm0, %v772_v54 }
0x114d   :  { %1096 = vrot.lane.b32.xlu1 %v3760_v56, %s4047_s28  ;;  %1387 = vmatpush.msra.mxu2 %v4271_v18 }
0x11bf   :  { %v1097_v57 = vpop.permute.xlu1 %1096 }
0x11c0   :  { %v1099_v58 = vmul.f32 %v1097_v57, %v1080_v48 }
0x11c2   :  { %1101 = vrot.lane.b32.xlu0 %v1099_v58, %s4048_s29 }
0x11cf   :  { %v861_v61 = vpop.f32.mrf.mxu2 }
0x11d0   :  { %v864_v62 = vadd.f32 %v861_v61, %v841_v59 }
0x11d2   :  { %3761 = vtanh.f32 %v864_v62  ;;  %v3550_v63 = vmul.f32 -1.442695, %v864_v62 }
0x11d4   :  { %3763 = vpow2.f32 %v3550_v63 }
0x11d8   :  { %v3762_v25 = vpop.eup %3761 }
0x11d9   :  { %887 = vrot.lane.b32.xlu1 %v3762_v25, %s4045_s26 }
0x11da   :  { %v3764_v0 = vpop.eup %3763 }
0x11db   :  { %v868_v1 = vadd.f32 1.0, %v3764_v0 }
0x11dd   :  { %3765 = vrcp.f32 %v868_v1  ;;  %v880_v11 = vand.u32 2147483648, %v868_v1  ;;  %vm874_vm8 = vweird.f32 %v868_v1  ;;  %v878_v12 = vand.u32 2147483647, %v868_v1 }
0x11df   :  { %v881_v14 = vor.u32 1.1754944e-38, %v880_v11  ;;  %vm879_vm10 = vcmp.eq.f32.partialorder %v878_v12, 8.507059e+37 }
0x11e3   :  { %v3766_v6 = vpop.eup %3765 }
0x11e4   :  { %v870_v7 = vmul.f32 %v3766_v6, %v868_v1  ;;  %vm875_vm7 = vweird.f32 %v3766_v6 }
0x11e5   :  { %vm876_vm9 = vmor %vm874_vm8, %vm875_vm7 }
0x11e6   :  { %v871_v8 = vsub.f32 1.0, %v870_v7 }
0x11e8   :  { %v872_v9 = vmul.f32 %v3766_v6, %v871_v8 }
0x11ea   :  { %v873_v10 = vadd.f32 %v3766_v6, %v872_v9 }
0x11ec   :  { %v877_v13 = vsel %vm876_vm9, %v3766_v6, %v873_v10  ;;  %v973_v6 = vld [vmem:[#allocation3 + $0xc] sm:$0x3] }
0x11ed   :  { %v882_v16 = vsel %vm879_vm10, %v881_v14, %v877_v13 }
0x11ee   :  { %v885_v21 = vmul.f32 %v882_v16, %v4276_v34 }
0x1234   :  { %v1102_v5 = vpop.permute.xlu0 %1101 }
0x1235   :  { %1104 = vst.msk [vmem:[#allocation4 + $0xe] sm:$0x3] %vm181_vm6, %v1102_v5  ;;  %3559 = vmatmul.msk.f32.vlgmr.msrb.gmra.mxu3 %vm35_vm0, %v1102_v5 }
0x124b   :  { %v888_v15 = vpop.permute.xlu1 %887 }
0x124c   :  { %v890_v17 = vmul.f32 %v888_v15, %v882_v16 }
0x124e   :  { %892 = vrot.lane.b32.xlu0 %v890_v17, %s4046_s27 }
0x12b8   :  { %v1191_v19 = vpop.f32.mrf.mxu3 }
0x12b9   :  { %v1194_v20 = vadd.f32 %v1191_v19, %v1171_v2 }
0x12bb   :  { %3767 = vtanh.f32 %v1194_v20  ;;  %v3560_v24 = vmul.f32 -1.442695, %v1194_v20 }
0x12c0   :  { %v893_v60 = vpop.permute.xlu0 %892 }
0x12c1   :  { %v3768_v22 = vpop.eup %3767  ;;  %v4297_v55 = vadd.f32 %v893_v60, %v885_v21 }
0x12c2   :  { %1217 = vrot.lane.b32.xlu2 %v3768_v22, %s4045_s26 }
0x12c3   :  { %3769 = vtanh.f32 %v4297_v55 }
0x12c4   :  { %3771 = vpow2.f32 %v3560_v24 }
0x12c9   :  { %v3770_v23 = vpop.eup %3769 }
0x12ca   :  { %898 = vrot.lane.b32.xlu2 %v3770_v23, %s4047_s28  ;;  %v3772_v26 = vpop.eup %3771 }
0x12cb   :  { %v1198_v27 = vadd.f32 1.0, %v3772_v26 }
0x12cd   :  { %3773 = vrcp.f32 %v1198_v27  ;;  %v1210_v34 = vand.u32 2147483648, %v1198_v27  ;;  %vm1204_vm13 = vweird.f32 %v1198_v27  ;;  %v1208_v35 = vand.u32 2147483647, %v1198_v27 }
0x12cf   :  { %v1211_v36 = vor.u32 1.1754944e-38, %v1210_v34  ;;  %vm1209_vm15 = vcmp.eq.f32.partialorder %v1208_v35, 8.507059e+37  ;;  %v1303_v35 = vld [vmem:[#allocation2 + $0x14] sm:$0x3] }
0x12d3   :  { %v3774_v28 = vpop.eup %3773 }
0x12d4   :  { %v1200_v30 = vmul.f32 %v3774_v28, %v1198_v27  ;;  %vm1205_vm12 = vweird.f32 %v3774_v28 }
0x12d5   :  { %vm1206_vm14 = vmor %vm1204_vm13, %vm1205_vm12 }
0x12d6   :  { %v1201_v31 = vsub.f32 1.0, %v1200_v30 }
0x12d8   :  { %v1202_v32 = vmul.f32 %v3774_v28, %v1201_v31 }
0x12da   :  { %v1203_v33 = vadd.f32 %v3774_v28, %v1202_v32 }
0x12dc   :  { %v1207_v29 = vsel %vm1206_vm14, %v3774_v28, %v1203_v33 }
0x12dd   :  { %v1212_v37 = vsel %vm1209_vm15, %v1211_v36, %v1207_v29 }
0x12de   :  { %v1215_v42 = vmul.f32 %v1212_v37, %v4284_v4 }
0x131c   :  { %v1218_v38 = vpop.permute.xlu2 %1217 }
0x131d   :  { %v1220_v39 = vmul.f32 %v1218_v38, %v1212_v37 }
0x131f   :  { %1222 = vrot.lane.b32.xlu1 %v1220_v39, %s4046_s27 }
0x1324   :  { %v899_v40 = vpop.permute.xlu2 %898 }
0x1325   :  { %v901_v41 = vmul.f32 %v899_v40, %v882_v16 }
0x1327   :  { %903 = vrot.lane.b32.xlu1 %v901_v41, %s4048_s29 }
0x1391   :  { %v1223_v43 = vpop.permute.xlu1 %1222 }
0x1392   :  { %v1225_v44 = vadd.f32 %v1223_v43, %v1215_v42 }
0x1394   :  { %3775 = vtanh.f32 %v1225_v44 }
0x1399   :  { %v904_v45 = vpop.permute.xlu1 %903 }
0x139a   :  { %v3776_v46 = vpop.eup %3775  ;;  %906 = vst.msk [vmem:[#allocation5 + $0xa] sm:$0x3] %vm181_vm6, %v904_v45  ;;  %3553 = vmatmul.msk.f32.vlgmr.msrb.gmra.mxu1 %vm35_vm0, %v904_v45 }
0x139b   :  { %1228 = vrot.lane.b32.xlu0 %v3776_v46, %s4047_s28  ;;  %1519 = vmatpush.msrb.mxu1 %v4271_v18 }
0x140d   :  { %v1229_v47 = vpop.permute.xlu0 %1228 }
0x140e   :  { %v1231_v48 = vmul.f32 %v1229_v47, %v1212_v37 }
0x1410   :  { %1233 = vrot.lane.b32.xlu2 %v1231_v48, %s4048_s29 }
0x1417   :  { %v993_v50 = vpop.f32.mrf.mxu1 }
0x1418   :  { %v996_v7 = vadd.f32 %v993_v50, %v973_v6  ;;  %v1369_v6 = vld [vmem:[#allocation2 + $0x16] sm:$0x3] }
0x141a   :  { %v3554_v16 = vmul.f32 -1.442695, %v996_v7 }
0x146a   :  { %v1234_v49 = vpop.permute.xlu2 %1233 }
0x146b   :  { %1236 = vst.msk [vmem:[#allocation4 + $0x10] sm:$0x3] %vm181_vm6, %v1234_v49  ;;  %3561 = vmatmul.msk.f32.vlgmr.msra.gmra.mxu1 %vm35_vm0, %v1234_v49 }
0x14e8   :  { %v1257_v52 = vpop.f32.mrf.mxu1 }
0x14e9   :  { %v1260_v53 = vadd.f32 %v1257_v52, %v1237_v51 }
0x14eb   :  { %3777 = vtanh.f32 %v1260_v53  ;;  %v3562_v54 = vmul.f32 -1.442695, %v1260_v53 }
0x14ed   :  { %3779 = vpow2.f32 %v3562_v54 }
0x14f1   :  { %v3778_v4 = vpop.eup %3777 }
0x14f2   :  { %1283 = vrot.lane.b32.xlu0 %v3778_v4, %s4045_s26 }
0x14f3   :  { %v3780_v56 = vpop.eup %3779 }
0x14f4   :  { %v1264_v57 = vadd.f32 1.0, %v3780_v56 }
0x14f6   :  { %3781 = vrcp.f32 %v1264_v57  ;;  %v1276_v63 = vand.u32 2147483648, %v1264_v57  ;;  %vm1270_vm3 = vweird.f32 %v1264_v57  ;;  %v1274_v0 = vand.u32 2147483647, %v1264_v57 }
0x14f7   :  { %3783 = vtanh.f32 %v996_v7 }
0x14f8   :  { %v1277_v5 = vor.u32 1.1754944e-38, %v1276_v63  ;;  %vm1275_vm5 = vcmp.eq.f32.partialorder %v1274_v0, 8.507059e+37 }
0x14fc   :  { %v3782_v58 = vpop.eup %3781 }
0x14fd   :  { %v1266_v59 = vmul.f32 %v3782_v58, %v1264_v57  ;;  %vm1271_vm2 = vweird.f32 %v3782_v58  ;;  %v3784_v11 = vpop.eup %3783 }
0x14fe   :  { %vm1272_vm4 = vmor %vm1270_vm3, %vm1271_vm2 }
0x14ff   :  { %v1267_v61 = vsub.f32 1.0, %v1266_v59 }
0x1501   :  { %v1268_v62 = vmul.f32 %v3782_v58, %v1267_v61 }
0x1503   :  { %v1269_v25 = vadd.f32 %v3782_v58, %v1268_v62 }
0x1505   :  { %v1273_v1 = vsel %vm1272_vm4, %v3782_v58, %v1269_v25 }
0x1506   :  { %v1278_v9 = vsel %vm1275_vm5, %v1277_v5, %v1273_v1 }
0x1507   :  { %v1281_v12 = vmul.f32 %v1278_v9, %v1225_v44 }
0x1564   :  { %v1284_v8 = vpop.permute.xlu0 %1283 }
0x1565   :  { %v1286_v10 = vmul.f32 %v1284_v8, %v1278_v9 }
0x1567   :  { %1288 = vrot.lane.b32.xlu1 %v1286_v10, %s4046_s27 }
0x156f   :  { %1019 = vrot.lane.b32.xlu1 %v3784_v11, %s4045_s26 }
0x15d9   :  { %v1289_v13 = vpop.permute.xlu1 %1288 }
0x15da   :  { %v4315_v14 = vadd.f32 %v1289_v13, %v1281_v12 }
0x15dc   :  { %3785 = vtanh.f32 %v4315_v14 }
0x15dd   :  { %3787 = vpow2.f32 %v3554_v16 }
0x15e1   :  { %v1020_v31 = vpop.permute.xlu1 %1019 }
0x15e2   :  { %v3786_v15 = vpop.eup %3785 }
0x15e3   :  { %1294 = vrot.lane.b32.xlu2 %v3786_v15, %s4047_s28  ;;  %v3788_v17 = vpop.eup %3787 }
0x15e4   :  { %v1000_v2 = vadd.f32 1.0, %v3788_v17 }
0x15e6   :  { %3789 = vrcp.f32 %v1000_v2  ;;  %v1012_v26 = vand.u32 2147483648, %v1000_v2  ;;  %vm1006_vm8 = vweird.f32 %v1000_v2  ;;  %v1010_v27 = vand.u32 2147483647, %v1000_v2 }
0x15e8   :  { %v1013_v30 = vor.u32 1.1754944e-38, %v1012_v26  ;;  %vm1011_vm10 = vcmp.eq.f32.partialorder %v1010_v27, 8.507059e+37 }
0x15ec   :  { %v3790_v19 = vpop.eup %3789 }
0x15ed   :  { %v1002_v20 = vmul.f32 %v3790_v19, %v1000_v2  ;;  %vm1007_vm7 = vweird.f32 %v3790_v19 }
0x15ee   :  { %vm1008_vm9 = vmor %vm1006_vm8, %vm1007_vm7 }
0x15ef   :  { %v1003_v21 = vsub.f32 1.0, %v1002_v20 }
0x15f1   :  { %v1004_v60 = vmul.f32 %v3790_v19, %v1003_v21 }
0x15f3   :  { %v1005_v23 = vadd.f32 %v3790_v19, %v1004_v60 }
0x15f5   :  { %v1009_v28 = vsel %vm1008_vm9, %v3790_v19, %v1005_v23 }
0x15f6   :  { %v1014_v32 = vsel %vm1011_vm10, %v1013_v30, %v1009_v28 }
0x15f7   :  { %v1022_v33 = vmul.f32 %v1020_v31, %v1014_v32  ;;  %v1017_v38 = vmul.f32 %v1014_v32, %v4297_v55  ;;  %v3575_v31 = vld [vmem:[%s4717_s3 + $0x20] sm:$0xff] }
0x15f8   :  { %1741 = vmatpush.msrb.mxu3 %v3575_v31 }
0x163d   :  { %v1295_v22 = vpop.permute.xlu2 %1294 }
0x163e   :  { %v1297_v24 = vmul.f32 %v1295_v22, %v1278_v9 }
0x1640   :  { %1299 = vrot.lane.b32.xlu0 %v1297_v24, %s4048_s29 }
0x1648   :  { %1024 = vrot.lane.b32.xlu0 %v1022_v33, %s4046_s27  ;;  %v1707_v33 = vld [vmem:[#allocation4] sm:$0xff] }
0x16b2   :  { %v1300_v34 = vpop.permute.xlu0 %1299 }
0x16b3   :  { %1302 = vst.msk [vmem:[#allocation4 + $0x12] sm:$0x3] %vm181_vm6, %v1300_v34  ;;  %3563 = vmatmul.msk.f32.vlgmr.msrb.gmra.mxu0 %vm35_vm0, %v1300_v34  ;;  %v1708_v34 = vld [vmem:[#allocation4 + $0x8] sm:$0xff] }
0x16ba   :  { %v1025_v37 = vpop.permute.xlu0 %1024 }
0x16bb   :  { %v4324_v39 = vadd.f32 %v1025_v37, %v1017_v38  ;;  %v3655_v38 = vld [vmem:[%s4717_s3 + $0x38] ss:$0 sm:$0xff] }
0x1730   :  { %v1323_v29 = vpop.f32.mrf.mxu0 }
0x1731   :  { %v1326_v36 = vadd.f32 %v1323_v29, %v1303_v35  ;;  %v1435_v29 = vld [vmem:[#allocation2 + $0x18] sm:$0x3] }
0x1733   :  { %3791 = vtanh.f32 %v1326_v36  ;;  %v3564_v42 = vmul.f32 -1.442695, %v1326_v36 }
0x1734   :  { %3793 = vtanh.f32 %v4324_v39 }
0x1735   :  { %3795 = vpow2.f32 %v3564_v42 }
0x1739   :  { %v3792_v40 = vpop.eup %3791 }
0x173a   :  { %1349 = vrot.lane.b32.xlu2 %v3792_v40, %s4045_s26  ;;  %v3794_v41 = vpop.eup %3793 }
0x173b   :  { %v3796_v43 = vpop.eup %3795 }
0x173c   :  { %v1330_v44 = vadd.f32 1.0, %v3796_v43 }
0x173e   :  { %3797 = vrcp.f32 %v1330_v44  ;;  %v1342_v49 = vand.u32 2147483648, %v1330_v44  ;;  %vm1336_vm13 = vweird.f32 %v1330_v44  ;;  %v1340_v50 = vand.u32 2147483647, %v1330_v44 }
0x1740   :  { %v1343_v52 = vor.u32 1.1754944e-38, %v1342_v49  ;;  %vm1341_vm15 = vcmp.eq.f32.partialorder %v1340_v50, 8.507059e+37 }
0x1742   :  { %1030 = vrot.lane.b32.xlu2 %v3794_v41, %s4047_s28 }
0x1744   :  { %v3798_v45 = vpop.eup %3797 }
0x1745   :  { %v1332_v46 = vmul.f32 %v3798_v45, %v1330_v44  ;;  %vm1337_vm12 = vweird.f32 %v3798_v45 }
0x1746   :  { %vm1338_vm14 = vmor %vm1336_vm13, %vm1337_vm12 }
0x1747   :  { %v1333_v47 = vsub.f32 1.0, %v1332_v46 }
0x1749   :  { %v1334_v48 = vmul.f32 %v3798_v45, %v1333_v47 }
0x174b   :  { %v1335_v55 = vadd.f32 %v3798_v45, %v1334_v48 }
0x174d   :  { %v1339_v51 = vsel %vm1338_vm14, %v3798_v45, %v1335_v55 }
0x174e   :  { %v1344_v4 = vsel %vm1341_vm15, %v1343_v52, %v1339_v51 }
0x174f   :  { %v1347_v58 = vmul.f32 %v1344_v4, %v4315_v14 }
0x1794   :  { %v1350_v53 = vpop.permute.xlu2 %1349 }
0x1795   :  { %v1352_v54 = vmul.f32 %v1350_v53, %v1344_v4 }
0x1797   :  { %1354 = vrot.lane.b32.xlu1 %v1352_v54, %s4046_s27 }
0x179c   :  { %v1031_v56 = vpop.permute.xlu2 %1030 }
0x179d   :  { %v1033_v57 = vmul.f32 %v1031_v56, %v1014_v32 }
0x179f   :  { %1035 = vrot.lane.b32.xlu1 %v1033_v57, %s4048_s29 }
0x1809   :  { %v1355_v59 = vpop.permute.xlu1 %1354 }
0x180a   :  { %v1357_v61 = vadd.f32 %v1355_v59, %v1347_v58 }
0x180c   :  { %3799 = vtanh.f32 %v1357_v61 }
0x1811   :  { %v1036_v62 = vpop.permute.xlu1 %1035 }
0x1812   :  { %v3800_v25 = vpop.eup %3799  ;;  %1038 = vst.msk [vmem:[#allocation5 + $0xc] sm:$0x3] %vm181_vm6, %v1036_v62  ;;  %3557 = vmatmul.msk.f32.vlgmr.msrb.gmra.mxu2 %vm35_vm0, %v1036_v62 }
0x1813   :  { %1360 = vrot.lane.b32.xlu0 %v3800_v25, %s4047_s28  ;;  %1651 = vmatpush.msrb.mxu2 %v4271_v18 }
0x1885   :  { %v1361_v63 = vpop.permute.xlu0 %1360 }
0x1886   :  { %v1363_v0 = vmul.f32 %v1361_v63, %v1344_v4 }
0x1888   :  { %1365 = vrot.lane.b32.xlu2 %v1363_v0, %s4048_s29 }
0x1895   :  { %v4339_v5 = vpop.f32.mrf.mxu2 }
0x18e2   :  { %v1366_v1 = vpop.permute.xlu2 %1365 }
0x18e3   :  { %1368 = vst.msk [vmem:[#allocation4 + $0x14] sm:$0x3] %vm181_vm6, %v1366_v1  ;;  %3565 = vmatmul.msk.f32.vlgmr.msra.gmra.mxu2 %vm35_vm0, %v1366_v1 }
0x1966   :  { %v1389_v7 = vpop.f32.mrf.mxu2 }
0x1967   :  { %v1392_v8 = vadd.f32 %v1389_v7, %v1369_v6  ;;  %v3578_v7 = vld [vmem:[%s4717_s3 + $0x60] sm:$0xff] }
0x1968   :  { %1781 = vmatpush.msra.mxu1 %v3578_v7 }
0x1969   :  { %3801 = vtanh.f32 %v1392_v8  ;;  %v3566_v10 = vmul.f32 -1.442695, %v1392_v8 }
0x196b   :  { %3803 = vpow2.f32 %v3566_v10  ;;  %v1501_v10 = vld [vmem:[#allocation2 + $0x1a] sm:$0x3] }
0x196f   :  { %v3802_v9 = vpop.eup %3801 }
0x1970   :  { %1415 = vrot.lane.b32.xlu0 %v3802_v9, %s4045_s26  ;;  %v1711_v9 = vld [vmem:[#allocation5] sm:$0xff] }
0x1971   :  { %v3804_v18 = vpop.eup %3803 }
0x1972   :  { %v1396_v11 = vadd.f32 1.0, %v3804_v18 }
0x1974   :  { %3805 = vrcp.f32 %v1396_v11  ;;  %v1408_v17 = vand.u32 2147483648, %v1396_v11  ;;  %vm1402_vm3 = vweird.f32 %v1396_v11  ;;  %v1406_v2 = vand.u32 2147483647, %v1396_v11 }
0x1976   :  { %v1409_v20 = vor.u32 1.1754944e-38, %v1408_v17  ;;  %vm1407_vm5 = vcmp.eq.f32.partialorder %v1406_v2, 8.507059e+37 }
0x197a   :  { %v3806_v12 = vpop.eup %3805 }
0x197b   :  { %v1398_v13 = vmul.f32 %v3806_v12, %v1396_v11  ;;  %vm1403_vm2 = vweird.f32 %v3806_v12 }
0x197c   :  { %vm1404_vm4 = vmor %vm1402_vm3, %vm1403_vm2 }
0x197d   :  { %v1399_v14 = vsub.f32 1.0, %v1398_v13 }
0x197f   :  { %v1400_v15 = vmul.f32 %v3806_v12, %v1399_v14 }
0x1981   :  { %v1401_v16 = vadd.f32 %v3806_v12, %v1400_v15 }
0x1983   :  { %v1405_v19 = vsel %vm1404_vm4, %v3806_v12, %v1401_v16  ;;  %v4372_v12 = vld [vmem:[%s4717_s3 + $0x78] ss:$0 sm:$0xff] }
0x1984   :  { %v1410_v60 = vsel %vm1407_vm5, %v1409_v20, %v1405_v19 }
0x1985   :  { %v1413_v23 = vmul.f32 %v1410_v60, %v1357_v61 }
0x19e2   :  { %v1416_v21 = vpop.permute.xlu0 %1415 }
0x19e3   :  { %v1418_v22 = vmul.f32 %v1416_v21, %v1410_v60 }
0x19e5   :  { %1420 = vrot.lane.b32.xlu1 %v1418_v22, %s4046_s27 }
0x1a57   :  { %v1421_v24 = vpop.permute.xlu1 %1420 }
0x1a58   :  { %v1423_v26 = vadd.f32 %v1421_v24, %v1413_v23 }
0x1a5a   :  { %3807 = vtanh.f32 %v1423_v26 }
0x1a60   :  { %v3808_v27 = vpop.eup %3807 }
0x1a61   :  { %1426 = vrot.lane.b32.xlu2 %v3808_v27, %s4047_s28 }
0x1abb   :  { %v1427_v28 = vpop.permute.xlu2 %1426 }
0x1abc   :  { %v1429_v30 = vmul.f32 %v1427_v28, %v1410_v60 }
0x1abe   :  { %1431 = vrot.lane.b32.xlu0 %v1429_v30, %s4048_s29 }
0x1b30   :  { %v1432_v32 = vpop.permute.xlu0 %1431 }
0x1b31   :  { %1434 = vst.msk [vmem:[#allocation4 + $0x16] sm:$0x3] %vm181_vm6, %v1432_v32  ;;  %3567 = vmatmul.msk.f32.vlgmr.msra.gmra.mxu3 %vm35_vm0, %v1432_v32 }
0x1b38   :  { %v1709_v35 = vld [vmem:[#allocation4 + $0x10] sm:$0xff] }
0x1b39   :  { %3581 = vmatmul.msk.f32.vlgmr.msrb.gmra.mxu3 %vm35_vm0, %v1707_v33 }
0x1b41   :  { %3582 = vmatmul.msk.f32.gmra.mxu3 %vm35_vm0, %v1708_v34 }
0x1b49   :  { %3583 = vmatmul.msk.f32.gmra.mxu3 %vm35_vm0, %v1709_v35 }
0x1bb4   :  { %v1455_v36 = vpop.f32.mrf.mxu3 }
0x1bb5   :  { %v1458_v37 = vadd.f32 %v1455_v36, %v1435_v29 }
0x1bb7   :  { %3809 = vtanh.f32 %v1458_v37  ;;  %v3568_v47 = vmul.f32 -1.442695, %v1458_v37  ;;  %v4386_v37 = vld [vmem:[%s4717_s3 + $0x30] sm:$0xff] }
0x1bb8   :  { %1807 = vmatpush.msrb.mxu0 %v4386_v37  ;;  %2465 = vmatpush.msra.mxu3 %v4386_v37 }
0x1bb9   :  { %3811 = vpow2.f32 %v3568_v47 }
0x1bba   :  { %2729 = vmatpush.msrb.mxu3 %v4386_v37 }
0x1bbc   :  { %v1743_v40 = vpop.f32.mrf.mxu3 }
0x1bbd   :  { %v3810_v41 = vpop.eup %3809  ;;  %v1744_v42 = vadd.f32 %v3655_v38, %v1743_v40 }
0x1bbe   :  { %1481 = vrot.lane.b32.xlu1 %v3810_v41, %s4045_s26 }
0x1bbf   :  { %1755 = vst.msk [vmem:[#allocation2] sm:$0xff] %vm77_vm1, %v1744_v42  ;;  %v3812_v48 = vpop.eup %3811 }
0x1bc0   :  { %v1462_v55 = vadd.f32 1.0, %v3812_v48 }
0x1bc2   :  { %3813 = vrcp.f32 %v1462_v55  ;;  %v1474_v4 = vand.u32 2147483648, %v1462_v55  ;;  %vm1468_vm8 = vweird.f32 %v1462_v55  ;;  %v1472_v54 = vand.u32 2147483647, %v1462_v55 }
0x1bc4   :  { %v1746_v43 = vpop.f32.mrf.mxu3  ;;  %v1475_v57 = vor.u32 1.1754944e-38, %v1474_v4  ;;  %vm1473_vm10 = vcmp.eq.f32.partialorder %v1472_v54, 8.507059e+37 }
0x1bc5   :  { %v1747_v44 = vadd.f32 %v3655_v38, %v1746_v43 }
0x1bc6   :  { %v1791_v41 = vld [vmem:[#allocation2] sm:$0x3] }
0x1bc7   :  { %1756 = vst.msk [vmem:[#allocation2 + $0x8] sm:$0xff] %vm77_vm1, %v1747_v44 }
0x1bc8   :  { %v3814_v49 = vpop.eup %3813 }
0x1bc9   :  { %v1464_v50 = vmul.f32 %v3814_v49, %v1462_v55  ;;  %vm1469_vm7 = vweird.f32 %v3814_v49 }
0x1bca   :  { %vm1470_vm9 = vmor %vm1468_vm8, %vm1469_vm7 }
0x1bcb   :  { %v1465_v51 = vsub.f32 1.0, %v1464_v50 }
0x1bcc   :  { %v1749_v45 = vpop.f32.mrf.mxu3 }
0x1bcd   :  { %v1750_v46 = vadd.f32 %v3655_v38, %v1749_v45  ;;  %v1466_v52 = vmul.f32 %v3814_v49, %v1465_v51 }
0x1bcf   :  { %1757 = vst.msk [vmem:[#allocation2 + $0x10] sm:$0xff] %vm77_vm1, %v1750_v46  ;;  %v1467_v53 = vadd.f32 %v3814_v49, %v1466_v52 }
0x1bd1   :  { %v1471_v56 = vsel %vm1470_vm9, %v3814_v49, %v1467_v53 }
0x1bd2   :  { %v1476_v59 = vsel %vm1473_vm10, %v1475_v57, %v1471_v56  ;;  %v1567_v56 = vld [vmem:[#allocation2 + $0x1c] sm:$0x3] }
0x1bd3   :  { %v1479_v62 = vmul.f32 %v1476_v59, %v1423_v26 }
0x1c30   :  { %v1482_v58 = vpop.permute.xlu1 %1481 }
0x1c31   :  { %v1484_v61 = vmul.f32 %v1482_v58, %v1476_v59 }
0x1c33   :  { %1486 = vrot.lane.b32.xlu2 %v1484_v61, %s4046_s27 }
0x1c8d   :  { %v1487_v25 = vpop.permute.xlu2 %1486 }
0x1c8e   :  { %v1489_v63 = vadd.f32 %v1487_v25, %v1479_v62 }
0x1c90   :  { %3815 = vtanh.f32 %v1489_v63 }
0x1c96   :  { %v3816_v0 = vpop.eup %3815 }
0x1c97   :  { %1492 = vrot.lane.b32.xlu0 %v3816_v0, %s4047_s28 }
0x1d09   :  { %v1493_v1 = vpop.permute.xlu0 %1492 }
0x1d0a   :  { %v1495_v6 = vmul.f32 %v1493_v1, %v1476_v59 }
0x1d0c   :  { %1497 = vrot.lane.b32.xlu1 %v1495_v6, %s4048_s29 }
0x1d7e   :  { %v1498_v8 = vpop.permute.xlu1 %1497 }
0x1d7f   :  { %1500 = vst.msk [vmem:[#allocation4 + $0x18] sm:$0x3] %vm181_vm6, %v1498_v8  ;;  %3569 = vmatmul.msk.f32.vlgmr.msrb.gmra.mxu1 %vm35_vm0, %v1498_v8 }
0x1d80   :  { %2069 = vmatpush.msrb.mxu1 %v4386_v37 }
0x1d87   :  { %3585 = vmatmul.msk.f32.vlgmr.msra.gmra.mxu1 %vm35_vm0, %v1711_v9 }
0x1dfc   :  { %v1521_v18 = vpop.f32.mrf.mxu1 }
0x1dfd   :  { %v1524_v11 = vadd.f32 %v1521_v18, %v1501_v10 }
0x1dff   :  { %3817 = vtanh.f32 %v1524_v11  ;;  %v3570_v16 = vmul.f32 -1.442695, %v1524_v11 }
0x1e01   :  { %3819 = vpow2.f32 %v3570_v16  ;;  %v1105_v16 = vld [vmem:[#allocation3 + $0xe] sm:$0x3] }
0x1e04   :  { %v1783_v13 = vpop.f32.mrf.mxu1 }
0x1e05   :  { %v3818_v14 = vpop.eup %3817  ;;  %v1784_v15 = vadd.f32 %v4372_v12, %v1783_v13 }
0x1e06   :  { %1547 = vrot.lane.b32.xlu2 %v3818_v14, %s4045_s26 }
0x1e07   :  { %1789 = vst.msk [vmem:[#allocation3] sm:$0xff] %vm77_vm1, %v1784_v15  ;;  %v3820_v17 = vpop.eup %3819 }
0x1e08   :  { %v1528_v2 = vadd.f32 1.0, %v3820_v17 }
0x1e0a   :  { %3821 = vrcp.f32 %v1528_v2  ;;  %v1540_v23 = vand.u32 2147483648, %v1528_v2  ;;  %vm1534_vm13 = vweird.f32 %v1528_v2  ;;  %v1538_v24 = vand.u32 2147483647, %v1528_v2 }
0x1e0c   :  { %v1541_v27 = vor.u32 1.1754944e-38, %v1540_v23  ;;  %vm1539_vm15 = vcmp.eq.f32.partialorder %v1538_v24, 8.507059e+37 }
0x1e10   :  { %v3822_v19 = vpop.eup %3821 }
0x1e11   :  { %v1530_v20 = vmul.f32 %v3822_v19, %v1528_v2  ;;  %vm1535_vm12 = vweird.f32 %v3822_v19  ;;  %v1128_v2 = vadd.f32 %v4339_v5, %v1105_v16 }
0x1e12   :  { %vm1536_vm14 = vmor %vm1534_vm13, %vm1535_vm12 }
0x1e13   :  { %v1531_v21 = vsub.f32 1.0, %v1530_v20  ;;  %v3558_v23 = vmul.f32 -1.442695, %v1128_v2 }
0x1e15   :  { %v1532_v60 = vmul.f32 %v3822_v19, %v1531_v21 }
0x1e17   :  { %v1533_v22 = vadd.f32 %v3822_v19, %v1532_v60 }
0x1e19   :  { %v1537_v26 = vsel %vm1536_vm14, %v3822_v19, %v1533_v22 }
0x1e1a   :  { %v1542_v30 = vsel %vm1539_vm15, %v1541_v27, %v1537_v26 }
0x1e1b   :  { %v1545_v32 = vmul.f32 %v1542_v30, %v1489_v63 }
0x1e60   :  { %v1548_v28 = vpop.permute.xlu2 %1547 }
0x1e61   :  { %v1550_v31 = vmul.f32 %v1548_v28, %v1542_v30 }
0x1e63   :  { %1552 = vrot.lane.b32.xlu0 %v1550_v31, %s4046_s27 }
0x1ed5   :  { %v1553_v33 = vpop.permute.xlu0 %1552 }
0x1ed6   :  { %v4378_v34 = vadd.f32 %v1553_v33, %v1545_v32 }
0x1ed8   :  { %3823 = vtanh.f32 %v4378_v34 }
0x1ede   :  { %v3824_v35 = vpop.eup %3823 }
0x1edf   :  { %1558 = vrot.lane.b32.xlu1 %v3824_v35, %s4047_s28 }
0x1f51   :  { %v1559_v29 = vpop.permute.xlu1 %1558 }
0x1f52   :  { %v1561_v36 = vmul.f32 %v1559_v29, %v1542_v30 }
0x1f54   :  { %1563 = vrot.lane.b32.xlu2 %v1561_v36, %s4048_s29 }
0x1fae   :  { %v1564_v38 = vpop.permute.xlu2 %1563 }
0x1faf   :  { %1566 = vst.msk [vmem:[#allocation4 + $0x1a] sm:$0x3] %vm181_vm6, %v1564_v38  ;;  %3571 = vmatmul.msk.f32.vlgmr.msra.gmra.mxu0 %vm35_vm0, %v1564_v38 }
0x1fb0   :  { %1937 = vmatpush.msra.mxu0 %v4386_v37 }
0x1fb7   :  { %1808 = vmatmul.f32.vlgmr.msrb.gmra.mxu0 %v4044_v3 }
0x202c   :  { %v1587_v40 = vpop.f32.mrf.mxu0 }
0x202d   :  { %v1590_v57 = vadd.f32 %v1587_v40, %v1567_v56 }
0x202f   :  { %v3572_v25 = vmul.f32 -1.442695, %v1590_v57 }
0x2034   :  { %v1809_v42 = vpop.f32.mrf.mxu0 }
0x2035   :  { %v1812_v43 = vadd.f32 %v1809_v42, %v1791_v41 }
0x2037   :  { %3825 = vtanh.f32 %v1812_v43  ;;  %v3587_v45 = vmul.f32 -1.442695, %v1812_v43 }
0x2039   :  { %3827 = vpow2.f32 %v3587_v45 }
0x203d   :  { %v3826_v44 = vpop.eup %3825 }
0x203e   :  { %1835 = vrot.lane.b32.xlu0 %v3826_v44, %s4045_s26 }
0x203f   :  { %v3828_v46 = vpop.eup %3827 }
0x2040   :  { %v1816_v47 = vadd.f32 1.0, %v3828_v46 }
0x2042   :  { %3829 = vrcp.f32 %v1816_v47  ;;  %v1828_v52 = vand.u32 2147483648, %v1816_v47  ;;  %vm1822_vm3 = vweird.f32 %v1816_v47  ;;  %v1826_v53 = vand.u32 2147483647, %v1816_v47 }
0x2043   :  { %3831 = vtanh.f32 %v1590_v57 }
0x2044   :  { %v1829_v54 = vor.u32 1.1754944e-38, %v1828_v52  ;;  %vm1827_vm5 = vcmp.eq.f32.partialorder %v1826_v53, 8.507059e+37  ;;  %3833 = vpow2.f32 %v3572_v25 }
0x2048   :  { %v3830_v48 = vpop.eup %3829 }
0x2049   :  { %v1818_v55 = vmul.f32 %v3830_v48, %v1816_v47  ;;  %vm1823_vm2 = vweird.f32 %v3830_v48  ;;  %v3832_v62 = vpop.eup %3831 }
0x204a   :  { %vm1824_vm4 = vmor %vm1822_vm3, %vm1823_vm2  ;;  %v3834_v63 = vpop.eup %3833 }
0x204b   :  { %v1819_v49 = vsub.f32 1.0, %v1818_v55  ;;  %v1594_v0 = vadd.f32 1.0, %v3834_v63 }
0x204d   :  { %v1820_v50 = vmul.f32 %v3830_v48, %v1819_v49  ;;  %3835 = vrcp.f32 %v1594_v0  ;;  %v1606_v13 = vand.u32 2147483648, %v1594_v0  ;;  %vm1600_vm8 = vweird.f32 %v1594_v0 }
0x204e   :  { %v1604_v14 = vand.u32 2147483647, %v1594_v0 }
0x204f   :  { %v1821_v51 = vadd.f32 %v3830_v48, %v1820_v50  ;;  %v1607_v17 = vor.u32 1.1754944e-38, %v1606_v13 }
0x2050   :  { %vm1605_vm10 = vcmp.eq.f32.partialorder %v1604_v14, 8.507059e+37 }
0x2051   :  { %v1825_v4 = vsel %vm1824_vm4, %v3830_v48, %v1821_v51 }
0x2052   :  { %v1830_v59 = vsel %vm1827_vm5, %v1829_v54, %v1825_v4  ;;  %v1919_v4 = vld [vmem:[#allocation2 + $0x2] sm:$0x3] }
0x2053   :  { %v3836_v1 = vpop.eup %3835  ;;  %v1833_v9 = vmul.f32 0.0, %v1830_v59 }
0x2054   :  { %v1596_v6 = vmul.f32 %v3836_v1, %v1594_v0  ;;  %vm1601_vm7 = vweird.f32 %v3836_v1 }
0x2055   :  { %vm1602_vm9 = vmor %vm1600_vm8, %vm1601_vm7 }
0x2056   :  { %v1597_v7 = vsub.f32 1.0, %v1596_v6 }
0x2058   :  { %v1598_v8 = vmul.f32 %v3836_v1, %v1597_v7 }
0x205a   :  { %v1599_v11 = vadd.f32 %v3836_v1, %v1598_v8 }
0x205c   :  { %v1603_v15 = vsel %vm1602_vm9, %v3836_v1, %v1599_v11 }
0x205d   :  { %v1608_v19 = vsel %vm1605_vm10, %v1607_v17, %v1603_v15  ;;  %v1855_v17 = vld [vmem:[#allocation3] sm:$0x3] }
0x205e   :  { %v1611_v43 = vmul.f32 %v1608_v19, %v4378_v34 }
0x20b0   :  { %v1836_v58 = vpop.permute.xlu0 %1835 }
0x20b1   :  { %v1838_v61 = vmul.f32 %v1836_v58, %v1830_v59 }
0x20b3   :  { %1840 = vrot.lane.b32.xlu1 %v1838_v61, %s4046_s27 }
0x20bb   :  { %1613 = vrot.lane.b32.xlu1 %v3832_v62, %s4045_s26 }
0x2125   :  { %v1841_v10 = vpop.permute.xlu1 %1840 }
0x2126   :  { %v4399_v18 = vadd.f32 %v1841_v10, %v1833_v9 }
0x2128   :  { %3837 = vtanh.f32 %v4399_v18 }
0x2129   :  { %3839 = vtanh.f32 %v1128_v2 }
0x212a   :  { %3841 = vpow2.f32 %v3558_v23 }
0x212d   :  { %v1614_v20 = vpop.permute.xlu1 %1613 }
0x212e   :  { %v3838_v21 = vpop.eup %3837  ;;  %v1616_v60 = vmul.f32 %v1614_v20, %v1608_v19 }
0x212f   :  { %1846 = vrot.lane.b32.xlu2 %v3838_v21, %s4047_s28  ;;  %v3840_v22 = vpop.eup %3839 }
0x2130   :  { %1618 = vrot.lane.b32.xlu1 %v1616_v60, %s4046_s27  ;;  %v3842_v24 = vpop.eup %3841 }
0x2131   :  { %v1132_v26 = vadd.f32 1.0, %v3842_v24 }
0x2133   :  { %3843 = vrcp.f32 %v1132_v26  ;;  %v1144_v35 = vand.u32 2147483648, %v1132_v26  ;;  %vm1138_vm13 = vweird.f32 %v1132_v26  ;;  %v1142_v29 = vand.u32 2147483647, %v1132_v26 }
0x2135   :  { %v1145_v38 = vor.u32 1.1754944e-38, %v1144_v35  ;;  %vm1143_vm15 = vcmp.eq.f32.partialorder %v1142_v29, 8.507059e+37 }
0x2137   :  { %1151 = vrot.lane.b32.xlu2 %v3840_v22, %s4045_s26 }
0x2139   :  { %v3844_v27 = vpop.eup %3843 }
0x213a   :  { %v1134_v5 = vmul.f32 %v3844_v27, %v1132_v26  ;;  %vm1139_vm12 = vweird.f32 %v3844_v27 }
0x213b   :  { %vm1140_vm14 = vmor %vm1138_vm13, %vm1139_vm12 }
0x213c   :  { %v1135_v28 = vsub.f32 1.0, %v1134_v5 }
0x213e   :  { %v1136_v30 = vmul.f32 %v3844_v27, %v1135_v28 }
0x2140   :  { %v1137_v33 = vadd.f32 %v3844_v27, %v1136_v30 }
0x2142   :  { %v1141_v36 = vsel %vm1140_vm14, %v3844_v27, %v1137_v33 }
0x2143   :  { %v1146_v40 = vsel %vm1143_vm15, %v1145_v38, %v1141_v36 }
0x2144   :  { %v1149_v47 = vmul.f32 %v1146_v40, %v4324_v39  ;;  %v4422_v39 = vld [vmem:[%s4717_s3 + $0x70] sm:$0xff] }
0x2145   :  { %1871 = vmatpush.msra.mxu2 %v4422_v39  ;;  %2135 = vmatpush.msrb.mxu0 %v4422_v39 }
0x2146   :  { %2267 = vmatpush.msra.mxu1 %v4422_v39 }
0x2189   :  { %v1847_v31 = vpop.permute.xlu2 %1846 }
0x218a   :  { %v1849_v32 = vmul.f32 %v1847_v31, %v1830_v59 }
0x218c   :  { %1851 = vrot.lane.b32.xlu0 %v1849_v32, %s4048_s29 }
0x2191   :  { %v1152_v41 = vpop.permute.xlu2 %1151 }
0x2192   :  { %v1154_v42 = vmul.f32 %v1152_v41, %v1146_v40 }
0x2194   :  { %1156 = vrot.lane.b32.xlu2 %v1154_v42, %s4046_s27 }
0x21a2   :  { %v1619_v44 = vpop.permute.xlu1 %1618 }
0x21a3   :  { %v4409_v45 = vadd.f32 %v1619_v44, %v1611_v43 }
0x21a5   :  { %3845 = vtanh.f32 %v4409_v45 }
0x21ab   :  { %v3846_v46 = vpop.eup %3845 }
0x21ac   :  { %1624 = vrot.lane.b32.xlu1 %v3846_v46, %s4047_s28  ;;  %v2051_v46 = vld [vmem:[#allocation2 + $0x4] sm:$0x3] }
0x21ee   :  { %v1157_v48 = vpop.permute.xlu2 %1156 }
0x21ef   :  { %v1159_v55 = vadd.f32 %v1157_v48, %v1149_v47 }
0x21f1   :  { %3847 = vtanh.f32 %v1159_v55 }
0x21f7   :  { %v3848_v49 = vpop.eup %3847 }
0x21f8   :  { %1162 = vrot.lane.b32.xlu2 %v3848_v49, %s4047_s28 }
0x21fe   :  { %v1852_v50 = vpop.permute.xlu0 %1851 }
0x21ff   :  { %1854 = vst.msk [vmem:[#allocation4] sm:$0x3] %vm181_vm6, %v1852_v50  ;;  %3589 = vmatmul.msk.f32.vlgmr.msra.gmra.mxu0 %vm35_vm0, %v1852_v50 }
0x2200   :  { %2333 = vmatpush.msra.mxu0 %v4386_v37 }
0x221e   :  { %v1625_v34 = vpop.permute.xlu1 %1624 }
0x221f   :  { %v1627_v51 = vmul.f32 %v1625_v34, %v1608_v19 }
0x2221   :  { %1629 = vrot.lane.b32.xlu1 %v1627_v51, %s4048_s29 }
0x2252   :  { %v1163_v52 = vpop.permute.xlu2 %1162 }
0x2253   :  { %v1165_v53 = vmul.f32 %v1163_v52, %v1146_v40 }
0x2255   :  { %1167 = vrot.lane.b32.xlu2 %v1165_v53, %s4048_s29 }
0x227c   :  { %v1939_v54 = vpop.f32.mrf.mxu0 }
0x227d   :  { %v1942_v56 = vadd.f32 %v1939_v54, %v1919_v4 }
0x227f   :  { %3849 = vtanh.f32 %v1942_v56  ;;  %v3590_v62 = vmul.f32 -1.442695, %v1942_v56 }
0x2281   :  { %3851 = vpow2.f32 %v3590_v62 }
0x2285   :  { %v3850_v57 = vpop.eup %3849 }
0x2286   :  { %1965 = vrot.lane.b32.xlu0 %v3850_v57, %s4045_s26 }
0x2287   :  { %v3852_v25 = vpop.eup %3851 }
0x2288   :  { %v1946_v63 = vadd.f32 1.0, %v3852_v25 }
0x228a   :  { %3853 = vrcp.f32 %v1946_v63  ;;  %vm1952_vm3 = vweird.f32 %v1946_v63  ;;  %v1956_v9 = vand.u32 2147483647, %v1946_v63 }
0x228c   :  { %vm1957_vm5 = vcmp.eq.f32.partialorder %v1956_v9, 8.507059e+37 }
0x2290   :  { %v3854_v0 = vpop.eup %3853 }
0x2291   :  { %v1948_v1 = vmul.f32 %v3854_v0, %v1946_v63  ;;  %vm1953_vm2 = vweird.f32 %v3854_v0 }
0x2292   :  { %vm1954_vm4 = vmor %vm1952_vm3, %vm1953_vm2 }
0x2293   :  { %v1630_v58 = vpop.permute.xlu1 %1629  ;;  %v1949_v6 = vsub.f32 1.0, %v1948_v1 }
0x2294   :  { %1632 = vst.msk [vmem:[#allocation4 + $0x1c] sm:$0x3] %vm181_vm6, %v1630_v58  ;;  %3573 = vmatmul.msk.f32.vlgmr.msrb.gmra.mxu2 %vm35_vm0, %v1630_v58 }
0x2295   :  { %2003 = vmatpush.msrb.mxu2 %v4422_v39  ;;  %v1950_v7 = vmul.f32 %v3854_v0, %v1949_v6 }
0x2297   :  { %v1951_v8 = vadd.f32 %v3854_v0, %v1950_v7 }
0x2299   :  { %v1955_v10 = vsel %vm1954_vm4, %v3854_v0, %v1951_v8 }
0x229c   :  { %1872 = vmatmul.f32.vlgmr.msra.gmra.mxu2 %v4044_v3  ;;  %v1958_v3 = vand.u32 2147483648, %v1946_v63 }
0x229d   :  { %2201 = vmatpush.msra.mxu2 %v4386_v37 }
0x229e   :  { %v1959_v11 = vor.u32 1.1754944e-38, %v1958_v3 }
0x22a0   :  { %v1960_v14 = vsel %vm1957_vm5, %v1959_v11, %v1955_v10 }
0x22a1   :  { %v1963_v22 = vmul.f32 %v1960_v14, %v4399_v18 }
0x22af   :  { %v1168_v59 = vpop.permute.xlu2 %1167 }
0x22b0   :  { %1170 = vst.msk [vmem:[#allocation5 + $0xe] sm:$0x3] %vm181_vm6, %v1168_v59 }
0x22b7   :  { %v1712_v61 = vld [vmem:[#allocation5 + $0x8] sm:$0xff] }
0x22b8   :  { %3586 = vmatmul.msk.f32.gmra.mxu1 %vm35_vm0, %v1712_v61 }
0x22f8   :  { %v1966_v13 = vpop.permute.xlu0 %1965 }
0x22f9   :  { %v1968_v15 = vmul.f32 %v1966_v13, %v1960_v14 }
0x22fb   :  { %1970 = vrot.lane.b32.xlu0 %v1968_v15, %s4046_s27 }
0x2317   :  { %v4437_v16 = vpop.f32.mrf.mxu2 }
0x231f   :  { %v1873_v2 = vpop.f32.mrf.mxu2 }
0x2320   :  { %v1876_v19 = vadd.f32 %v1873_v2, %v1855_v17  ;;  %v1985_v17 = vld [vmem:[#allocation3 + $0x2] sm:$0x3] }
0x2322   :  { %3855 = vtanh.f32 %v1876_v19  ;;  %v3588_v27 = vmul.f32 -1.442695, %v1876_v19 }
0x2328   :  { %v3856_v20 = vpop.eup %3855 }
0x2329   :  { %1899 = vrot.lane.b32.xlu1 %v3856_v20, %s4045_s26 }
0x2335   :  { %v1786_v21 = vpop.f32.mrf.mxu1 }
0x2336   :  { %v1787_v60 = vadd.f32 %v4372_v12, %v1786_v21 }
0x2338   :  { %1790 = vst.msk [vmem:[#allocation3 + $0x8] sm:$0xff] %vm77_vm1, %v1787_v60 }
0x236d   :  { %v1971_v23 = vpop.permute.xlu0 %1970 }
0x236e   :  { %v4443_v24 = vadd.f32 %v1971_v23, %v1963_v22 }
0x2370   :  { %3857 = vtanh.f32 %v4443_v24 }
0x2371   :  { %3859 = vpow2.f32 %v3588_v27 }
0x2376   :  { %v3858_v26 = vpop.eup %3857 }
0x2377   :  { %1976 = vrot.lane.b32.xlu0 %v3858_v26, %s4047_s28  ;;  %v3860_v5 = vpop.eup %3859 }
0x2378   :  { %v1880_v28 = vadd.f32 1.0, %v3860_v5 }
0x237a   :  { %3861 = vrcp.f32 %v1880_v28  ;;  %v1892_v29 = vand.u32 2147483648, %v1880_v28  ;;  %vm1886_vm8 = vweird.f32 %v1880_v28  ;;  %v1890_v36 = vand.u32 2147483647, %v1880_v28 }
0x237c   :  { %v1893_v41 = vor.u32 1.1754944e-38, %v1892_v29  ;;  %vm1891_vm10 = vcmp.eq.f32.partialorder %v1890_v36, 8.507059e+37  ;;  %v2183_v29 = vld [vmem:[#allocation2 + $0x6] sm:$0x3] }
0x2380   :  { %v3862_v30 = vpop.eup %3861 }
0x2381   :  { %v1882_v31 = vmul.f32 %v3862_v30, %v1880_v28  ;;  %vm1887_vm7 = vweird.f32 %v3862_v30 }
0x2382   :  { %vm1888_vm9 = vmor %vm1886_vm8, %vm1887_vm7 }
0x2383   :  { %v1883_v12 = vsub.f32 1.0, %v1882_v31 }
0x2385   :  { %v1884_v32 = vmul.f32 %v3862_v30, %v1883_v12 }
0x2387   :  { %v1885_v35 = vadd.f32 %v3862_v30, %v1884_v32 }
0x2389   :  { %v1889_v38 = vsel %vm1888_vm9, %v3862_v30, %v1885_v35 }
0x238a   :  { %v1894_v42 = vsel %vm1891_vm10, %v1893_v41, %v1889_v38 }
0x238b   :  { %v1897_v49 = vmul.f32 0.0, %v1894_v42 }
0x239b   :  { %v1900_v40 = vpop.permute.xlu1 %1899 }
0x239c   :  { %v1902_v43 = vmul.f32 %v1900_v40, %v1894_v42 }
0x23e9   :  { %v1977_v33 = vpop.permute.xlu0 %1976 }
0x23ea   :  { %v1979_v18 = vmul.f32 %v1977_v33, %v1960_v14 }
0x23ec   :  { %1981 = vrot.lane.b32.xlu0 %v1979_v18, %s4048_s29 }
0x23f4   :  { %1904 = vrot.lane.b32.xlu0 %v1902_v43, %s4046_s27 }
0x245e   :  { %v1982_v44 = vpop.permute.xlu0 %1981 }
0x245f   :  { %1984 = vst.msk [vmem:[#allocation4 + $0x2] sm:$0x3] %vm181_vm6, %v1982_v44  ;;  %3593 = vmatmul.msk.f32.vlgmr.msrb.gmra.mxu1 %vm35_vm0, %v1982_v44 }
0x2460   :  { %2531 = vmatpush.msrb.mxu1 %v4422_v39 }
0x2466   :  { %v1905_v55 = vpop.permute.xlu0 %1904 }
0x2467   :  { %v4452_v50 = vadd.f32 %v1905_v55, %v1897_v49 }
0x24dc   :  { %v2071_v47 = vpop.f32.mrf.mxu1 }
0x24dd   :  { %v2074_v48 = vadd.f32 %v2071_v47, %v2051_v46 }
0x24df   :  { %3863 = vtanh.f32 %v2074_v48  ;;  %v3594_v52 = vmul.f32 -1.442695, %v2074_v48 }
0x24e0   :  { %3865 = vtanh.f32 %v4452_v50 }
0x24e1   :  { %3867 = vpow2.f32 %v3594_v52 }
0x24e5   :  { %v3864_v34 = vpop.eup %3863 }
0x24e6   :  { %2097 = vrot.lane.b32.xlu2 %v3864_v34, %s4045_s26  ;;  %v3866_v51 = vpop.eup %3865 }
0x24e7   :  { %v3868_v53 = vpop.eup %3867 }
0x24e8   :  { %v2078_v4 = vadd.f32 1.0, %v3868_v53 }
0x24ea   :  { %3869 = vrcp.f32 %v2078_v4  ;;  %v2090_v61 = vand.u32 2147483648, %v2078_v4  ;;  %vm2084_vm13 = vweird.f32 %v2078_v4  ;;  %v2088_v62 = vand.u32 2147483647, %v2078_v4 }
0x24ec   :  { %v2091_v63 = vor.u32 1.1754944e-38, %v2090_v61  ;;  %vm2089_vm15 = vcmp.eq.f32.partialorder %v2088_v62, 8.507059e+37 }
0x24ee   :  { %1910 = vrot.lane.b32.xlu2 %v3866_v51, %s4047_s28 }
0x24f0   :  { %v3870_v54 = vpop.eup %3869 }
0x24f1   :  { %v2080_v56 = vmul.f32 %v3870_v54, %v2078_v4  ;;  %vm2085_vm12 = vweird.f32 %v3870_v54 }
0x24f2   :  { %vm2086_vm14 = vmor %vm2084_vm13, %vm2085_vm12 }
0x24f3   :  { %v2081_v57 = vsub.f32 1.0, %v2080_v56 }
0x24f5   :  { %v2082_v58 = vmul.f32 %v3870_v54, %v2081_v57 }
0x24f7   :  { %v2083_v59 = vadd.f32 %v3870_v54, %v2082_v58 }
0x24f9   :  { %v2087_v25 = vsel %vm2086_vm14, %v3870_v54, %v2083_v59 }
0x24fa   :  { %v2092_v1 = vsel %vm2089_vm15, %v2091_v63, %v2087_v25 }
0x24fb   :  { %v2095_v3 = vmul.f32 %v2092_v1, %v4443_v24 }
0x2540   :  { %v2098_v0 = vpop.permute.xlu2 %2097 }
0x2541   :  { %v2100_v6 = vmul.f32 %v2098_v0, %v2092_v1  ;;  %v1633_v0 = vld [vmem:[#allocation2 + $0x1e] sm:$0x3] }
0x2543   :  { %2102 = vrot.lane.b32.xlu1 %v2100_v6, %s4046_s27 }
0x2548   :  { %v1911_v7 = vpop.permute.xlu2 %1910 }
0x2549   :  { %v1913_v8 = vmul.f32 %v1911_v7, %v1894_v42 }
0x254b   :  { %1915 = vrot.lane.b32.xlu1 %v1913_v8, %s4048_s29 }
0x25b5   :  { %v2103_v9 = vpop.permute.xlu1 %2102 }
0x25b6   :  { %v4460_v10 = vadd.f32 %v2103_v9, %v2095_v3 }
0x25b8   :  { %3871 = vtanh.f32 %v4460_v10 }
0x25bd   :  { %v1916_v11 = vpop.permute.xlu1 %1915 }
0x25be   :  { %v3872_v13 = vpop.eup %3871  ;;  %1918 = vst.msk [vmem:[#allocation5] sm:$0x3] %vm181_vm6, %v1916_v11  ;;  %3591 = vmatmul.msk.f32.vlgmr.msrb.gmra.mxu2 %vm35_vm0, %v1916_v11 }
0x25bf   :  { %2108 = vrot.lane.b32.xlu0 %v3872_v13, %s4047_s28  ;;  %2399 = vmatpush.msrb.mxu2 %v4422_v39 }
0x2631   :  { %v2109_v14 = vpop.permute.xlu0 %2108 }
0x2632   :  { %v2111_v15 = vmul.f32 %v2109_v14, %v2092_v1  ;;  %v1656_v1 = vadd.f32 %v4437_v16, %v1633_v0 }
0x2634   :  { %2113 = vrot.lane.b32.xlu2 %v2111_v15, %s4048_s29  ;;  %v3574_v3 = vmul.f32 -1.442695, %v1656_v1 }
0x2641   :  { %v2005_v2 = vpop.f32.mrf.mxu2 }
0x2642   :  { %v2008_v19 = vadd.f32 %v2005_v2, %v1985_v17 }
0x2644   :  { %3873 = vtanh.f32 %v2008_v19  ;;  %v3592_v60 = vmul.f32 -1.442695, %v2008_v19 }
0x2646   :  { %3875 = vpow2.f32 %v3592_v60 }
0x264a   :  { %v3874_v20 = vpop.eup %3873 }
0x264b   :  { %2031 = vrot.lane.b32.xlu0 %v3874_v20, %s4045_s26 }
0x264c   :  { %v3876_v22 = vpop.eup %3875 }
0x264d   :  { %v2012_v23 = vadd.f32 1.0, %v3876_v22 }
0x264f   :  { %3877 = vrcp.f32 %v2012_v23  ;;  %v2024_v30 = vand.u32 2147483648, %v2012_v23  ;;  %vm2018_vm3 = vweird.f32 %v2012_v23  ;;  %v2022_v31 = vand.u32 2147483647, %v2012_v23 }
0x2651   :  { %v2025_v32 = vor.u32 1.1754944e-38, %v2024_v30  ;;  %vm2023_vm5 = vcmp.eq.f32.partialorder %v2022_v31, 8.507059e+37 }
0x2655   :  { %v3878_v24 = vpop.eup %3877 }
0x2656   :  { %v2014_v26 = vmul.f32 %v3878_v24, %v2012_v23  ;;  %vm2019_vm2 = vweird.f32 %v3878_v24 }
0x2657   :  { %vm2020_vm4 = vmor %vm2018_vm3, %vm2019_vm2 }
0x2658   :  { %v2015_v27 = vsub.f32 1.0, %v2014_v26 }
0x265a   :  { %v2016_v5 = vmul.f32 %v3878_v24, %v2015_v27 }
0x265c   :  { %v2017_v28 = vadd.f32 %v3878_v24, %v2016_v5  ;;  %v2315_v5 = vld [vmem:[#allocation2 + $0x8] sm:$0x3] }
0x265e   :  { %v2021_v12 = vsel %vm2020_vm4, %v3878_v24, %v2017_v28 }
0x265f   :  { %v2026_v33 = vsel %vm2023_vm5, %v2025_v32, %v2021_v12 }
0x2660   :  { %v2029_v40 = vmul.f32 %v2026_v33, %v4452_v50 }
0x268e   :  { %v2114_v21 = vpop.permute.xlu2 %2113 }
0x268f   :  { %2116 = vst.msk [vmem:[#allocation4 + $0x4] sm:$0x3] %vm181_vm6, %v2114_v21  ;;  %3597 = vmatmul.msk.f32.vlgmr.msra.gmra.mxu2 %vm35_vm0, %v2114_v21 }
0x2690   :  { %2663 = vmatpush.msra.mxu2 %v4422_v39 }
0x26bd   :  { %v2032_v35 = vpop.permute.xlu0 %2031 }
0x26be   :  { %v2034_v18 = vmul.f32 %v2032_v35, %v2026_v33 }
0x26c0   :  { %2036 = vrot.lane.b32.xlu2 %v2034_v18, %s4046_s27 }
0x2712   :  { %v2203_v36 = vpop.f32.mrf.mxu2 }
0x2713   :  { %v2206_v38 = vadd.f32 %v2203_v36, %v2183_v29 }
0x2715   :  { %3879 = vtanh.f32 %v2206_v38  ;;  %v3598_v46 = vmul.f32 -1.442695, %v2206_v38 }
0x271a   :  { %v2037_v41 = vpop.permute.xlu2 %2036 }
0x271b   :  { %v3880_v42 = vpop.eup %3879  ;;  %v4474_v43 = vadd.f32 %v2037_v41, %v2029_v40 }
0x271c   :  { %2229 = vrot.lane.b32.xlu1 %v3880_v42, %s4045_s26 }
0x271d   :  { %3881 = vtanh.f32 %v4474_v43 }
0x271e   :  { %3883 = vpow2.f32 %v3598_v46 }
0x2723   :  { %v3882_v44 = vpop.eup %3881 }
0x2724   :  { %2042 = vrot.lane.b32.xlu1 %v3882_v44, %s4047_s28  ;;  %v3884_v47 = vpop.eup %3883 }
0x2725   :  { %v2210_v48 = vadd.f32 1.0, %v3884_v47 }
0x2727   :  { %3885 = vrcp.f32 %v2210_v48  ;;  %v2222_v52 = vand.u32 2147483648, %v2210_v48  ;;  %vm2216_vm8 = vweird.f32 %v2210_v48  ;;  %v2220_v53 = vand.u32 2147483647, %v2210_v48 }
0x2729   :  { %v2223_v54 = vor.u32 1.1754944e-38, %v2222_v52  ;;  %vm2221_vm10 = vcmp.eq.f32.partialorder %v2220_v53, 8.507059e+37 }
0x272d   :  { %v3886_v55 = vpop.eup %3885 }
0x272e   :  { %v2212_v49 = vmul.f32 %v3886_v55, %v2210_v48  ;;  %vm2217_vm7 = vweird.f32 %v3886_v55 }
0x272f   :  { %vm2218_vm9 = vmor %vm2216_vm8, %vm2217_vm7 }
0x2730   :  { %v2213_v34 = vsub.f32 1.0, %v2212_v49 }
0x2732   :  { %v2214_v50 = vmul.f32 %v3886_v55, %v2213_v34 }
0x2734   :  { %v2215_v51 = vadd.f32 %v3886_v55, %v2214_v50 }
0x2736   :  { %v2219_v4 = vsel %vm2218_vm9, %v3886_v55, %v2215_v51 }
0x2737   :  { %v2224_v57 = vsel %vm2221_vm10, %v2223_v54, %v2219_v4  ;;  %v2117_v54 = vld [vmem:[#allocation3 + $0x4] sm:$0x3] }
0x2738   :  { %v2227_v62 = vmul.f32 %v2224_v57, %v4460_v10 }
0x278e   :  { %v2230_v56 = vpop.permute.xlu1 %2229 }
0x278f   :  { %v2232_v58 = vmul.f32 %v2230_v56, %v2224_v57 }
0x2791   :  { %2234 = vrot.lane.b32.xlu0 %v2232_v58, %s4046_s27 }
0x2796   :  { %v2043_v59 = vpop.permute.xlu1 %2042 }
0x2797   :  { %v2045_v61 = vmul.f32 %v2043_v59, %v2026_v33 }
0x2799   :  { %2047 = vrot.lane.b32.xlu0 %v2045_v61, %s4048_s29 }
0x2803   :  { %v2235_v25 = vpop.permute.xlu0 %2234 }
0x2804   :  { %v4482_v63 = vadd.f32 %v2235_v25, %v2227_v62 }
0x2806   :  { %3887 = vtanh.f32 %v4482_v63 }
0x2807   :  { %3889 = vtanh.f32 %v1656_v1 }
0x2808   :  { %3891 = vpow2.f32 %v3574_v3 }
0x280b   :  { %v2048_v6 = vpop.permute.xlu0 %2047 }
0x280c   :  { %v3888_v7 = vpop.eup %3887  ;;  %2050 = vst.msk [vmem:[#allocation5 + $0x2] sm:$0x3] %vm181_vm6, %v2048_v6  ;;  %3595 = vmatmul.msk.f32.vlgmr.msrb.gmra.mxu0 %vm35_vm0, %v2048_v6 }
0x280d   :  { %2240 = vrot.lane.b32.xlu2 %v3888_v7, %s4047_s28  ;;  %2597 = vmatpush.msrb.mxu0 %v4386_v37  ;;  %v3890_v8 = vpop.eup %3889 }
0x280e   :  { %v3892_v9 = vpop.eup %3891 }
0x280f   :  { %v1660_v10 = vadd.f32 1.0, %v3892_v9 }
0x2811   :  { %3893 = vrcp.f32 %v1660_v10  ;;  %v1672_v19 = vand.u32 2147483648, %v1660_v10  ;;  %vm1666_vm13 = vweird.f32 %v1660_v10  ;;  %v1670_v20 = vand.u32 2147483647, %v1660_v10 }
0x2813   :  { %v1673_v60 = vor.u32 1.1754944e-38, %v1672_v19  ;;  %vm1671_vm15 = vcmp.eq.f32.partialorder %v1670_v20, 8.507059e+37  ;;  %v4042_v19 = vld [vmem:[%s4717_s3 + $0x38] ss:$0 sm:$0xff] }
0x2815   :  { %1679 = vrot.lane.b32.xlu2 %v3890_v8, %s4045_s26 }
0x2817   :  { %v3894_v16 = vpop.eup %3893 }
0x2818   :  { %v1662_v11 = vmul.f32 %v3894_v16, %v1660_v10  ;;  %vm1667_vm12 = vweird.f32 %v3894_v16 }
0x2819   :  { %vm1668_vm14 = vmor %vm1666_vm13, %vm1667_vm12 }
0x281a   :  { %v1663_v13 = vsub.f32 1.0, %v1662_v11 }
0x281c   :  { %v1664_v14 = vmul.f32 %v3894_v16, %v1663_v13 }
0x281e   :  { %v1665_v2 = vadd.f32 %v3894_v16, %v1664_v14 }
0x2820   :  { %v1669_v21 = vsel %vm1668_vm14, %v3894_v16, %v1665_v2 }
0x2821   :  { %v1674_v22 = vsel %vm1671_vm15, %v1673_v60, %v1669_v21  ;;  %v2447_v60 = vld [vmem:[#allocation2 + $0xa] sm:$0x3] }
0x2822   :  { %v1677_v12 = vmul.f32 %v1674_v22, %v4409_v45 }
0x2867   :  { %v2241_v15 = vpop.permute.xlu2 %2240 }
0x2868   :  { %v2243_v17 = vmul.f32 %v2241_v15, %v2224_v57 }
0x286a   :  { %2245 = vrot.lane.b32.xlu1 %v2243_v17, %s4048_s29 }
0x286f   :  { %v1680_v23 = vpop.permute.xlu2 %1679 }
0x2870   :  { %v1682_v24 = vmul.f32 %v1680_v23, %v1674_v22 }
0x2872   :  { %1684 = vrot.lane.b32.xlu1 %v1682_v24, %s4046_s27 }
0x2889   :  { %v2137_v27 = vpop.f32.mrf.mxu0 }
0x288a   :  { %v2140_v56 = vadd.f32 %v2137_v27, %v2117_v54 }
0x288c   :  { %v3596_v62 = vmul.f32 -1.442695, %v2140_v56 }
0x28dc   :  { %v2246_v26 = vpop.permute.xlu1 %2245 }
0x28dd   :  { %2248 = vst.msk [vmem:[#allocation4 + $0x6] sm:$0x3] %vm181_vm6, %v2246_v26  ;;  %3601 = vmatmul.msk.f32.vlgmr.msra.gmra.mxu0 %vm35_vm0, %v2246_v26 }
0x28de   :  { %2861 = vmatpush.msra.mxu0 %v4386_v37 }
0x28e4   :  { %v1685_v31 = vpop.permute.xlu1 %1684 }
0x28e5   :  { %v1687_v32 = vadd.f32 %v1685_v31, %v1677_v12 }
0x295a   :  { %v2335_v28 = vpop.f32.mrf.mxu0 }
0x295b   :  { %v2338_v30 = vadd.f32 %v2335_v28, %v2315_v5 }
0x295d   :  { %3895 = vtanh.f32 %v2338_v30  ;;  %v3602_v18 = vmul.f32 -1.442695, %v2338_v30 }
0x295e   :  { %3897 = vtanh.f32 %v1687_v32 }
0x295f   :  { %3899 = vpow2.f32 %v3602_v18 }
0x2963   :  { %v3896_v33 = vpop.eup %3895 }
0x2964   :  { %2361 = vrot.lane.b32.xlu0 %v3896_v33, %s4045_s26  ;;  %v3898_v35 = vpop.eup %3897 }
0x2965   :  { %v3900_v29 = vpop.eup %3899 }
0x2966   :  { %v2342_v36 = vadd.f32 1.0, %v3900_v29 }
0x2968   :  { %3901 = vrcp.f32 %v2342_v36  ;;  %v2354_v45 = vand.u32 2147483648, %v2342_v36  ;;  %vm2348_vm3 = vweird.f32 %v2342_v36  ;;  %v2352_v46 = vand.u32 2147483647, %v2342_v36 }
0x296a   :  { %v2355_v48 = vor.u32 1.1754944e-38, %v2354_v45  ;;  %vm2353_vm5 = vcmp.eq.f32.partialorder %v2352_v46, 8.507059e+37 }
0x296c   :  { %1690 = vrot.lane.b32.xlu0 %v3898_v35, %s4047_s28 }
0x296e   :  { %v3902_v38 = vpop.eup %3901 }
0x296f   :  { %v2344_v40 = vmul.f32 %v3902_v38, %v2342_v36  ;;  %vm2349_vm2 = vweird.f32 %v3902_v38 }
0x2970   :  { %vm2350_vm4 = vmor %vm2348_vm3, %vm2349_vm2 }
0x2971   :  { %v2345_v41 = vsub.f32 1.0, %v2344_v40 }
0x2973   :  { %v2346_v42 = vmul.f32 %v3902_v38, %v2345_v41 }
0x2975   :  { %v2347_v44 = vadd.f32 %v3902_v38, %v2346_v42 }
0x2977   :  { %v2351_v47 = vsel %vm2350_vm4, %v3902_v38, %v2347_v44 }
0x2978   :  { %v2356_v49 = vsel %vm2353_vm5, %v2355_v48, %v2351_v47 }
0x2979   :  { %v2359_v52 = vmul.f32 %v2356_v49, %v4482_v63 }
0x29d6   :  { %v2362_v55 = vpop.permute.xlu0 %2361 }
0x29d7   :  { %v2364_v34 = vmul.f32 %v2362_v55, %v2356_v49 }
0x29d9   :  { %2366 = vrot.lane.b32.xlu2 %v2364_v34, %s4046_s27 }
0x29de   :  { %v1691_v50 = vpop.permute.xlu0 %1690 }
0x29df   :  { %v1693_v51 = vmul.f32 %v1691_v50, %v1674_v22 }
0x29e1   :  { %1695 = vrot.lane.b32.xlu2 %v1693_v51, %s4048_s29  ;;  %v2249_v51 = vld [vmem:[#allocation3 + $0x6] sm:$0x3] }
0x2a33   :  { %v2367_v53 = vpop.permute.xlu2 %2366 }
0x2a34   :  { %v4502_v4 = vadd.f32 %v2367_v53, %v2359_v52 }
0x2a36   :  { %3903 = vtanh.f32 %v4502_v4 }
0x2a37   :  { %3905 = vtanh.f32 %v2140_v56 }
0x2a38   :  { %3907 = vpow2.f32 %v3596_v62 }
0x2a3b   :  { %v1696_v57 = vpop.permute.xlu2 %1695 }
0x2a3c   :  { %v3904_v58 = vpop.eup %3903  ;;  %1698 = vst.msk [vmem:[#allocation4 + $0x1e] sm:$0x3] %vm181_vm6, %v1696_v57 }
0x2a3d   :  { %2372 = vrot.lane.b32.xlu1 %v3904_v58, %s4047_s28  ;;  %v3906_v61 = vpop.eup %3905 }
0x2a3e   :  { %v3908_v25 = vpop.eup %3907 }
0x2a3f   :  { %v2144_v63 = vadd.f32 1.0, %v3908_v25 }
0x2a41   :  { %3909 = vrcp.f32 %v2144_v63  ;;  %v2156_v10 = vand.u32 2147483648, %v2144_v63  ;;  %vm2150_vm8 = vweird.f32 %v2144_v63  ;;  %v2154_v16 = vand.u32 2147483647, %v2144_v63 }
0x2a43   :  { %v1710_v59 = vld [vmem:[#allocation4 + $0x18] sm:$0xff]  ;;  %v2157_v13 = vor.u32 1.1754944e-38, %v2156_v10  ;;  %vm2155_vm10 = vcmp.eq.f32.partialorder %v2154_v16, 8.507059e+37 }
0x2a44   :  { %3584 = vmatmul.msk.f32.gmra.mxu3 %vm35_vm0, %v1710_v59  ;;  %v2579_v10 = vld [vmem:[#allocation2 + $0xc] sm:$0x3] }
0x2a45   :  { %2163 = vrot.lane.b32.xlu1 %v3906_v61, %s4045_s26 }
0x2a47   :  { %v3910_v0 = vpop.eup %3909 }
0x2a48   :  { %v2146_v1 = vmul.f32 %v3910_v0, %v2144_v63  ;;  %vm2151_vm7 = vweird.f32 %v3910_v0 }
0x2a49   :  { %vm2152_vm9 = vmor %vm2150_vm8, %vm2151_vm7 }
0x2a4a   :  { %v2147_v6 = vsub.f32 1.0, %v2146_v1 }
0x2a4c   :  { %v2148_v7 = vmul.f32 %v3910_v0, %v2147_v6 }
0x2a4e   :  { %v2149_v9 = vadd.f32 %v3910_v0, %v2148_v7 }
0x2a50   :  { %v2153_v11 = vsel %vm2152_vm9, %v3910_v0, %v2149_v9 }
0x2a51   :  { %v2158_v15 = vsel %vm2155_vm10, %v2157_v13, %v2153_v11 }
0x2a52   :  { %v2161_v26 = vmul.f32 %v2158_v15, %v4474_v43 }
0x2aaf   :  { %v2373_v8 = vpop.permute.xlu1 %2372 }
0x2ab0   :  { %v2375_v3 = vmul.f32 %v2373_v8, %v2356_v49 }
0x2ab2   :  { %2377 = vrot.lane.b32.xlu0 %v2375_v3, %s4048_s29 }
0x2ab7   :  { %v2164_v14 = vpop.permute.xlu1 %2163 }
0x2ab8   :  { %v2166_v17 = vmul.f32 %v2164_v14, %v2158_v15 }
0x2aba   :  { %2168 = vrot.lane.b32.xlu0 %v2166_v17, %s4046_s27 }
0x2ac7   :  { %v1752_v2 = vpop.f32.mrf.mxu3 }
0x2ac8   :  { %v1753_v20 = vadd.f32 %v4042_v19, %v1752_v2 }
0x2aca   :  { %1758 = vst.msk [vmem:[#allocation2 + $0x18] sm:$0xff] %vm77_vm1, %v1753_v20 }
0x2b24   :  { %v2378_v21 = vpop.permute.xlu0 %2377 }
0x2b25   :  { %2380 = vst.msk [vmem:[#allocation4 + $0x8] sm:$0x3] %vm181_vm6, %v2378_v21  ;;  %3605 = vmatmul.msk.f32.vlgmr.msra.gmra.mxu3 %vm35_vm0, %v2378_v21 }
0x2b26   :  { %2993 = vmatpush.msra.mxu3 %v4386_v37 }
0x2b2c   :  { %v2169_v24 = vpop.permute.xlu0 %2168 }
0x2b2d   :  { %v4519_v27 = vadd.f32 %v2169_v24, %v2161_v26 }
0x2ba8   :  { %v2467_v22 = vpop.f32.mrf.mxu3 }
0x2ba9   :  { %v2470_v23 = vadd.f32 %v2467_v22, %v2447_v60 }
0x2bab   :  { %3911 = vtanh.f32 %v2470_v23  ;;  %v3606_v30 = vmul.f32 -1.442695, %v2470_v23 }
0x2bac   :  { %3913 = vtanh.f32 %v4519_v27 }
0x2bad   :  { %3915 = vpow2.f32 %v3606_v30 }
0x2bb1   :  { %v3912_v5 = vpop.eup %3911 }
0x2bb2   :  { %2493 = vrot.lane.b32.xlu2 %v3912_v5, %s4045_s26  ;;  %v3914_v28 = vpop.eup %3913 }
0x2bb3   :  { %v3916_v37 = vpop.eup %3915 }
0x2bb4   :  { %v2474_v31 = vadd.f32 1.0, %v3916_v37 }
0x2bb6   :  { %3917 = vrcp.f32 %v2474_v31  ;;  %v2486_v18 = vand.u32 2147483648, %v2474_v31  ;;  %vm2480_vm12 = vweird.f32 %v2474_v31  ;;  %v2484_v29 = vand.u32 2147483647, %v2474_v31 }
0x2bb8   :  { %v2487_v38 = vor.u32 1.1754944e-38, %v2486_v18  ;;  %vm2485_vm14 = vcmp.eq.f32.partialorder %v2484_v29, 8.507059e+37 }
0x2bba   :  { %2174 = vrot.lane.b32.xlu2 %v3914_v28, %s4047_s28 }
0x2bbc   :  { %v3918_v12 = vpop.eup %3917 }
0x2bbd   :  { %v2476_v32 = vmul.f32 %v3918_v12, %v2474_v31  ;;  %vm2481_vm1 = vweird.f32 %v3918_v12 }
0x2bbe   :  { %vm2482_vm13 = vmor %vm2480_vm12, %vm2481_vm1 }
0x2bbf   :  { %v2477_v33 = vsub.f32 1.0, %v2476_v32 }
0x2bc1   :  { %v2478_v35 = vmul.f32 %v3918_v12, %v2477_v33 }
0x2bc3   :  { %v2479_v43 = vadd.f32 %v3918_v12, %v2478_v35 }
0x2bc5   :  { %v2483_v36 = vsel %vm2482_vm13, %v3918_v12, %v2479_v43 }
0x2bc6   :  { %v2488_v41 = vsel %vm2485_vm14, %v2487_v38, %v2483_v36 }
0x2bc7   :  { %v2491_v46 = vmul.f32 %v2488_v41, %v4502_v4 }
0x2c0c   :  { %v2494_v40 = vpop.permute.xlu2 %2493 }
0x2c0d   :  { %v2496_v42 = vmul.f32 %v2494_v40, %v2488_v41 }
0x2c0f   :  { %2498 = vrot.lane.b32.xlu1 %v2496_v42, %s4046_s27 }
0x2c14   :  { %v2175_v44 = vpop.permute.xlu2 %2174 }
0x2c15   :  { %v2177_v45 = vmul.f32 %v2175_v44, %v2158_v15 }
0x2c17   :  { %2179 = vrot.lane.b32.xlu1 %v2177_v45, %s4048_s29 }
0x2c81   :  { %v2499_v47 = vpop.permute.xlu1 %2498 }
0x2c82   :  { %v4527_v48 = vadd.f32 %v2499_v47, %v2491_v46 }
0x2c84   :  { %3919 = vtanh.f32 %v4527_v48 }
0x2c89   :  { %v2180_v55 = vpop.permute.xlu1 %2179 }
0x2c8a   :  { %v3920_v49 = vpop.eup %3919  ;;  %2182 = vst.msk [vmem:[#allocation5 + $0x4] sm:$0x3] %vm181_vm6, %v2180_v55  ;;  %3599 = vmatmul.msk.f32.vlgmr.msra.gmra.mxu1 %vm35_vm0, %v2180_v55 }
0x2c8b   :  { %2504 = vrot.lane.b32.xlu0 %v3920_v49, %s4047_s28  ;;  %2795 = vmatpush.msra.mxu1 %v4422_v39  ;;  %v4541_v39 = vld [vmem:[%s4717_s3 + $0x30] sm:$0xff] }
0x2cfd   :  { %v2505_v34 = vpop.permute.xlu0 %2504 }
0x2cfe   :  { %v2507_v50 = vmul.f32 %v2505_v34, %v2488_v41  ;;  %v2381_v41 = vld [vmem:[#allocation3 + $0x8] sm:$0x3] }
0x2d00   :  { %2509 = vrot.lane.b32.xlu2 %v2507_v50, %s4048_s29 }
0x2d07   :  { %v2269_v52 = vpop.f32.mrf.mxu1 }
0x2d08   :  { %v2272_v53 = vadd.f32 %v2269_v52, %v2249_v51 }
0x2d0a   :  { %3921 = vtanh.f32 %v2272_v53  ;;  %v3600_v54 = vmul.f32 -1.442695, %v2272_v53 }
0x2d0c   :  { %3923 = vpow2.f32 %v3600_v54 }
0x2d10   :  { %v3922_v4 = vpop.eup %3921 }
0x2d11   :  { %2295 = vrot.lane.b32.xlu0 %v3922_v4, %s4045_s26 }
0x2d12   :  { %v3924_v57 = vpop.eup %3923 }
0x2d13   :  { %v2276_v58 = vadd.f32 1.0, %v3924_v57 }
0x2d15   :  { %3925 = vrcp.f32 %v2276_v58  ;;  %v2288_v0 = vand.u32 2147483648, %v2276_v58  ;;  %vm2282_vm2 = vweird.f32 %v2276_v58  ;;  %v2286_v1 = vand.u32 2147483647, %v2276_v58 }
0x2d17   :  { %v2289_v7 = vor.u32 1.1754944e-38, %v2288_v0  ;;  %vm2287_vm4 = vcmp.eq.f32.partialorder %v2286_v1, 8.507059e+37 }
0x2d1b   :  { %v3926_v59 = vpop.eup %3925 }
0x2d1c   :  { %v2278_v61 = vmul.f32 %v3926_v59, %v2276_v58  ;;  %vm2283_vm15 = vweird.f32 %v3926_v59 }
0x2d1d   :  { %vm2284_vm3 = vmor %vm2282_vm2, %vm2283_vm15 }
0x2d1e   :  { %v2279_v62 = vsub.f32 1.0, %v2278_v61  ;;  %v2711_v61 = vld [vmem:[#allocation2 + $0xe] sm:$0x3] }
0x2d20   :  { %v2280_v25 = vmul.f32 %v3926_v59, %v2279_v62 }
0x2d22   :  { %v2281_v63 = vadd.f32 %v3926_v59, %v2280_v25 }
0x2d24   :  { %v2285_v6 = vsel %vm2284_vm3, %v3926_v59, %v2281_v63 }
0x2d25   :  { %v2290_v3 = vsel %vm2287_vm4, %v2289_v7, %v2285_v6 }
0x2d26   :  { %v2293_v13 = vmul.f32 %v2290_v3, %v4519_v27 }
0x2d5a   :  { %v2510_v56 = vpop.permute.xlu2 %2509 }
0x2d5b   :  { %2512 = vst.msk [vmem:[#allocation4 + $0xa] sm:$0x3] %vm181_vm6, %v2510_v56  ;;  %3609 = vmatmul.msk.f32.vlgmr.msrb.gmra.mxu0 %vm35_vm0, %v2510_v56 }
0x2d5c   :  { %3125 = vmatpush.msrb.mxu0 %v4541_v39 }
0x2d83   :  { %v2296_v8 = vpop.permute.xlu0 %2295 }
0x2d84   :  { %v2298_v9 = vmul.f32 %v2296_v8, %v2290_v3 }
0x2d86   :  { %2300 = vrot.lane.b32.xlu2 %v2298_v9, %s4046_s27 }
0x2dd8   :  { %v2599_v16 = vpop.f32.mrf.mxu0 }
0x2dd9   :  { %v2602_v11 = vadd.f32 %v2599_v16, %v2579_v10 }
0x2ddb   :  { %3927 = vtanh.f32 %v2602_v11  ;;  %v3610_v19 = vmul.f32 -1.442695, %v2602_v11 }
0x2de0   :  { %v2301_v14 = vpop.permute.xlu2 %2300 }
0x2de1   :  { %v3928_v15 = vpop.eup %3927  ;;  %v4546_v17 = vadd.f32 %v2301_v14, %v2293_v13 }
0x2de2   :  { %2625 = vrot.lane.b32.xlu1 %v3928_v15, %s4045_s26 }
0x2de3   :  { %3929 = vtanh.f32 %v4546_v17 }
0x2de4   :  { %3931 = vpow2.f32 %v3610_v19 }
0x2de9   :  { %v3930_v2 = vpop.eup %3929 }
0x2dea   :  { %2306 = vrot.lane.b32.xlu1 %v3930_v2, %s4047_s28  ;;  %v3932_v20 = vpop.eup %3931 }
0x2deb   :  { %v2606_v21 = vadd.f32 1.0, %v3932_v20 }
0x2ded   :  { %3933 = vrcp.f32 %v2606_v21  ;;  %v2618_v27 = vand.u32 2147483648, %v2606_v21  ;;  %vm2612_vm7 = vweird.f32 %v2606_v21  ;;  %v2616_v5 = vand.u32 2147483647, %v2606_v21 }
0x2def   :  { %v2619_v30 = vor.u32 1.1754944e-38, %v2618_v27  ;;  %vm2617_vm9 = vcmp.eq.f32.partialorder %v2616_v5, 8.507059e+37 }
0x2df3   :  { %v3934_v60 = vpop.eup %3933 }
0x2df4   :  { %v2608_v22 = vmul.f32 %v3934_v60, %v2606_v21  ;;  %vm2613_vm5 = vweird.f32 %v3934_v60 }
0x2df5   :  { %vm2614_vm8 = vmor %vm2612_vm7, %vm2613_vm5 }
0x2df6   :  { %v2609_v23 = vsub.f32 1.0, %v2608_v22 }
0x2df8   :  { %v2610_v24 = vmul.f32 %v3934_v60, %v2609_v23 }
0x2dfa   :  { %v2611_v26 = vadd.f32 %v3934_v60, %v2610_v24 }
0x2dfc   :  { %v2615_v28 = vsel %vm2614_vm8, %v3934_v60, %v2611_v26 }
0x2dfd   :  { %v2620_v31 = vsel %vm2617_vm9, %v2619_v30, %v2615_v28 }
0x2dfe   :  { %v2623_v35 = vmul.f32 %v2620_v31, %v4527_v48 }
0x2e54   :  { %v2626_v37 = vpop.permute.xlu1 %2625 }
0x2e55   :  { %v2628_v12 = vmul.f32 %v2626_v37, %v2620_v31 }
0x2e57   :  { %2630 = vrot.lane.b32.xlu0 %v2628_v12, %s4046_s27 }
0x2e5c   :  { %v2307_v32 = vpop.permute.xlu1 %2306 }
0x2e5d   :  { %v2309_v33 = vmul.f32 %v2307_v32, %v2290_v3 }
0x2e5f   :  { %2311 = vrot.lane.b32.xlu0 %v2309_v33, %s4048_s29 }
0x2ec9   :  { %v2631_v43 = vpop.permute.xlu0 %2630 }
0x2eca   :  { %v4554_v18 = vadd.f32 %v2631_v43, %v2623_v35 }
0x2ecc   :  { %3935 = vtanh.f32 %v4554_v18 }
0x2ed1   :  { %v2312_v29 = vpop.permute.xlu0 %2311 }
0x2ed2   :  { %v3936_v36 = vpop.eup %3935  ;;  %2314 = vst.msk [vmem:[#allocation5 + $0x6] sm:$0x3] %vm181_vm6, %v2312_v29  ;;  %3603 = vmatmul.msk.f32.vlgmr.msrb.gmra.mxu2 %vm35_vm0, %v2312_v29 }
0x2ed3   :  { %2636 = vrot.lane.b32.xlu2 %v3936_v36, %s4047_s28  ;;  %2927 = vmatpush.msrb.mxu2 %v4541_v39 }
0x2f2d   :  { %v2637_v38 = vpop.permute.xlu2 %2636 }
0x2f2e   :  { %v2639_v40 = vmul.f32 %v2637_v38, %v2620_v31  ;;  %v2513_v31 = vld [vmem:[#allocation3 + $0xa] sm:$0x3] }
0x2f30   :  { %2641 = vrot.lane.b32.xlu1 %v2639_v40, %s4048_s29 }
0x2f55   :  { %v2401_v42 = vpop.f32.mrf.mxu2 }
0x2f56   :  { %v2404_v44 = vadd.f32 %v2401_v42, %v2381_v41 }
0x2f58   :  { %3937 = vtanh.f32 %v2404_v44  ;;  %v3604_v46 = vmul.f32 -1.442695, %v2404_v44 }
0x2f5a   :  { %3939 = vpow2.f32 %v3604_v46 }
0x2f5e   :  { %v3938_v45 = vpop.eup %3937 }
0x2f5f   :  { %2427 = vrot.lane.b32.xlu2 %v3938_v45, %s4045_s26 }
0x2f60   :  { %v3940_v47 = vpop.eup %3939 }
0x2f61   :  { %v2408_v48 = vadd.f32 1.0, %v3940_v47 }
0x2f63   :  { %3941 = vrcp.f32 %v2408_v48  ;;  %v2420_v53 = vand.u32 2147483648, %v2408_v48  ;;  %vm2414_vm1 = vweird.f32 %v2408_v48  ;;  %v2418_v4 = vand.u32 2147483647, %v2408_v48 }
0x2f65   :  { %v2421_v56 = vor.u32 1.1754944e-38, %v2420_v53  ;;  %vm2419_vm13 = vcmp.eq.f32.partialorder %v2418_v4, 8.507059e+37 }
0x2f69   :  { %v3942_v49 = vpop.eup %3941 }
0x2f6a   :  { %v2410_v34 = vmul.f32 %v3942_v49, %v2408_v48  ;;  %vm2415_vm10 = vweird.f32 %v3942_v49 }
0x2f6b   :  { %vm2416_vm12 = vmor %vm2414_vm1, %vm2415_vm10 }
0x2f6c   :  { %v2411_v50 = vsub.f32 1.0, %v2410_v34  ;;  %v2843_v34 = vld [vmem:[#allocation2 + $0x10] sm:$0x3] }
0x2f6e   :  { %v2412_v51 = vmul.f32 %v3942_v49, %v2411_v50 }
0x2f70   :  { %v2413_v52 = vadd.f32 %v3942_v49, %v2412_v51 }
0x2f72   :  { %v2417_v54 = vsel %vm2416_vm12, %v3942_v49, %v2413_v52 }
0x2f73   :  { %v2422_v58 = vsel %vm2419_vm13, %v2421_v56, %v2417_v54 }
0x2f74   :  { %v2425_v63 = vmul.f32 %v2422_v58, %v4546_v17 }
0x2fa2   :  { %v2642_v55 = vpop.permute.xlu1 %2641 }
0x2fa3   :  { %2644 = vst.msk [vmem:[#allocation4 + $0xc] sm:$0x3] %vm181_vm6, %v2642_v55  ;;  %3613 = vmatmul.msk.f32.vlgmr.msrb.gmra.mxu3 %vm35_vm0, %v2642_v55 }
0x2fa4   :  { %3257 = vmatpush.msrb.mxu3 %v4541_v39 }
0x2fb9   :  { %v2428_v57 = vpop.permute.xlu2 %2427 }
0x2fba   :  { %v2430_v59 = vmul.f32 %v2428_v57, %v2422_v58 }
0x2fbc   :  { %2432 = vrot.lane.b32.xlu1 %v2430_v59, %s4046_s27 }
0x3026   :  { %v2731_v62 = vpop.f32.mrf.mxu3 }
0x3027   :  { %v2734_v25 = vadd.f32 %v2731_v62, %v2711_v61 }
0x3029   :  { %3943 = vtanh.f32 %v2734_v25  ;;  %v3614_v8 = vmul.f32 -1.442695, %v2734_v25 }
0x302e   :  { %v2433_v0 = vpop.permute.xlu1 %2432 }
0x302f   :  { %v3944_v1 = vpop.eup %3943  ;;  %v4568_v6 = vadd.f32 %v2433_v0, %v2425_v63 }
0x3030   :  { %2757 = vrot.lane.b32.xlu0 %v3944_v1, %s4045_s26 }
0x3031   :  { %3945 = vtanh.f32 %v4568_v6 }
0x3032   :  { %3947 = vpow2.f32 %v3614_v8 }
0x3037   :  { %v3946_v7 = vpop.eup %3945 }
0x3038   :  { %2438 = vrot.lane.b32.xlu0 %v3946_v7, %s4047_s28  ;;  %v3948_v3 = vpop.eup %3947 }
0x3039   :  { %v2738_v9 = vadd.f32 1.0, %v3948_v3 }
0x303b   :  { %3949 = vrcp.f32 %v2738_v9  ;;  %v2750_v15 = vand.u32 2147483648, %v2738_v9  ;;  %vm2744_vm15 = vweird.f32 %v2738_v9  ;;  %v2748_v17 = vand.u32 2147483647, %v2738_v9 }
0x303d   :  { %v2751_v19 = vor.u32 1.1754944e-38, %v2750_v15  ;;  %vm2749_vm3 = vcmp.eq.f32.partialorder %v2748_v17, 8.507059e+37 }
0x3041   :  { %v3950_v10 = vpop.eup %3949 }
0x3042   :  { %v2740_v16 = vmul.f32 %v3950_v10, %v2738_v9  ;;  %vm2745_vm14 = vweird.f32 %v3950_v10 }
0x3043   :  { %vm2746_vm2 = vmor %vm2744_vm15, %vm2745_vm14 }
0x3044   :  { %v2741_v11 = vsub.f32 1.0, %v2740_v16 }
0x3046   :  { %v2742_v13 = vmul.f32 %v3950_v10, %v2741_v11 }
0x3048   :  { %v2743_v14 = vadd.f32 %v3950_v10, %v2742_v13 }
0x304a   :  { %v2747_v2 = vsel %vm2746_vm2, %v3950_v10, %v2743_v14 }
0x304b   :  { %v2752_v21 = vsel %vm2749_vm3, %v2751_v19, %v2747_v2 }
0x304c   :  { %v2755_v24 = vmul.f32 %v2752_v21, %v4554_v18 }
0x30a2   :  { %v2758_v20 = vpop.permute.xlu0 %2757 }
0x30a3   :  { %v2760_v60 = vmul.f32 %v2758_v20, %v2752_v21 }
0x30a5   :  { %2762 = vrot.lane.b32.xlu2 %v2760_v60, %s4046_s27 }
0x30aa   :  { %v2439_v22 = vpop.permute.xlu0 %2438 }
0x30ab   :  { %v2441_v23 = vmul.f32 %v2439_v22, %v2422_v58  ;;  %v2909_v22 = vld [vmem:[#allocation2 + $0x12] sm:$0x3] }
0x30ad   :  { %2443 = vrot.lane.b32.xlu2 %v2441_v23, %s4048_s29 }
0x30ff   :  { %v2763_v26 = vpop.permute.xlu2 %2762 }
0x3100   :  { %v4576_v27 = vadd.f32 %v2763_v26, %v2755_v24 }
0x3102   :  { %3951 = vtanh.f32 %v4576_v27 }
0x3107   :  { %v2444_v5 = vpop.permute.xlu2 %2443 }
0x3108   :  { %v3952_v28 = vpop.eup %3951  ;;  %2446 = vst.msk [vmem:[#allocation5 + $0x8] sm:$0x3] %vm181_vm6, %v2444_v5  ;;  %3607 = vmatmul.msk.f32.vlgmr.msrb.gmra.mxu1 %vm35_vm0, %v2444_v5 }
0x3109   :  { %2768 = vrot.lane.b32.xlu1 %v3952_v28, %s4047_s28  ;;  %3059 = vmatpush.msrb.mxu1 %v4541_v39 }
0x317b   :  { %v2769_v30 = vpop.permute.xlu1 %2768 }
0x317c   :  { %v2771_v37 = vmul.f32 %v2769_v30, %v2752_v21 }
0x317e   :  { %2773 = vrot.lane.b32.xlu0 %v2771_v37, %s4048_s29 }
0x3185   :  { %v2533_v12 = vpop.f32.mrf.mxu1 }
0x3186   :  { %v2536_v32 = vadd.f32 %v2533_v12, %v2513_v31 }
0x3188   :  { %3953 = vtanh.f32 %v2536_v32  ;;  %v3608_v35 = vmul.f32 -1.442695, %v2536_v32 }
0x318a   :  { %3955 = vpow2.f32 %v3608_v35 }
0x318e   :  { %v3954_v33 = vpop.eup %3953 }
0x318f   :  { %2559 = vrot.lane.b32.xlu1 %v3954_v33, %s4045_s26 }
0x3190   :  { %v3956_v43 = vpop.eup %3955 }
0x3191   :  { %v2540_v18 = vadd.f32 1.0, %v3956_v43 }
0x3193   :  { %3957 = vrcp.f32 %v2540_v18  ;;  %v2552_v44 = vand.u32 2147483648, %v2540_v18  ;;  %vm2546_vm5 = vweird.f32 %v2540_v18  ;;  %v2550_v45 = vand.u32 2147483647, %v2540_v18 }
0x3195   :  { %v2553_v47 = vor.u32 1.1754944e-38, %v2552_v44  ;;  %vm2551_vm8 = vcmp.eq.f32.partialorder %v2550_v45, 8.507059e+37 }
0x3199   :  { %v3958_v29 = vpop.eup %3957 }
0x319a   :  { %v2542_v36 = vmul.f32 %v3958_v29, %v2540_v18  ;;  %vm2547_vm4 = vweird.f32 %v3958_v29 }
0x319b   :  { %vm2548_vm7 = vmor %vm2546_vm5, %vm2547_vm4 }
0x319c   :  { %v2543_v40 = vsub.f32 1.0, %v2542_v36 }
0x319e   :  { %v2544_v41 = vmul.f32 %v3958_v29, %v2543_v40 }
0x31a0   :  { %v2545_v42 = vadd.f32 %v3958_v29, %v2544_v41 }
0x31a2   :  { %v2549_v46 = vsel %vm2548_vm7, %v3958_v29, %v2545_v42  ;;  %v2645_v29 = vld [vmem:[#allocation3 + $0xc] sm:$0x3] }
0x31a3   :  { %v2554_v55 = vsel %vm2551_vm8, %v2553_v47, %v2549_v46 }
0x31a4   :  { %v2557_v52 = vmul.f32 %v2554_v55, %v4568_v6 }
0x31f0   :  { %v2774_v38 = vpop.permute.xlu0 %2773 }
0x31f1   :  { %2776 = vst.msk [vmem:[#allocation4 + $0xe] sm:$0x3] %vm181_vm6, %v2774_v38  ;;  %3617 = vmatmul.msk.f32.vlgmr.msra.gmra.mxu0 %vm35_vm0, %v2774_v38 }
0x3201   :  { %v2560_v48 = vpop.permute.xlu1 %2559 }
0x3202   :  { %v2562_v49 = vmul.f32 %v2560_v48, %v2554_v55 }
0x3204   :  { %2564 = vrot.lane.b32.xlu0 %v2562_v49, %s4046_s27 }
0x326e   :  { %v2863_v50 = vpop.f32.mrf.mxu0 }
0x326f   :  { %v2866_v51 = vadd.f32 %v2863_v50, %v2843_v34 }
0x3271   :  { %3959 = vtanh.f32 %v2866_v51  ;;  %v3618_v57 = vmul.f32 -1.442695, %v2866_v51 }
0x3276   :  { %v2565_v53 = vpop.permute.xlu0 %2564 }
0x3277   :  { %v3960_v4 = vpop.eup %3959  ;;  %v4589_v54 = vadd.f32 %v2565_v53, %v2557_v52 }
0x3278   :  { %2889 = vrot.lane.b32.xlu2 %v3960_v4, %s4045_s26 }
0x3279   :  { %3961 = vtanh.f32 %v4589_v54 }
0x327a   :  { %3963 = vpow2.f32 %v3618_v57 }
0x327f   :  { %v3962_v56 = vpop.eup %3961 }
0x3280   :  { %2570 = vrot.lane.b32.xlu2 %v3962_v56, %s4047_s28  ;;  %v3964_v58 = vpop.eup %3963 }
0x3281   :  { %v2870_v59 = vadd.f32 1.0, %v3964_v58 }
0x3283   :  { %3965 = vrcp.f32 %v2870_v59  ;;  %v2882_v1 = vand.u32 2147483648, %v2870_v59  ;;  %vm2876_vm10 = vweird.f32 %v2870_v59  ;;  %v2880_v6 = vand.u32 2147483647, %v2870_v59 }
0x3285   :  { %v2883_v8 = vor.u32 1.1754944e-38, %v2882_v1  ;;  %vm2881_vm12 = vcmp.eq.f32.partialorder %v2880_v6, 8.507059e+37  ;;  %v2975_v1 = vld [vmem:[#allocation2 + $0x14] sm:$0x3] }
0x3289   :  { %v3966_v61 = vpop.eup %3965 }
0x328a   :  { %v2872_v62 = vmul.f32 %v3966_v61, %v2870_v59  ;;  %vm2877_vm9 = vweird.f32 %v3966_v61 }
0x328b   :  { %vm2878_vm1 = vmor %vm2876_vm10, %vm2877_vm9 }
0x328c   :  { %v2873_v25 = vsub.f32 1.0, %v2872_v62 }
0x328e   :  { %v2874_v63 = vmul.f32 %v3966_v61, %v2873_v25 }
0x3290   :  { %v2875_v0 = vadd.f32 %v3966_v61, %v2874_v63 }
0x3292   :  { %v2879_v7 = vsel %vm2878_vm1, %v3966_v61, %v2875_v0 }
0x3293   :  { %v2884_v9 = vsel %vm2881_vm12, %v2883_v8, %v2879_v7 }
0x3294   :  { %v2887_v13 = vmul.f32 %v2884_v9, %v4576_v27 }
0x32d2   :  { %v2890_v3 = vpop.permute.xlu2 %2889 }
0x32d3   :  { %v2892_v10 = vmul.f32 %v2890_v3, %v2884_v9 }
0x32d5   :  { %2894 = vrot.lane.b32.xlu1 %v2892_v10, %s4046_s27 }
0x32da   :  { %v2571_v16 = vpop.permute.xlu2 %2570 }
0x32db   :  { %v2573_v11 = vmul.f32 %v2571_v16, %v2554_v55 }
0x32dd   :  { %2575 = vrot.lane.b32.xlu1 %v2573_v11, %s4048_s29 }
0x3347   :  { %v2895_v14 = vpop.permute.xlu1 %2894 }
0x3348   :  { %v2897_v15 = vadd.f32 %v2895_v14, %v2887_v13 }
0x334a   :  { %3967 = vtanh.f32 %v2897_v15 }
0x334f   :  { %v2576_v17 = vpop.permute.xlu1 %2575 }
0x3350   :  { %v3968_v2 = vpop.eup %3967  ;;  %2578 = vst.msk [vmem:[#allocation5 + $0xa] sm:$0x3] %vm181_vm6, %v2576_v17  ;;  %3611 = vmatmul.msk.f32.vlgmr.msra.gmra.mxu2 %vm35_vm0, %v2576_v17 }
0x3351   :  { %2900 = vrot.lane.b32.xlu0 %v3968_v2, %s4047_s28  ;;  %3191 = vmatpush.msra.mxu2 %v4541_v39 }
0x33c3   :  { %v2901_v19 = vpop.permute.xlu0 %2900 }
0x33c4   :  { %v2903_v20 = vmul.f32 %v2901_v19, %v2884_v9 }
0x33c6   :  { %2905 = vrot.lane.b32.xlu2 %v2903_v20, %s4048_s29 }
0x33d3   :  { %v2665_v60 = vpop.f32.mrf.mxu2 }
0x33d4   :  { %v2668_v36 = vadd.f32 %v2665_v60, %v2645_v29 }
0x33d6   :  { %v3612_v48 = vmul.f32 -1.442695, %v2668_v36 }
0x3420   :  { %v2906_v21 = vpop.permute.xlu2 %2905 }
0x3421   :  { %2908 = vst.msk [vmem:[#allocation4 + $0x10] sm:$0x3] %vm181_vm6, %v2906_v21  ;;  %3619 = vmatmul.msk.f32.vlgmr.msrb.gmra.mxu2 %vm35_vm0, %v2906_v21 }
0x34a4   :  { %v2929_v23 = vpop.f32.mrf.mxu2 }
0x34a5   :  { %v2932_v24 = vadd.f32 %v2929_v23, %v2909_v22 }
0x34a7   :  { %3969 = vtanh.f32 %v2932_v24  ;;  %v3620_v27 = vmul.f32 -1.442695, %v2932_v24 }
0x34a9   :  { %3971 = vpow2.f32 %v3620_v27 }
0x34ad   :  { %v3970_v26 = vpop.eup %3969 }
0x34ae   :  { %2955 = vrot.lane.b32.xlu0 %v3970_v26, %s4045_s26 }
0x34af   :  { %v3972_v5 = vpop.eup %3971 }
0x34b0   :  { %v2936_v28 = vadd.f32 1.0, %v3972_v5 }
0x34b2   :  { %3973 = vrcp.f32 %v2936_v28  ;;  %v2948_v33 = vand.u32 2147483648, %v2936_v28  ;;  %vm2942_vm14 = vweird.f32 %v2936_v28  ;;  %v2946_v35 = vand.u32 2147483647, %v2936_v28 }
0x34b3   :  { %3975 = vtanh.f32 %v2668_v36 }
0x34b4   :  { %v2949_v18 = vor.u32 1.1754944e-38, %v2948_v33  ;;  %vm2947_vm2 = vcmp.eq.f32.partialorder %v2946_v35, 8.507059e+37 }
0x34b8   :  { %v3974_v30 = vpop.eup %3973 }
0x34b9   :  { %v2938_v37 = vmul.f32 %v3974_v30, %v2936_v28  ;;  %vm2943_vm13 = vweird.f32 %v3974_v30  ;;  %v3976_v42 = vpop.eup %3975 }
0x34ba   :  { %vm2944_vm15 = vmor %vm2942_vm14, %vm2943_vm13 }
0x34bb   :  { %v2939_v31 = vsub.f32 1.0, %v2938_v37 }
0x34bd   :  { %v2940_v12 = vmul.f32 %v3974_v30, %v2939_v31 }
0x34bf   :  { %v2941_v32 = vadd.f32 %v3974_v30, %v2940_v12 }
0x34c1   :  { %v2945_v43 = vsel %vm2944_vm15, %v3974_v30, %v2941_v32 }
0x34c2   :  { %v2950_v40 = vsel %vm2947_vm2, %v2949_v18, %v2945_v43  ;;  %v3041_v18 = vld [vmem:[#allocation2 + $0x16] sm:$0x3] }
0x34c3   :  { %v2953_v44 = vmul.f32 %v2950_v40, %v2897_v15 }
0x3520   :  { %v2956_v38 = vpop.permute.xlu0 %2955 }
0x3521   :  { %v2958_v41 = vmul.f32 %v2956_v38, %v2950_v40 }
0x3523   :  { %2960 = vrot.lane.b32.xlu1 %v2958_v41, %s4046_s27 }
0x352b   :  { %2691 = vrot.lane.b32.xlu1 %v3976_v42, %s4045_s26 }
0x3595   :  { %v2961_v45 = vpop.permute.xlu1 %2960 }
0x3596   :  { %v4607_v46 = vadd.f32 %v2961_v45, %v2953_v44 }
0x3598   :  { %3977 = vtanh.f32 %v4607_v46 }
0x3599   :  { %3979 = vpow2.f32 %v3612_v48 }
0x359d   :  { %v2692_v62 = vpop.permute.xlu1 %2691 }
0x359e   :  { %v3978_v47 = vpop.eup %3977 }
0x359f   :  { %2966 = vrot.lane.b32.xlu2 %v3978_v47, %s4047_s28  ;;  %v3980_v55 = vpop.eup %3979 }
0x35a0   :  { %v2672_v49 = vadd.f32 1.0, %v3980_v55 }
0x35a2   :  { %3981 = vrcp.f32 %v2672_v49  ;;  %v2684_v57 = vand.u32 2147483648, %v2672_v49  ;;  %vm2678_vm4 = vweird.f32 %v2672_v49  ;;  %v2682_v58 = vand.u32 2147483647, %v2672_v49 }
0x35a4   :  { %v2685_v61 = vor.u32 1.1754944e-38, %v2684_v57  ;;  %vm2683_vm7 = vcmp.eq.f32.partialorder %v2682_v58, 8.507059e+37 }
0x35a8   :  { %v3982_v34 = vpop.eup %3981 }
0x35a9   :  { %v2674_v50 = vmul.f32 %v3982_v34, %v2672_v49  ;;  %vm2679_vm3 = vweird.f32 %v3982_v34 }
0x35aa   :  { %vm2680_vm5 = vmor %vm2678_vm4, %vm2679_vm3 }
0x35ab   :  { %v2675_v51 = vsub.f32 1.0, %v2674_v50 }
0x35ad   :  { %v2676_v52 = vmul.f32 %v3982_v34, %v2675_v51 }
0x35af   :  { %v2677_v4 = vadd.f32 %v3982_v34, %v2676_v52 }
0x35b1   :  { %v2681_v59 = vsel %vm2680_vm5, %v3982_v34, %v2677_v4 }
0x35b2   :  { %v2686_v25 = vsel %vm2683_vm7, %v2685_v61, %v2681_v59 }
0x35b3   :  { %v2694_v63 = vmul.f32 %v2692_v62, %v2686_v25  ;;  %v2689_v3 = vmul.f32 %v2686_v25, %v4589_v54  ;;  %v3107_v62 = vld [vmem:[#allocation2 + $0x18] sm:$0x3] }
0x35f9   :  { %v2967_v53 = vpop.permute.xlu2 %2966 }
0x35fa   :  { %v2969_v56 = vmul.f32 %v2967_v53, %v2950_v40 }
0x35fc   :  { %2971 = vrot.lane.b32.xlu0 %v2969_v56, %s4048_s29 }
0x3604   :  { %2696 = vrot.lane.b32.xlu0 %v2694_v63, %s4046_s27 }
0x366e   :  { %v2972_v0 = vpop.permute.xlu0 %2971 }
0x366f   :  { %2974 = vst.msk [vmem:[#allocation4 + $0x12] sm:$0x3] %vm181_vm6, %v2972_v0  ;;  %3621 = vmatmul.msk.f32.vlgmr.msra.gmra.mxu3 %vm35_vm0, %v2972_v0 }
0x3676   :  { %v2697_v8 = vpop.permute.xlu0 %2696 }
0x3677   :  { %v4616_v9 = vadd.f32 %v2697_v8, %v2689_v3 }
0x36f2   :  { %v2995_v6 = vpop.f32.mrf.mxu3 }
0x36f3   :  { %v2998_v7 = vadd.f32 %v2995_v6, %v2975_v1 }
0x36f5   :  { %3983 = vtanh.f32 %v2998_v7  ;;  %v3622_v11 = vmul.f32 -1.442695, %v2998_v7 }
0x36f6   :  { %3985 = vtanh.f32 %v4616_v9 }
0x36f7   :  { %3987 = vpow2.f32 %v3622_v11 }
0x36fb   :  { %v3984_v10 = vpop.eup %3983 }
0x36fc   :  { %3021 = vrot.lane.b32.xlu2 %v3984_v10, %s4045_s26  ;;  %v3986_v16 = vpop.eup %3985 }
0x36fd   :  { %v3988_v13 = vpop.eup %3987 }
0x36fe   :  { %v3002_v14 = vadd.f32 1.0, %v3988_v13 }
0x3700   :  { %3989 = vrcp.f32 %v3002_v14  ;;  %v3014_v20 = vand.u32 2147483648, %v3002_v14  ;;  %vm3008_vm9 = vweird.f32 %v3002_v14  ;;  %v3012_v21 = vand.u32 2147483647, %v3002_v14 }
0x3702   :  { %v3015_v22 = vor.u32 1.1754944e-38, %v3014_v20  ;;  %vm3013_vm1 = vcmp.eq.f32.partialorder %v3012_v21, 8.507059e+37 }
0x3704   :  { %2702 = vrot.lane.b32.xlu2 %v3986_v16, %s4047_s28 }
0x3706   :  { %v3990_v15 = vpop.eup %3989 }
0x3707   :  { %v3004_v17 = vmul.f32 %v3990_v15, %v3002_v14  ;;  %vm3009_vm8 = vweird.f32 %v3990_v15 }
0x3708   :  { %vm3010_vm10 = vmor %vm3008_vm9, %vm3009_vm8 }
0x3709   :  { %v3005_v2 = vsub.f32 1.0, %v3004_v17 }
0x370b   :  { %v3006_v19 = vmul.f32 %v3990_v15, %v3005_v2 }
0x370d   :  { %v3007_v54 = vadd.f32 %v3990_v15, %v3006_v19 }
0x370f   :  { %v3011_v60 = vsel %vm3010_vm10, %v3990_v15, %v3007_v54 }
0x3710   :  { %v3016_v24 = vsel %vm3013_vm1, %v3015_v22, %v3011_v60 }
0x3711   :  { %v3019_v28 = vmul.f32 %v3016_v24, %v4607_v46 }
0x3756   :  { %v3022_v23 = vpop.permute.xlu2 %3021 }
0x3757   :  { %v3024_v26 = vmul.f32 %v3022_v23, %v3016_v24 }
0x3759   :  { %3026 = vrot.lane.b32.xlu1 %v3024_v26, %s4046_s27 }
0x375e   :  { %v2703_v27 = vpop.permute.xlu2 %2702 }
0x375f   :  { %v2705_v5 = vmul.f32 %v2703_v27, %v2686_v25  ;;  %v3173_v27 = vld [vmem:[#allocation2 + $0x1a] sm:$0x3] }
0x3761   :  { %2707 = vrot.lane.b32.xlu1 %v2705_v5, %s4048_s29 }
0x37cb   :  { %v3027_v30 = vpop.permute.xlu1 %3026 }
0x37cc   :  { %v3029_v37 = vadd.f32 %v3027_v30, %v3019_v28 }
0x37ce   :  { %3991 = vtanh.f32 %v3029_v37 }
0x37d3   :  { %v2708_v31 = vpop.permute.xlu1 %2707 }
0x37d4   :  { %v3992_v12 = vpop.eup %3991  ;;  %2710 = vst.msk [vmem:[#allocation5 + $0xc] sm:$0x3] %vm181_vm6, %v2708_v31  ;;  %3615 = vmatmul.msk.f32.vlgmr.msra.gmra.mxu1 %vm35_vm0, %v2708_v31 }
0x37d5   :  { %3032 = vrot.lane.b32.xlu0 %v3992_v12, %s4047_s28  ;;  %3323 = vmatpush.msra.mxu1 %v4541_v39 }
0x3847   :  { %v3033_v32 = vpop.permute.xlu0 %3032 }
0x3848   :  { %v3035_v33 = vmul.f32 %v3033_v32, %v3016_v24 }
0x384a   :  { %3037 = vrot.lane.b32.xlu2 %v3035_v33, %s4048_s29 }
0x3851   :  { %v4631_v43 = vpop.f32.mrf.mxu1 }
0x38a4   :  { %v3038_v35 = vpop.permute.xlu2 %3037 }
0x38a5   :  { %3040 = vst.msk [vmem:[#allocation4 + $0x14] sm:$0x3] %vm181_vm6, %v3038_v35  ;;  %3623 = vmatmul.msk.f32.vlgmr.msrb.gmra.mxu1 %vm35_vm0, %v3038_v35 }
0x3922   :  { %v3061_v29 = vpop.f32.mrf.mxu1 }
0x3923   :  { %v3064_v36 = vadd.f32 %v3061_v29, %v3041_v18 }
0x3925   :  { %3993 = vtanh.f32 %v3064_v36  ;;  %v3624_v40 = vmul.f32 -1.442695, %v3064_v36 }
0x3927   :  { %3995 = vpow2.f32 %v3624_v40 }
0x392b   :  { %v3994_v38 = vpop.eup %3993 }
0x392c   :  { %3087 = vrot.lane.b32.xlu0 %v3994_v38, %s4045_s26 }
0x392d   :  { %v3996_v39 = vpop.eup %3995 }
0x392e   :  { %v3068_v41 = vadd.f32 1.0, %v3996_v39 }
0x3930   :  { %3997 = vrcp.f32 %v3068_v41  ;;  %v3080_v48 = vand.u32 2147483648, %v3068_v41  ;;  %vm3074_vm13 = vweird.f32 %v3068_v41  ;;  %v3078_v55 = vand.u32 2147483647, %v3068_v41 }
0x3932   :  { %v3081_v34 = vor.u32 1.1754944e-38, %v3080_v48  ;;  %vm3079_vm15 = vcmp.eq.f32.partialorder %v3078_v55, 8.507059e+37 }
0x3936   :  { %v3998_v42 = vpop.eup %3997 }
0x3937   :  { %v3070_v44 = vmul.f32 %v3998_v42, %v3068_v41  ;;  %vm3075_vm12 = vweird.f32 %v3998_v42 }
0x3938   :  { %vm3076_vm14 = vmor %vm3074_vm13, %vm3075_vm12 }
0x3939   :  { %v3071_v45 = vsub.f32 1.0, %v3070_v44 }
0x393b   :  { %v3072_v46 = vmul.f32 %v3998_v42, %v3071_v45 }
0x393d   :  { %v3073_v47 = vadd.f32 %v3998_v42, %v3072_v46 }
0x393f   :  { %v3077_v49 = vsel %vm3076_vm14, %v3998_v42, %v3073_v47 }
0x3940   :  { %v3082_v51 = vsel %vm3079_vm15, %v3081_v34, %v3077_v49 }
0x3941   :  { %v3085_v53 = vmul.f32 %v3082_v51, %v3029_v37 }
0x399e   :  { %v3088_v50 = vpop.permute.xlu0 %3087 }
0x399f   :  { %v3090_v52 = vmul.f32 %v3088_v50, %v3082_v51  ;;  %v3239_v50 = vld [vmem:[#allocation2 + $0x1c] sm:$0x3] }
0x39a1   :  { %3092 = vrot.lane.b32.xlu1 %v3090_v52, %s4046_s27 }
0x3a13   :  { %v3093_v4 = vpop.permute.xlu1 %3092 }
0x3a14   :  { %v3095_v56 = vadd.f32 %v3093_v4, %v3085_v53 }
0x3a16   :  { %3999 = vtanh.f32 %v3095_v56 }
0x3a1c   :  { %v4000_v57 = vpop.eup %3999 }
0x3a1d   :  { %3098 = vrot.lane.b32.xlu2 %v4000_v57, %s4047_s28 }
0x3a77   :  { %v3099_v58 = vpop.permute.xlu2 %3098 }
0x3a78   :  { %v3101_v59 = vmul.f32 %v3099_v58, %v3082_v51 }
0x3a7a   :  { %3103 = vrot.lane.b32.xlu0 %v3101_v59, %s4048_s29 }
0x3aec   :  { %v3104_v61 = vpop.permute.xlu0 %3103 }
0x3aed   :  { %3106 = vst.msk [vmem:[#allocation4 + $0x16] sm:$0x3] %vm181_vm6, %v3104_v61  ;;  %3625 = vmatmul.msk.f32.vlgmr.msrb.gmra.mxu0 %vm35_vm0, %v3104_v61 }
0x3b6a   :  { %v3127_v25 = vpop.f32.mrf.mxu0 }
0x3b6b   :  { %v3130_v63 = vadd.f32 %v3127_v25, %v3107_v62 }
0x3b6d   :  { %4001 = vtanh.f32 %v3130_v63  ;;  %v3626_v1 = vmul.f32 -1.442695, %v3130_v63 }
0x3b6f   :  { %4003 = vpow2.f32 %v3626_v1 }
0x3b73   :  { %v4002_v0 = vpop.eup %4001 }
0x3b74   :  { %3153 = vrot.lane.b32.xlu1 %v4002_v0, %s4045_s26 }
0x3b75   :  { %v4004_v6 = vpop.eup %4003 }
0x3b76   :  { %v3134_v7 = vadd.f32 1.0, %v4004_v6 }
0x3b78   :  { %4005 = vrcp.f32 %v3134_v7  ;;  %v3146_v13 = vand.u32 2147483648, %v3134_v7  ;;  %vm3140_vm3 = vweird.f32 %v3134_v7  ;;  %v3144_v14 = vand.u32 2147483647, %v3134_v7 }
0x3b7a   :  { %v3147_v17 = vor.u32 1.1754944e-38, %v3146_v13  ;;  %vm3145_vm5 = vcmp.eq.f32.partialorder %v3144_v14, 8.507059e+37  ;;  %v2777_v13 = vld [vmem:[#allocation3 + $0xe] sm:$0x3] }
0x3b7b   :  { %v2800_v14 = vadd.f32 %v4631_v43, %v2777_v13  ;;  %v3373_v13 = vld [vmem:[#allocation4] ss:$2 sm:$0xff] }
0x3b7e   :  { %v4006_v8 = vpop.eup %4005 }
0x3b7f   :  { %v3136_v3 = vmul.f32 %v4006_v8, %v3134_v7  ;;  %vm3141_vm2 = vweird.f32 %v4006_v8 }
0x3b80   :  { %vm3142_vm4 = vmor %vm3140_vm3, %vm3141_vm2 }
0x3b81   :  { %v3137_v10 = vsub.f32 1.0, %v3136_v3 }
0x3b83   :  { %v3138_v16 = vmul.f32 %v4006_v8, %v3137_v10 }
0x3b85   :  { %v3139_v11 = vadd.f32 %v4006_v8, %v3138_v16 }
0x3b87   :  { %v3143_v15 = vsel %vm3142_vm4, %v4006_v8, %v3139_v11 }
0x3b88   :  { %v3148_v19 = vsel %vm3145_vm5, %v3147_v17, %v3143_v15 }
0x3b89   :  { %v3151_v20 = vmul.f32 %v3148_v19, %v3095_v56 }
0x3be6   :  { %v3154_v2 = vpop.permute.xlu1 %3153 }
0x3be7   :  { %v3156_v54 = vmul.f32 %v3154_v2, %v3148_v19 }
0x3be9   :  { %3158 = vrot.lane.b32.xlu2 %v3156_v54, %s4046_s27 }
0x3c43   :  { %v3159_v21 = vpop.permute.xlu2 %3158 }
0x3c44   :  { %v3161_v60 = vadd.f32 %v3159_v21, %v3151_v20  ;;  %v3616_v20 = vmul.f32 -1.442695, %v2800_v14 }
0x3c46   :  { %4007 = vtanh.f32 %v3161_v60 }
0x3c4c   :  { %v4008_v22 = vpop.eup %4007 }
0x3c4d   :  { %3164 = vrot.lane.b32.xlu0 %v4008_v22, %s4047_s28 }
0x3cbf   :  { %v3165_v23 = vpop.permute.xlu0 %3164 }
0x3cc0   :  { %v3167_v24 = vmul.f32 %v3165_v23, %v3148_v19 }
0x3cc2   :  { %3169 = vrot.lane.b32.xlu1 %v3167_v24, %s4048_s29  ;;  %v3305_v24 = vld [vmem:[#allocation2 + $0x1e] sm:$0x3] }
0x3d34   :  { %v3170_v26 = vpop.permute.xlu1 %3169 }
0x3d35   :  { %3172 = vst.msk [vmem:[#allocation4 + $0x18] sm:$0x3] %vm181_vm6, %v3170_v26  ;;  %3627 = vmatmul.msk.f32.vlgmr.msra.gmra.mxu2 %vm35_vm0, %v3170_v26 }
0x3db8   :  { %v3193_v5 = vpop.f32.mrf.mxu2 }
0x3db9   :  { %v3196_v28 = vadd.f32 %v3193_v5, %v3173_v27 }
0x3dbb   :  { %4009 = vtanh.f32 %v3196_v28  ;;  %v3628_v37 = vmul.f32 -1.442695, %v3196_v28 }
0x3dbd   :  { %4011 = vpow2.f32 %v3628_v37 }
0x3dc1   :  { %v4010_v30 = vpop.eup %4009 }
0x3dc2   :  { %3219 = vrot.lane.b32.xlu2 %v4010_v30, %s4045_s26 }
0x3dc3   :  { %v4012_v31 = vpop.eup %4011 }
0x3dc4   :  { %v3200_v12 = vadd.f32 1.0, %v4012_v31 }
0x3dc6   :  { %4013 = vrcp.f32 %v3200_v12  ;;  %v3212_v36 = vand.u32 2147483648, %v3200_v12  ;;  %vm3206_vm8 = vweird.f32 %v3200_v12  ;;  %v3210_v38 = vand.u32 2147483647, %v3200_v12 }
0x3dc8   :  { %v3213_v39 = vor.u32 1.1754944e-38, %v3212_v36  ;;  %vm3211_vm10 = vcmp.eq.f32.partialorder %v3210_v38, 8.507059e+37 }
0x3dcc   :  { %v4014_v32 = vpop.eup %4013 }
0x3dcd   :  { %v3202_v33 = vmul.f32 %v4014_v32, %v3200_v12  ;;  %vm3207_vm7 = vweird.f32 %v4014_v32 }
0x3dce   :  { %vm3208_vm9 = vmor %vm3206_vm8, %vm3207_vm7 }
0x3dcf   :  { %v3203_v35 = vsub.f32 1.0, %v3202_v33 }
0x3dd1   :  { %v3204_v18 = vmul.f32 %v4014_v32, %v3203_v35 }
0x3dd3   :  { %v3205_v29 = vadd.f32 %v4014_v32, %v3204_v18 }
0x3dd5   :  { %v3209_v40 = vsel %vm3208_vm9, %v4014_v32, %v3205_v29 }
0x3dd6   :  { %v3214_v42 = vsel %vm3211_vm10, %v3213_v39, %v3209_v40 }
0x3dd7   :  { %v3217_v45 = vmul.f32 %v3214_v42, %v3161_v60 }
0x3e1c   :  { %v3220_v41 = vpop.permute.xlu2 %3219 }
0x3e1d   :  { %v3222_v44 = vmul.f32 %v3220_v41, %v3214_v42 }
0x3e1f   :  { %3224 = vrot.lane.b32.xlu0 %v3222_v44, %s4046_s27 }
0x3e91   :  { %v3225_v46 = vpop.permute.xlu0 %3224 }
0x3e92   :  { %v3227_v47 = vadd.f32 %v3225_v46, %v3217_v45 }
0x3e94   :  { %4015 = vtanh.f32 %v3227_v47 }
0x3e9a   :  { %v4016_v48 = vpop.eup %4015 }
0x3e9b   :  { %3230 = vrot.lane.b32.xlu1 %v4016_v48, %s4047_s28 }
0x3f0d   :  { %v3231_v55 = vpop.permute.xlu1 %3230 }
0x3f0e   :  { %v3233_v49 = vmul.f32 %v3231_v55, %v3214_v42 }
0x3f10   :  { %3235 = vrot.lane.b32.xlu2 %v3233_v49, %s4048_s29 }
0x3f6a   :  { %v3236_v34 = vpop.permute.xlu2 %3235 }
0x3f6b   :  { %3238 = vst.msk [vmem:[#allocation4 + $0x1a] sm:$0x3] %vm181_vm6, %v3236_v34  ;;  %3629 = vmatmul.msk.f32.vlgmr.msrb.gmra.mxu3 %vm35_vm0, %v3236_v34 }
0x3fee   :  { %v3259_v51 = vpop.f32.mrf.mxu3 }
0x3fef   :  { %v3262_v52 = vadd.f32 %v3259_v51, %v3239_v50 }
0x3ff1   :  { %4017 = vtanh.f32 %v3262_v52  ;;  %v3630_v4 = vmul.f32 -1.442695, %v3262_v52 }
0x3ff3   :  { %4019 = vpow2.f32 %v3630_v4 }
0x3ff7   :  { %v4018_v53 = vpop.eup %4017 }
0x3ff8   :  { %3285 = vrot.lane.b32.xlu0 %v4018_v53, %s4045_s26 }
0x3ff9   :  { %v4020_v56 = vpop.eup %4019 }
0x3ffa   :  { %v3266_v57 = vadd.f32 1.0, %v4020_v56 }
0x3ffc   :  { %4021 = vrcp.f32 %v3266_v57  ;;  %v3278_v63 = vand.u32 2147483648, %v3266_v57  ;;  %vm3272_vm12 = vweird.f32 %v3266_v57  ;;  %v3276_v0 = vand.u32 2147483647, %v3266_v57 }
0x3ffe   :  { %v3279_v6 = vor.u32 1.1754944e-38, %v3278_v63  ;;  %vm3277_vm14 = vcmp.eq.f32.partialorder %v3276_v0, 8.507059e+37  ;;  %v3372_v0 = vld [vmem:[%s4720_s4 + $0x8] sm:$0xff] }
0x4002   :  { %v4022_v58 = vpop.eup %4021 }
0x4003   :  { %v3268_v59 = vmul.f32 %v4022_v58, %v3266_v57  ;;  %vm3273_vm1 = vweird.f32 %v4022_v58 }
0x4004   :  { %vm3274_vm13 = vmor %vm3272_vm12, %vm3273_vm1 }
0x4005   :  { %v3269_v61 = vsub.f32 1.0, %v3268_v59 }
0x4007   :  { %v3270_v62 = vmul.f32 %v4022_v58, %v3269_v61 }
0x4009   :  { %v3271_v25 = vadd.f32 %v4022_v58, %v3270_v62 }
0x400b   :  { %v3275_v1 = vsel %vm3274_vm13, %v4022_v58, %v3271_v25 }
0x400c   :  { %v3280_v8 = vsel %vm3277_vm14, %v3279_v6, %v3275_v1 }
0x400d   :  { %v3283_v10 = vmul.f32 %v3280_v8, %v3227_v47 }
0x406a   :  { %v3286_v7 = vpop.permute.xlu0 %3285 }
0x406b   :  { %v3288_v3 = vmul.f32 %v3286_v7, %v3280_v8 }
0x406d   :  { %3290 = vrot.lane.b32.xlu1 %v3288_v3, %s4046_s27 }
0x40df   :  { %v3291_v16 = vpop.permute.xlu1 %3290 }
0x40e0   :  { %v4653_v11 = vadd.f32 %v3291_v16, %v3283_v10 }
0x40e2   :  { %4023 = vtanh.f32 %v4653_v11 }
0x40e3   :  { %4025 = vtanh.f32 %v2800_v14  ;;  %v3454_v14 = vld [vmem:[#allocation4 + $0x1] ss:$2 sm:$0xff] }
0x40e4   :  { %4027 = vpow2.f32 %v3616_v20 }
0x40e8   :  { %v4024_v15 = vpop.eup %4023 }
0x40e9   :  { %3296 = vrot.lane.b32.xlu2 %v4024_v15, %s4047_s28  ;;  %v4026_v17 = vpop.eup %4025 }
0x40ea   :  { %v4028_v21 = vpop.eup %4027 }
0x40eb   :  { %v2804_v43 = vadd.f32 1.0, %v4028_v21 }
0x40ed   :  { %4029 = vrcp.f32 %v2804_v43  ;;  %v2816_v37 = vand.u32 2147483648, %v2804_v43  ;;  %vm2810_vm2 = vweird.f32 %v2804_v43  ;;  %v2814_v31 = vand.u32 2147483647, %v2804_v43 }
0x40ef   :  { %v2817_v32 = vor.u32 1.1754944e-38, %v2816_v37  ;;  %vm2815_vm4 = vcmp.eq.f32.partialorder %v2814_v31, 8.507059e+37 }
0x40f1   :  { %2823 = vrot.lane.b32.xlu2 %v4026_v17, %s4045_s26 }
0x40f3   :  { %v4030_v60 = vpop.eup %4029 }
0x40f4   :  { %v2806_v22 = vmul.f32 %v4030_v60, %v2804_v43  ;;  %vm2811_vm15 = vweird.f32 %v4030_v60 }
0x40f5   :  { %vm2812_vm3 = vmor %vm2810_vm2, %vm2811_vm15 }
0x40f6   :  { %v2807_v23 = vsub.f32 1.0, %v2806_v22 }
0x40f8   :  { %v2808_v5 = vmul.f32 %v4030_v60, %v2807_v23 }
0x40fa   :  { %v2809_v28 = vadd.f32 %v4030_v60, %v2808_v5 }
0x40fc   :  { %v2813_v12 = vsel %vm2812_vm3, %v4030_v60, %v2809_v28 }
0x40fd   :  { %v2818_v35 = vsel %vm2815_vm4, %v2817_v32, %v2813_v12 }
0x40fe   :  { %v2821_v50 = vmul.f32 %v2818_v35, %v4616_v9  ;;  %v3371_v9 = vld [vmem:[%s4720_s4] sm:$0xff] }
0x4143   :  { %v3297_v2 = vpop.permute.xlu2 %3296 }
0x4144   :  { %v3299_v19 = vmul.f32 %v3297_v2, %v3280_v8  ;;  %v4049_v8 = vmov 24  }
0x4145   :  { %3652 = vset.pattern.permute.xlu0 %v4049_v8  ;;  %3651 = vset.pattern.permute.xlu2 %v4049_v8 }
0x4146   :  { %3301 = vrot.lane.b32.xlu0 %v3299_v19, %s4048_s29 }
0x414b   :  { %v2824_v33 = vpop.permute.xlu2 %2823 }
0x414c   :  { %v2826_v18 = vmul.f32 %v2824_v33, %v2818_v35 }
0x41b8   :  { %v3302_v54 = vpop.permute.xlu0 %3301 }
0x41b9   :  { %3304 = vst.msk [vmem:[#allocation4 + $0x1c] sm:$0x3] %vm181_vm6, %v3302_v54  ;;  %3631 = vmatmul.msk.f32.vlgmr.msra.gmra.mxu1 %vm35_vm0, %v3302_v54  ;;  %v3641_v54 = vld [vmem:[%s4721_s2 + $0x10] sm:$0xff] }
0x4236   :  { %v3325_v26 = vpop.f32.mrf.mxu1 }
0x4237   :  { %v3328_v27 = vadd.f32 %v3325_v26, %v3305_v24  ;;  %v3447_v24 = vld [vmem:[%s4721_s2] sm:$0xff] }
0x4239   :  { %4031 = vtanh.f32 %v3328_v27  ;;  %v3632_v29 = vmul.f32 -1.442695, %v3328_v27 }
0x423b   :  { %4033 = vpow2.f32 %v3632_v29 }
0x423f   :  { %v4032_v30 = vpop.eup %4031 }
0x4240   :  { %3351 = vrot.lane.b32.xlu1 %v4032_v30, %s4045_s26  ;;  %v3642_v30 = vld [vmem:[%s4721_s2 + $0x18] sm:$0xff] }
0x4241   :  { %v4034_v36 = vpop.eup %4033 }
0x4242   :  { %v3332_v38 = vadd.f32 1.0, %v4034_v36 }
0x4244   :  { %4035 = vrcp.f32 %v3332_v38  ;;  %v3344_v45 = vand.u32 2147483648, %v3332_v38  ;;  %vm3338_vm7 = vweird.f32 %v3332_v38  ;;  %v3342_v46 = vand.u32 2147483647, %v3332_v38 }
0x4246   :  { %v3345_v48 = vor.u32 1.1754944e-38, %v3344_v45  ;;  %vm3343_vm9 = vcmp.eq.f32.partialorder %v3342_v46, 8.507059e+37 }
0x4248   :  { %2828 = vrot.lane.b32.xlu1 %v2826_v18, %s4046_s27  ;;  %v3448_v18 = vld [vmem:[%s4721_s2 + $0x8] sm:$0xff] }
0x424a   :  { %v4036_v40 = vpop.eup %4035 }
0x424b   :  { %v3334_v39 = vmul.f32 %v4036_v40, %v3332_v38  ;;  %vm3339_vm5 = vweird.f32 %v4036_v40 }
0x424c   :  { %vm3340_vm8 = vmor %vm3338_vm7, %vm3339_vm5 }
0x424d   :  { %v3335_v41 = vsub.f32 1.0, %v3334_v39 }
0x424f   :  { %v3336_v42 = vmul.f32 %v4036_v40, %v3335_v41 }
0x4251   :  { %v3337_v44 = vadd.f32 %v4036_v40, %v3336_v42 }
0x4253   :  { %v3341_v47 = vsel %vm3340_vm8, %v4036_v40, %v3337_v44 }
0x4254   :  { %v3346_v49 = vsel %vm3343_vm9, %v3345_v48, %v3341_v47 }
0x4255   :  { %v3349_v4 = vmul.f32 %v3346_v49, %v4653_v11 }
0x42b2   :  { %v3352_v55 = vpop.permute.xlu1 %3351 }
0x42b3   :  { %v3354_v34 = vmul.f32 %v3352_v55, %v3346_v49 }
0x42b5   :  { %3356 = vrot.lane.b32.xlu0 %v3354_v34, %s4046_s27 }
0x42ba   :  { %v2829_v51 = vpop.permute.xlu1 %2828 }
0x42bb   :  { %v2831_v52 = vadd.f32 %v2829_v51, %v2821_v50 }
0x42bd   :  { %4037 = vtanh.f32 %v2831_v52 }
0x42c3   :  { %v4038_v53 = vpop.eup %4037 }
0x42c4   :  { %2834 = vrot.lane.b32.xlu0 %v4038_v53, %s4047_s28 }
0x42cc   :  { %3379 = vrot.lane.b32.xlu0 %v3371_v9, %s4045_s26 }
0x42d4   :  { %3442 = vperm.xlu0 %3652, %v3372_v0  }
0x4327   :  { %v3357_v56 = vpop.permute.xlu0 %3356 }
0x4328   :  { %v3359_v57 = vadd.f32 %v3357_v56, %v3349_v4 }
0x432a   :  { %4039 = vtanh.f32 %v3359_v57 }
0x4330   :  { %v4040_v58 = vpop.eup %4039 }
0x4331   :  { %3362 = vrot.lane.b32.xlu2 %v4040_v58, %s4047_s28 }
0x4336   :  { %v2835_v59 = vpop.permute.xlu0 %2834 }
0x4337   :  { %v2837_v61 = vmul.f32 %v2835_v59, %v2818_v35 }
0x4339   :  { %2839 = vrot.lane.b32.xlu2 %v2837_v61, %s4048_s29 }
0x433e   :  { %v3380_v7 = vpop.permute.xlu0 %3379 }
0x4341   :  { %3438 = vperm.xlu2 %3651, %v3371_v9  }
0x4346   :  { %v3443_v26 = vpop.permute.xlu0 %3442 }
0x438b   :  { %v3363_v62 = vpop.permute.xlu2 %3362 }
0x438c   :  { %v3365_v25 = vmul.f32 %v3363_v62, %v3346_v49 }
0x438e   :  { %3367 = vrot.lane.b32.xlu1 %v3365_v25, %s4048_s29 }
0x4393   :  { %v2840_v63 = vpop.permute.xlu2 %2839 }
0x4394   :  { %2842 = vst.msk [vmem:[#allocation5 + $0xe] sm:$0x3] %vm181_vm6, %v2840_v63 }
0x4396   :  { %3381 = vrot.lane.b32.xlu1 %v3372_v0, %s4045_s26 }
0x439b   :  { %v3376_v1 = vld [vmem:[#allocation5] ss:$2 sm:$0xff]  ;;  %v3458_v6 = vld [vmem:[#allocation5 + $0x1] ss:$2 sm:$0xff]  ;;  %v3439_v17 = vpop.permute.xlu2 %3438 }
0x439c   :  { %3402 = vmatpush.msra.mxu0 %v3376_v1  ;;  %3474 = vmatpush.msra.mxu3 %v3458_v6 }
0x439d   :  { %3633 = vmatmul.msk.f32.vlgmr.msra.gmra.mxu0 %vm35_vm0, %v3380_v7  ;;  %3637 = vmatmul.msk.f32.vlgmr.msra.gmra.mxu3 %vm35_vm0, %v3380_v7 }
0x4400   :  { %v3368_v3 = vpop.permute.xlu1 %3367 }
0x4401   :  { %3370 = vst.msk [vmem:[#allocation4 + $0x1e] sm:$0x3] %vm181_vm6, %v3368_v3 }
0x4408   :  { %v3375_v10 = vld [vmem:[#allocation4 + $0x10] ss:$2 sm:$0xff]  ;;  %v3456_v16 = vld [vmem:[#allocation4 + $0x11] ss:$2 sm:$0xff]  ;;  %v3382_v11 = vpop.permute.xlu1 %3381 }
0x4409   :  { %3428 = vmatpush.msrb.mxu2 %v3375_v10  ;;  %3496 = vmatpush.msrb.mxu1 %v3456_v16 }
0x440a   :  { %3634 = vmatmul.msk.f32.gmra.mxu0 %vm35_vm0, %v3382_v11  ;;  %3638 = vmatmul.msk.f32.gmra.mxu3 %vm35_vm0, %v3382_v11 }
0x440b   :  { %3429 = vmatpush.msrb.mxu2 %v3373_v13  ;;  %3497 = vmatpush.msrb.mxu1 %v3454_v14 }
0x440c   :  { %3635 = vmatmul.msk.f32.vlgmr.msrb.gmra.mxu2 %vm83_vm11, %v3371_v9  ;;  %3639 = vmatmul.msk.f32.vlgmr.msrb.gmra.mxu1 %vm83_vm11, %v3371_v9 }
0x4414   :  { %3636 = vmatmul.msk.f32.gmra.mxu2 %vm83_vm11, %v3372_v0  ;;  %3640 = vmatmul.msk.f32.gmra.mxu1 %vm83_vm11, %v3372_v0 }
0x441a   :  { %v3404_v21 = vpop.f32.mrf.mxu0 }
0x4420   :  { %v3476_v15 = vpop.f32.mrf.mxu3 }
0x4487   :  { %v3407_v32 = vpop.f32.mrf.mxu0 }
0x4489   :  { %v3499_v2 = vpop.f32.mrf.mxu1 }
0x448a   :  { %v3500_v19 = vadd.f32 %v3499_v2, %v3476_v15 }
0x448c   :  { %v3505_v20 = vadd.f32 %v3500_v19, %v3439_v17 }
0x448d   :  { %v3479_v22 = vpop.f32.mrf.mxu3 }
0x448e   :  { %v3510_v43 = vadd.f32 %v3641_v54, %v3505_v20 }
0x448f   :  { %v3431_v60 = vpop.f32.mrf.mxu2 }
0x4490   :  { %v3432_v23 = vadd.f32 %v3431_v60, %v3404_v21  ;;  %3643 = vst.msk [vmem:[%s4722_s5 + $0x10] sm:$0xff] %vm35_vm0, %v3510_v43 }
0x4491   :  { %v3502_v27 = vpop.f32.mrf.mxu1 }
0x4492   :  { %v3445_v5 = vadd.f32 %v3439_v17, %v3432_v23  ;;  %v3503_v28 = vadd.f32 %v3502_v27, %v3479_v22 }
0x4494   :  { %v3449_v37 = vadd.f32 %v3447_v24, %v3445_v5  ;;  %v3506_v31 = vadd.f32 %v3503_v28, %v3443_v26 }
0x4496   :  { %3451 = vst.msk [vmem:[%s4722_s5] sm:$0xff] %vm35_vm0, %v3449_v37  ;;  %v3511_v12 = vadd.f32 %v3642_v30, %v3506_v31 }
0x4497   :  { %v3434_v33 = vpop.f32.mrf.mxu2 }
0x4498   :  { %v3435_v35 = vadd.f32 %v3434_v33, %v3407_v32  ;;  %3644 = vst.msk [vmem:[%s4722_s5 + $0x18] sm:$0xff] %vm35_vm0, %v3511_v12 }
0x449a   :  { %v3446_v29 = vadd.f32 %v3443_v26, %v3435_v35 }
0x449c   :  { %v3450_v36 = vadd.f32 %v3448_v18, %v3446_v29 }
0x449e   :  { %3452 = vst.msk [vmem:[%s4722_s5 + $0x8] sm:$0xff] %vm35_vm0, %v3450_v36 }

</bundles_post_ra>
